<compile_context>
chip_gen: v5e
topology: v5e:2x2
jax: 0.10.0
libtpu: 0.0.40
codegen_flags: <defaults>
</compile_context>

<pallas_src>
import functools

import jax
import jax.numpy as jnp
import numpy as np
from jax.experimental import pallas as pl
from jax.experimental.pallas import tpu as pltpu


_CONV_DIMS = [(1, 64), (64, 128), (128, 256), (256, 256),
              (256, 128), (128, 64), (64, 1)]
# (Cin_padded, Cout) of the 5 MXU middle layers (layer-1 Cin padded 64 -> 128).
_MID_DIMS = ((128, 128), (128, 256), (256, 256), (256, 128), (128, 64))
# per-layer-input scratch channel counts: signal, layer1..5 inputs, layer6 input
_SCRATCH_CH = (1,) + tuple(cp for cp, _ in _MID_DIMS) + (64,)
_KSIZE = 5
_PAD = (_KSIZE - 1) // 2
_BIAS_PAD = 256
_ORDER = 2
_N_DIM = 1
_N_IV = 1
_STEP_SIZE = 0.1

# Storage dtype of middle-layer weights AND middle-layer activation scratch.
# bf16 inputs + f32 MXU accumulation is native on v5e/v6e/v7x and halves the
# dominant weight-DMA bytes.  Set to jnp.float32 for bit-closer parity with the
# f32 PyTorch reference (~1e-3 relative deviation in bf16).
_MXU_DTYPE = jnp.bfloat16


# ----------------------------------------------------------------------------
# Numerics helpers (only ops guaranteed to lower in Mosaic).
# ----------------------------------------------------------------------------
def _expm1(x):
    # Kahan's exp/log correction: accurate expm1 using only exp/log/div/where.
    # (jnp.expm1 could replace this if/when Mosaic lowers lax.expm1 natively.)
    u = jnp.exp(x)
    y = jnp.where(u == 1.0, x, (u - 1.0) * x / jnp.log(u))
    return jnp.where(u == 0.0, -1.0, y)


def _elu(x):
    # ELU(alpha=1).  expm1 is evaluated on min(x, 0) so the unselected branch
    # never produces inf/nan for large positive activations.
    return jnp.where(x > 0, x, _expm1(jnp.minimum(x, 0.0)))


# ----------------------------------------------------------------------------
# Fused 7-layer Conv1d(k=5, same padding) + ELU kernel (single invocation).
# ----------------------------------------------------------------------------
def _fused_cf_cnn_kernel(x_ref, w1_ref, w2_ref, w3_ref, w4_ref, w5_ref,
                         sw_ref, bias_ref, o_ref,
                         b0, b1, b2, b3, b4, b5, b6, *, B, L):
    K, PAD = _KSIZE, _PAD

    # ---- one-time init: zero every padded scratch (pad rows + channel pad) ----
    for buf in (b0, b1, b2, b3, b4, b5, b6):
        buf[...] = jnp.zeros_like(buf)
    b0[:, PAD:PAD + L, :] = x_ref[...]            # place the (B, L, 1) signal

    sw = sw_ref[...]       # (2, K, 64) f32: [0] = layer-0 weight, [1] = layer-6
    bv = bias_ref[...]     # (7, 256) f32 bias table (row li, lanes 0:Cout_li)

    # ---- layer 0 (Cin=1): VPU broadcast MACs + ELU -> bf16 scratch ----------
    pv = b0[...]                                   # (B, L+2P, 1) f32
    acc = pv[:, 0:L, :] * sw[0, 0]                 # (B,L,1)*(64,) -> (B,L,64)
    for k in range(1, K):
        acc = acc + pv[:, k:k + L, :] * sw[0, k]
    acc = acc + bv[0, 0:64]
    b1[:, PAD:PAD + L, 0:64] = _elu(acc).astype(b1.dtype)   # lanes 64:128 stay 0

    # ---- layers 1..5: K-folded im2col + ONE MXU dot per layer ---------------
    mids = ((w1_ref, b1, b2), (w2_ref, b2, b3), (w3_ref, b3, b4),
            (w4_ref, b4, b5), (w5_ref, b5, b6))
    for li, (w_ref, in_buf, out_buf) in enumerate(mids, start=1):
        cin_p = in_buf.shape[2]
        cout = w_ref.shape[1]
        pv = in_buf[...]                                          # (B, L+2P, cin_p)
        im2col = jnp.concatenate([pv[:, k:k + L, :] for k in range(K)],
                                 axis=-1).reshape(B * L, K * cin_p)
        acc = jnp.dot(im2col, w_ref[...],
                      preferred_element_type=jnp.float32)         # (B*L, cout) f32
        acc = acc + bv[li, 0:cout]
        out_buf[:, PAD:PAD + L, 0:cout] = (
            _elu(acc).astype(out_buf.dtype).reshape(B, L, cout))

    # ---- layer 6 (Cout=1): VPU MACs + lane reduction, no trailing ELU -------
    pv = b6[...].astype(jnp.float32)               # (B, L+2P, 64)
    prod = pv[:, 0:L, :] * sw[1, 0]
    for k in range(1, K):
        prod = prod + pv[:, k:k + L, :] * sw[1, k]
    out = jnp.sum(prod, axis=-1) + bv[6, 0:1]      # (B, L)
    o_ref[...] = out.astype(o_ref.dtype)


def cf_cnn_fused(y, w_mid, small_w, bias):
    """Fused 7-layer Conv1d(k=5, same padding) + ELU stack.

    y: (B, L) f32 signal  ->  (B, L) f32 (the conv stack's single out channel).
    Single kernel invocation (no grid): weights are fetched into VMEM once and
    every array uses the default whole-array VMEM BlockSpec — at B=2, L=16 the
    kernel is weight-DMA bound, so splitting the batch would only re-fetch
    weights.  Total VMEM footprint (~1.6 MB weights + <100 KB scratch) is far
    under the default scoped limit on v5e/v6e/v7x.
    """
    B, L = y.shape
    Lp = L + 2 * _PAD
    kernel = functools.partial(_fused_cf_cnn_kernel, B=B, L=L)
    return pl.pallas_call(
        kernel,
        out_shape=jax.ShapeDtypeStruct((B, L), jnp.float32),
        scratch_shapes=[
            pltpu.VMEM((B, Lp, c), jnp.float32 if c == 1 else _MXU_DTYPE)
            for c in _SCRATCH_CH
        ],
    )(y[:, :, None], *w_mid, small_w, bias)


# ----------------------------------------------------------------------------
# Deterministic parameter init + packing (shapes from ComplexModel.__init__).
# ----------------------------------------------------------------------------
def init_params(key, n_step):
    """Generates ComplexModel parameters and packs the conv stack for the fused
    kernel.  Conv weights are generated directly in (K, Cin, Cout) layout; real
    torch Conv1d weights (Cout, Cin, K) would need w.transpose(2, 1, 0) first."""
    raw = []
    for cin, cout in _CONV_DIMS:
        key, kw, kb = jax.random.split(key, 3)
        bound = 1.0 / np.sqrt(cin * _KSIZE)     # PyTorch default conv init range
        w = jax.random.uniform(kw, (_KSIZE, cin, cout), jnp.float32, -bound, bound)
        b = jax.random.uniform(kb, (cout,), jnp.float32, -bound, bound)
        raw.append((w, b))

    params = {}
    # Layers 0 and 6 run on the VPU: both small weights in one (2, K, 64) f32 blob.
    params["small_w"] = jnp.stack([raw[0][0].reshape(_KSIZE, 64),
                                   raw[6][0].reshape(_KSIZE, 64)])

    # Layers 1-5 run on the MXU: im2col-fold to (K*Cin_pad, Cout) bf16.
    # Layer-1 Cin zero-padded 64 -> 128 keeps the in-kernel lane concat aligned.
    w_mid = []
    for li in range(1, 6):
        w = raw[li][0]                          # (K, Cin, Cout)
        cin_p = _MID_DIMS[li - 1][0]
        if w.shape[1] < cin_p:
            w = jnp.pad(w, ((0, 0), (0, cin_p - w.shape[1]), (0, 0)))
        w_mid.append(w.reshape(_KSIZE * cin_p, w.shape[2]).astype(_MXU_DTYPE))
    params["w_mid"] = w_mid

    # All 7 biases in one (7, 256) f32 table (one DMA instead of 7 tiny ones).
    bias = jnp.zeros((len(_CONV_DIMS), _BIAS_PAD), jnp.float32)
    for li, (_, b) in enumerate(raw):
        bias = bias.at[li, :b.shape[0]].set(b)
    params["bias"] = bias

    key, kc, kp = jax.random.split(key, 3)
    params["coeffs"] = jax.random.normal(kc, (_ORDER + 1,), jnp.float32)
    params["param_in"] = jax.random.normal(kp, (1, 64), jnp.float32)  # unused in forward (as in PyTorch)
    params["iv_rhs"] = jnp.zeros((_N_DIM, _N_IV), jnp.float32)
    # steps = logit(step_size) so that sigmoid(steps) == step_size
    logit = float(np.log(_STEP_SIZE / (1.0 - _STEP_SIZE)))
    params["steps"] = jnp.full((1, n_step - 1, _N_DIM), logit, jnp.float32)
    return params


# ----------------------------------------------------------------------------
# Forward pass (mirrors ComplexModel.forward up to the ODEINDLayer call).
# ----------------------------------------------------------------------------
def complex_model_forward(y, params):
    bs, n_step = y.shape

    # cf_cnn on y.view(bs, 1, -1) — one fused Pallas kernel, batch folded in.
    rhs = cf_cnn_fused(y, params["w_mid"], params["small_w"], params["bias"])
    rhs = rhs[:, None, :]                                     # (bs, n_dim, n_step)

    coeffs = jnp.broadcast_to(params["coeffs"][None, None, None, :],
                              (bs, _N_DIM, n_step, _ORDER + 1))
    iv_rhs = jnp.tile(params["iv_rhs"][None], (bs, 1, 1))          # (bs, 1, 1)
    steps = jnp.tile(jax.nn.sigmoid(params["steps"]), (bs, 1, 1))  # (bs, n_step-1, 1)

    # TODO(synk): ODEINDLayer (external constrained linear-ODE solver producing
    # u0, u1, u2, eps) is not defined in the provided module source; its
    # QP/least-squares solve is not reproduced here.
    return rhs, coeffs, iv_rhs, steps


if __name__ == "__main__":
    bs = 2
    n_step = 16   # small sequence length (global_len * step_size / step_size)

    key = jax.random.PRNGKey(0)
    key, ky = jax.random.split(key)
    y = jax.random.normal(ky, (bs, n_step), jnp.float32)

    params = init_params(key, n_step)

    fwd = jax.jit(complex_model_forward)
    rhs, coeffs, iv_rhs, steps = fwd(y, params)
    jax.block_until_ready((rhs, coeffs, iv_rhs, steps))

    assert rhs.shape == (bs, _N_DIM, n_step)
    assert coeffs.shape == (bs, _N_DIM, n_step, _ORDER + 1)
    assert iv_rhs.shape == (bs, _N_DIM, _N_IV)
    assert steps.shape == (bs, n_step - 1, _N_DIM)
    assert bool(jnp.all(jnp.isfinite(rhs)))

    print("KERNEL_OK")
</pallas_src>

<mosaic_0001>
module attributes {stable_mosaic.version = 11 : i64} {
  func.func @_fused_cf_cnn_kernel(%arg0: memref<2x16x1xf32, #tpu.memory_space<vmem>>, %arg1: memref<640x128xbf16, #tpu.memory_space<vmem>>, %arg2: memref<640x256xbf16, #tpu.memory_space<vmem>>, %arg3: memref<1280x256xbf16, #tpu.memory_space<vmem>>, %arg4: memref<1280x128xbf16, #tpu.memory_space<vmem>>, %arg5: memref<640x64xbf16, #tpu.memory_space<vmem>>, %arg6: memref<2x5x64xf32, #tpu.memory_space<vmem>>, %arg7: memref<7x256xf32, #tpu.memory_space<vmem>>, %arg8: memref<2x16xf32, #tpu.memory_space<vmem>>, %arg9: memref<2x20x1xf32, #tpu.memory_space<vmem>>, %arg10: memref<2x20x128xbf16, #tpu.memory_space<vmem>>, %arg11: memref<2x20x128xbf16, #tpu.memory_space<vmem>>, %arg12: memref<2x20x256xbf16, #tpu.memory_space<vmem>>, %arg13: memref<2x20x256xbf16, #tpu.memory_space<vmem>>, %arg14: memref<2x20x128xbf16, #tpu.memory_space<vmem>>, %arg15: memref<2x20x64xbf16, #tpu.memory_space<vmem>>) attributes {dimension_semantics = [], scalar_prefetch = 0 : i64, scratch_operands = 7 : i64, tpu.core_type = #tpu.core_type<tc>} {
    %cst = arith.constant 0.000000e+00 : f32
    %0 = vector.broadcast %cst : f32 to vector<2x20x1xf32>
    %c0 = arith.constant 0 : index
    %c0_0 = arith.constant 0 : index
    %c0_1 = arith.constant 0 : index
    %1 = vector.load %arg9[%c0, %c0_0, %c0_1] : memref<2x20x1xf32, #tpu.memory_space<vmem>>, vector<2x20x1xf32>
    tpu.vector_store %arg9[%c0, %c0_0, %c0_1], %0 {strides = array<i32>} : memref<2x20x1xf32, #tpu.memory_space<vmem>>, vector<2x20x1xf32>,
    %cst_2 = arith.constant 0.000000e+00 : bf16
    %2 = vector.broadcast %cst_2 : bf16 to vector<2x20x128xbf16>
    %c0_3 = arith.constant 0 : index
    %c0_4 = arith.constant 0 : index
    %c0_5 = arith.constant 0 : index
    %3 = vector.load %arg10[%c0_3, %c0_4, %c0_5] : memref<2x20x128xbf16, #tpu.memory_space<vmem>>, vector<2x20x128xbf16>
    tpu.vector_store %arg10[%c0_3, %c0_4, %c0_5], %2 {strides = array<i32>} : memref<2x20x128xbf16, #tpu.memory_space<vmem>>, vector<2x20x128xbf16>,
    %cst_6 = arith.constant 0.000000e+00 : bf16
    %4 = vector.broadcast %cst_6 : bf16 to vector<2x20x128xbf16>
    %c0_7 = arith.constant 0 : index
    %c0_8 = arith.constant 0 : index
    %c0_9 = arith.constant 0 : index
    %5 = vector.load %arg11[%c0_7, %c0_8, %c0_9] : memref<2x20x128xbf16, #tpu.memory_space<vmem>>, vector<2x20x128xbf16>
    tpu.vector_store %arg11[%c0_7, %c0_8, %c0_9], %4 {strides = array<i32>} : memref<2x20x128xbf16, #tpu.memory_space<vmem>>, vector<2x20x128xbf16>,
    %cst_10 = arith.constant 0.000000e+00 : bf16
    %6 = vector.broadcast %cst_10 : bf16 to vector<2x20x256xbf16>
    %c0_11 = arith.constant 0 : index
    %c0_12 = arith.constant 0 : index
    %c0_13 = arith.constant 0 : index
    %7 = vector.load %arg12[%c0_11, %c0_12, %c0_13] : memref<2x20x256xbf16, #tpu.memory_space<vmem>>, vector<2x20x256xbf16>
    tpu.vector_store %arg12[%c0_11, %c0_12, %c0_13], %6 {strides = array<i32>} : memref<2x20x256xbf16, #tpu.memory_space<vmem>>, vector<2x20x256xbf16>,
    %cst_14 = arith.constant 0.000000e+00 : bf16
    %8 = vector.broadcast %cst_14 : bf16 to vector<2x20x256xbf16>
    %c0_15 = arith.constant 0 : index
    %c0_16 = arith.constant 0 : index
    %c0_17 = arith.constant 0 : index
    %9 = vector.load %arg13[%c0_15, %c0_16, %c0_17] : memref<2x20x256xbf16, #tpu.memory_space<vmem>>, vector<2x20x256xbf16>
    tpu.vector_store %arg13[%c0_15, %c0_16, %c0_17], %8 {strides = array<i32>} : memref<2x20x256xbf16, #tpu.memory_space<vmem>>, vector<2x20x256xbf16>,
    %cst_18 = arith.constant 0.000000e+00 : bf16
    %10 = vector.broadcast %cst_18 : bf16 to vector<2x20x128xbf16>
    %c0_19 = arith.constant 0 : index
    %c0_20 = arith.constant 0 : index
    %c0_21 = arith.constant 0 : index
    %11 = vector.load %arg14[%c0_19, %c0_20, %c0_21] : memref<2x20x128xbf16, #tpu.memory_space<vmem>>, vector<2x20x128xbf16>
    tpu.vector_store %arg14[%c0_19, %c0_20, %c0_21], %10 {strides = array<i32>} : memref<2x20x128xbf16, #tpu.memory_space<vmem>>, vector<2x20x128xbf16>,
    %cst_22 = arith.constant 0.000000e+00 : bf16
    %12 = vector.broadcast %cst_22 : bf16 to vector<2x20x64xbf16>
    %c0_23 = arith.constant 0 : index
    %c0_24 = arith.constant 0 : index
    %c0_25 = arith.constant 0 : index
    %13 = vector.load %arg15[%c0_23, %c0_24, %c0_25] : memref<2x20x64xbf16, #tpu.memory_space<vmem>>, vector<2x20x64xbf16>
    tpu.vector_store %arg15[%c0_23, %c0_24, %c0_25], %12 {strides = array<i32>} : memref<2x20x64xbf16, #tpu.memory_space<vmem>>, vector<2x20x64xbf16>,
    %c0_26 = arith.constant 0 : index
    %c0_27 = arith.constant 0 : index
    %c0_28 = arith.constant 0 : index
    %14 = vector.load %arg0[%c0_26, %c0_27, %c0_28] : memref<2x16x1xf32, #tpu.memory_space<vmem>>, vector<2x16x1xf32>
    %c0_29 = arith.constant 0 : index
    %c2 = arith.constant 2 : index
    %c0_30 = arith.constant 0 : index
    %15 = vector.load %arg9[%c0_29, %c2, %c0_30] : memref<2x20x1xf32, #tpu.memory_space<vmem>>, vector<2x16x1xf32>
    tpu.vector_store %arg9[%c0_29, %c2, %c0_30], %14 {strides = array<i32>} : memref<2x20x1xf32, #tpu.memory_space<vmem>>, vector<2x16x1xf32>,
    %c0_31 = arith.constant 0 : index
    %c0_32 = arith.constant 0 : index
    %c0_33 = arith.constant 0 : index
    %16 = vector.load %arg6[%c0_31, %c0_32, %c0_33] : memref<2x5x64xf32, #tpu.memory_space<vmem>>, vector<2x5x64xf32>
    %c0_34 = arith.constant 0 : index
    %c0_35 = arith.constant 0 : index
    %17 = vector.load %arg7[%c0_34, %c0_35] : memref<7x256xf32, #tpu.memory_space<vmem>>, vector<7x256xf32>
    %c0_36 = arith.constant 0 : index
    %c0_37 = arith.constant 0 : index
    %c0_38 = arith.constant 0 : index
    %18 = vector.load %arg9[%c0_36, %c0_37, %c0_38] : memref<2x20x1xf32, #tpu.memory_space<vmem>>, vector<2x20x1xf32>
    %19 = vector.extract_strided_slice %18 {offsets = [0, 0, 0], sizes = [2, 16, 1], strides = [1, 1, 1]} : vector<2x20x1xf32> to vector<2x16x1xf32>
    %20 = vector.extract_strided_slice %16 {offsets = [0, 0, 0], sizes = [1, 1, 64], strides = [1, 1, 1]} : vector<2x5x64xf32> to vector<1x1x64xf32>
    %21 = vector.shape_cast %20 : vector<1x1x64xf32> to vector<64xf32>
    %22 = vector.shape_cast %21 : vector<64xf32> to vector<1x1x64xf32>
    %23 = vector.broadcast %19 : vector<2x16x1xf32> to vector<2x16x64xf32>
    %24 = vector.broadcast %22 : vector<1x1x64xf32> to vector<2x16x64xf32>
    %25 = arith.mulf %23, %24 : vector<2x16x64xf32>
    %26 = vector.extract_strided_slice %18 {offsets = [0, 1, 0], sizes = [2, 16, 1], strides = [1, 1, 1]} : vector<2x20x1xf32> to vector<2x16x1xf32>
    %27 = vector.extract_strided_slice %16 {offsets = [0, 1, 0], sizes = [1, 1, 64], strides = [1, 1, 1]} : vector<2x5x64xf32> to vector<1x1x64xf32>
    %28 = vector.shape_cast %27 : vector<1x1x64xf32> to vector<64xf32>
    %29 = vector.shape_cast %28 : vector<64xf32> to vector<1x1x64xf32>
    %30 = vector.broadcast %26 : vector<2x16x1xf32> to vector<2x16x64xf32>
    %31 = vector.broadcast %29 : vector<1x1x64xf32> to vector<2x16x64xf32>
    %32 = arith.mulf %30, %31 : vector<2x16x64xf32>
    %33 = arith.addf %25, %32 : vector<2x16x64xf32>
    %34 = vector.extract_strided_slice %18 {offsets = [0, 2, 0], sizes = [2, 16, 1], strides = [1, 1, 1]} : vector<2x20x1xf32> to vector<2x16x1xf32>
    %35 = vector.extract_strided_slice %16 {offsets = [0, 2, 0], sizes = [1, 1, 64], strides = [1, 1, 1]} : vector<2x5x64xf32> to vector<1x1x64xf32>
    %36 = vector.shape_cast %35 : vector<1x1x64xf32> to vector<64xf32>
    %37 = vector.shape_cast %36 : vector<64xf32> to vector<1x1x64xf32>
    %38 = vector.broadcast %34 : vector<2x16x1xf32> to vector<2x16x64xf32>
    %39 = vector.broadcast %37 : vector<1x1x64xf32> to vector<2x16x64xf32>
    %40 = arith.mulf %38, %39 : vector<2x16x64xf32>
    %41 = arith.addf %33, %40 : vector<2x16x64xf32>
    %42 = vector.extract_strided_slice %18 {offsets = [0, 3, 0], sizes = [2, 16, 1], strides = [1, 1, 1]} : vector<2x20x1xf32> to vector<2x16x1xf32>
    %43 = vector.extract_strided_slice %16 {offsets = [0, 3, 0], sizes = [1, 1, 64], strides = [1, 1, 1]} : vector<2x5x64xf32> to vector<1x1x64xf32>
    %44 = vector.shape_cast %43 : vector<1x1x64xf32> to vector<64xf32>
    %45 = vector.shape_cast %44 : vector<64xf32> to vector<1x1x64xf32>
    %46 = vector.broadcast %42 : vector<2x16x1xf32> to vector<2x16x64xf32>
    %47 = vector.broadcast %45 : vector<1x1x64xf32> to vector<2x16x64xf32>
    %48 = arith.mulf %46, %47 : vector<2x16x64xf32>
    %49 = arith.addf %41, %48 : vector<2x16x64xf32>
    %50 = vector.extract_strided_slice %18 {offsets = [0, 4, 0], sizes = [2, 16, 1], strides = [1, 1, 1]} : vector<2x20x1xf32> to vector<2x16x1xf32>
    %51 = vector.extract_strided_slice %16 {offsets = [0, 4, 0], sizes = [1, 1, 64], strides = [1, 1, 1]} : vector<2x5x64xf32> to vector<1x1x64xf32>
    %52 = vector.shape_cast %51 : vector<1x1x64xf32> to vector<64xf32>
    %53 = vector.shape_cast %52 : vector<64xf32> to vector<1x1x64xf32>
    %54 = vector.broadcast %50 : vector<2x16x1xf32> to vector<2x16x64xf32>
    %55 = vector.broadcast %53 : vector<1x1x64xf32> to vector<2x16x64xf32>
    %56 = arith.mulf %54, %55 : vector<2x16x64xf32>
    %57 = arith.addf %49, %56 : vector<2x16x64xf32>
    %58 = vector.extract_strided_slice %17 {offsets = [0, 0], sizes = [1, 64], strides = [1, 1]} : vector<7x256xf32> to vector<1x64xf32>
    %59 = vector.shape_cast %58 : vector<1x64xf32> to vector<64xf32>
    %60 = vector.shape_cast %59 : vector<64xf32> to vector<1x1x64xf32>
    %61 = vector.broadcast %60 : vector<1x1x64xf32> to vector<2x16x64xf32>
    %62 = arith.addf %57, %61 : vector<2x16x64xf32>
    %cst_39 = arith.constant 0.000000e+00 : f32
    %63 = vector.broadcast %cst_39 : f32 to vector<2x16x64xf32>
    %64 = arith.cmpf ogt, %62, %63 : vector<2x16x64xf32>
    %cst_40 = arith.constant 0.000000e+00 : f32
    %65 = vector.broadcast %cst_40 : f32 to vector<2x16x64xf32>
    %66 = arith.minimumf %62, %65 : vector<2x16x64xf32>
    %67 = math.exp %66 : vector<2x16x64xf32>
    %cst_41 = arith.constant 1.000000e+00 : f32
    %68 = vector.broadcast %cst_41 : f32 to vector<2x16x64xf32>
    %69 = arith.cmpf oeq, %67, %68 : vector<2x16x64xf32>
    %cst_42 = arith.constant 1.000000e+00 : f32
    %70 = vector.broadcast %cst_42 : f32 to vector<2x16x64xf32>
    %71 = arith.subf %67, %70 : vector<2x16x64xf32>
    %72 = arith.mulf %71, %66 : vector<2x16x64xf32>
    %73 = math.log %67 : vector<2x16x64xf32>
    %74 = arith.divf %72, %73 : vector<2x16x64xf32>
    %75 = arith.select %69, %66, %74 : vector<2x16x64xi1>, vector<2x16x64xf32>
    %cst_43 = arith.constant 0.000000e+00 : f32
    %76 = vector.broadcast %cst_43 : f32 to vector<2x16x64xf32>
    %77 = arith.cmpf oeq, %67, %76 : vector<2x16x64xf32>
    %cst_44 = arith.constant -1.000000e+00 : f32
    %78 = vector.broadcast %cst_44 : f32 to vector<2x16x64xf32>
    %79 = arith.select %77, %78, %75 : vector<2x16x64xi1>, vector<2x16x64xf32>
    %80 = arith.select %64, %62, %79 : vector<2x16x64xi1>, vector<2x16x64xf32>
    %81 = arith.truncf %80 : vector<2x16x64xf32> to vector<2x16x64xbf16>
    %c0_45 = arith.constant 0 : index
    %c2_46 = arith.constant 2 : index
    %c0_47 = arith.constant 0 : index
    %82 = vector.load %arg10[%c0_45, %c2_46, %c0_47] : memref<2x20x128xbf16, #tpu.memory_space<vmem>>, vector<2x16x64xbf16>
    tpu.vector_store %arg10[%c0_45, %c2_46, %c0_47], %81 {strides = array<i32>} : memref<2x20x128xbf16, #tpu.memory_space<vmem>>, vector<2x16x64xbf16>,
    %c0_48 = arith.constant 0 : index
    %c0_49 = arith.constant 0 : index
    %c0_50 = arith.constant 0 : index
    %83 = vector.load %arg10[%c0_48, %c0_49, %c0_50] : memref<2x20x128xbf16, #tpu.memory_space<vmem>>, vector<2x20x128xbf16>
    %84 = vector.extract_strided_slice %83 {offsets = [0, 0, 0], sizes = [2, 16, 128], strides = [1, 1, 1]} : vector<2x20x128xbf16> to vector<2x16x128xbf16>
    %85 = vector.extract_strided_slice %83 {offsets = [0, 1, 0], sizes = [2, 16, 128], strides = [1, 1, 1]} : vector<2x20x128xbf16> to vector<2x16x128xbf16>
    %86 = vector.extract_strided_slice %83 {offsets = [0, 2, 0], sizes = [2, 16, 128], strides = [1, 1, 1]} : vector<2x20x128xbf16> to vector<2x16x128xbf16>
    %87 = vector.extract_strided_slice %83 {offsets = [0, 3, 0], sizes = [2, 16, 128], strides = [1, 1, 1]} : vector<2x20x128xbf16> to vector<2x16x128xbf16>
    %88 = vector.extract_strided_slice %83 {offsets = [0, 4, 0], sizes = [2, 16, 128], strides = [1, 1, 1]} : vector<2x20x128xbf16> to vector<2x16x128xbf16>
    %89 = tpu.concatenate %84, %85, %86, %87, %88 in 2 : vector<2x16x128xbf16>, vector<2x16x128xbf16>, vector<2x16x128xbf16>, vector<2x16x128xbf16>, vector<2x16x128xbf16> -> vector<2x16x640xbf16>
    %90 = vector.shape_cast %89 : vector<2x16x640xbf16> to vector<32x640xbf16>
    %c0_51 = arith.constant 0 : index
    %c0_52 = arith.constant 0 : index
    %91 = vector.load %arg1[%c0_51, %c0_52] : memref<640x128xbf16, #tpu.memory_space<vmem>>, vector<640x128xbf16>
    %cst_53 = arith.constant dense<0.000000e+00> : vector<32x128xf32>
    %92 = tpu.matmul %90, %91, %cst_53 {dimension_numbers = #tpu.dot_dimension_numbers<[1], [0], [0], [1], [0, 0, 1, 1], [], []>} : vector<32x640xbf16>, vector<640x128xbf16>, vector<32x128xf32> -> vector<32x128xf32>
    %93 = vector.extract_strided_slice %17 {offsets = [1, 0], sizes = [1, 128], strides = [1, 1]} : vector<7x256xf32> to vector<1x128xf32>
    %94 = vector.shape_cast %93 : vector<1x128xf32> to vector<128xf32>
    %95 = vector.shape_cast %94 : vector<128xf32> to vector<1x128xf32>
    %96 = vector.broadcast %95 : vector<1x128xf32> to vector<32x128xf32>
    %97 = arith.addf %92, %96 : vector<32x128xf32>
    %cst_54 = arith.constant 0.000000e+00 : f32
    %98 = vector.broadcast %cst_54 : f32 to vector<32x128xf32>
    %99 = arith.cmpf ogt, %97, %98 : vector<32x128xf32>
    %cst_55 = arith.constant 0.000000e+00 : f32
    %100 = vector.broadcast %cst_55 : f32 to vector<32x128xf32>
    %101 = arith.minimumf %97, %100 : vector<32x128xf32>
    %102 = math.exp %101 : vector<32x128xf32>
    %cst_56 = arith.constant 1.000000e+00 : f32
    %103 = vector.broadcast %cst_56 : f32 to vector<32x128xf32>
    %104 = arith.cmpf oeq, %102, %103 : vector<32x128xf32>
    %cst_57 = arith.constant 1.000000e+00 : f32
    %105 = vector.broadcast %cst_57 : f32 to vector<32x128xf32>
    %106 = arith.subf %102, %105 : vector<32x128xf32>
    %107 = arith.mulf %106, %101 : vector<32x128xf32>
    %108 = math.log %102 : vector<32x128xf32>
    %109 = arith.divf %107, %108 : vector<32x128xf32>
    %110 = arith.select %104, %101, %109 : vector<32x128xi1>, vector<32x128xf32>
    %cst_58 = arith.constant 0.000000e+00 : f32
    %111 = vector.broadcast %cst_58 : f32 to vector<32x128xf32>
    %112 = arith.cmpf oeq, %102, %111 : vector<32x128xf32>
    %cst_59 = arith.constant -1.000000e+00 : f32
    %113 = vector.broadcast %cst_59 : f32 to vector<32x128xf32>
    %114 = arith.select %112, %113, %110 : vector<32x128xi1>, vector<32x128xf32>
    %115 = arith.select %99, %97, %114 : vector<32x128xi1>, vector<32x128xf32>
    %116 = arith.truncf %115 : vector<32x128xf32> to vector<32x128xbf16>
    %117 = vector.shape_cast %116 : vector<32x128xbf16> to vector<2x16x128xbf16>
    %c0_60 = arith.constant 0 : index
    %c2_61 = arith.constant 2 : index
    %c0_62 = arith.constant 0 : index
    %118 = vector.load %arg11[%c0_60, %c2_61, %c0_62] : memref<2x20x128xbf16, #tpu.memory_space<vmem>>, vector<2x16x128xbf16>
    tpu.vector_store %arg11[%c0_60, %c2_61, %c0_62], %117 {strides = array<i32>} : memref<2x20x128xbf16, #tpu.memory_space<vmem>>, vector<2x16x128xbf16>,
    %c0_63 = arith.constant 0 : index
    %c0_64 = arith.constant 0 : index
    %c0_65 = arith.constant 0 : index
    %119 = vector.load %arg11[%c0_63, %c0_64, %c0_65] : memref<2x20x128xbf16, #tpu.memory_space<vmem>>, vector<2x20x128xbf16>
    %120 = vector.extract_strided_slice %119 {offsets = [0, 0, 0], sizes = [2, 16, 128], strides = [1, 1, 1]} : vector<2x20x128xbf16> to vector<2x16x128xbf16>
    %121 = vector.extract_strided_slice %119 {offsets = [0, 1, 0], sizes = [2, 16, 128], strides = [1, 1, 1]} : vector<2x20x128xbf16> to vector<2x16x128xbf16>
    %122 = vector.extract_strided_slice %119 {offsets = [0, 2, 0], sizes = [2, 16, 128], strides = [1, 1, 1]} : vector<2x20x128xbf16> to vector<2x16x128xbf16>
    %123 = vector.extract_strided_slice %119 {offsets = [0, 3, 0], sizes = [2, 16, 128], strides = [1, 1, 1]} : vector<2x20x128xbf16> to vector<2x16x128xbf16>
    %124 = vector.extract_strided_slice %119 {offsets = [0, 4, 0], sizes = [2, 16, 128], strides = [1, 1, 1]} : vector<2x20x128xbf16> to vector<2x16x128xbf16>
    %125 = tpu.concatenate %120, %121, %122, %123, %124 in 2 : vector<2x16x128xbf16>, vector<2x16x128xbf16>, vector<2x16x128xbf16>, vector<2x16x128xbf16>, vector<2x16x128xbf16> -> vector<2x16x640xbf16>
    %126 = vector.shape_cast %125 : vector<2x16x640xbf16> to vector<32x640xbf16>
    %c0_66 = arith.constant 0 : index
    %c0_67 = arith.constant 0 : index
    %127 = vector.load %arg2[%c0_66, %c0_67] : memref<640x256xbf16, #tpu.memory_space<vmem>>, vector<640x256xbf16>
    %cst_68 = arith.constant dense<0.000000e+00> : vector<32x256xf32>
    %128 = tpu.matmul %126, %127, %cst_68 {dimension_numbers = #tpu.dot_dimension_numbers<[1], [0], [0], [1], [0, 0, 1, 1], [], []>} : vector<32x640xbf16>, vector<640x256xbf16>, vector<32x256xf32> -> vector<32x256xf32>
    %129 = vector.extract_strided_slice %17 {offsets = [2, 0], sizes = [1, 256], strides = [1, 1]} : vector<7x256xf32> to vector<1x256xf32>
    %130 = vector.shape_cast %129 : vector<1x256xf32> to vector<256xf32>
    %131 = vector.shape_cast %130 : vector<256xf32> to vector<1x256xf32>
    %132 = vector.broadcast %131 : vector<1x256xf32> to vector<32x256xf32>
    %133 = arith.addf %128, %132 : vector<32x256xf32>
    %cst_69 = arith.constant 0.000000e+00 : f32
    %134 = vector.broadcast %cst_69 : f32 to vector<32x256xf32>
    %135 = arith.cmpf ogt, %133, %134 : vector<32x256xf32>
    %cst_70 = arith.constant 0.000000e+00 : f32
    %136 = vector.broadcast %cst_70 : f32 to vector<32x256xf32>
    %137 = arith.minimumf %133, %136 : vector<32x256xf32>
    %138 = math.exp %137 : vector<32x256xf32>
    %cst_71 = arith.constant 1.000000e+00 : f32
    %139 = vector.broadcast %cst_71 : f32 to vector<32x256xf32>
    %140 = arith.cmpf oeq, %138, %139 : vector<32x256xf32>
    %cst_72 = arith.constant 1.000000e+00 : f32
    %141 = vector.broadcast %cst_72 : f32 to vector<32x256xf32>
    %142 = arith.subf %138, %141 : vector<32x256xf32>
    %143 = arith.mulf %142, %137 : vector<32x256xf32>
    %144 = math.log %138 : vector<32x256xf32>
    %145 = arith.divf %143, %144 : vector<32x256xf32>
    %146 = arith.select %140, %137, %145 : vector<32x256xi1>, vector<32x256xf32>
    %cst_73 = arith.constant 0.000000e+00 : f32
    %147 = vector.broadcast %cst_73 : f32 to vector<32x256xf32>
    %148 = arith.cmpf oeq, %138, %147 : vector<32x256xf32>
    %cst_74 = arith.constant -1.000000e+00 : f32
    %149 = vector.broadcast %cst_74 : f32 to vector<32x256xf32>
    %150 = arith.select %148, %149, %146 : vector<32x256xi1>, vector<32x256xf32>
    %151 = arith.select %135, %133, %150 : vector<32x256xi1>, vector<32x256xf32>
    %152 = arith.truncf %151 : vector<32x256xf32> to vector<32x256xbf16>
    %153 = vector.shape_cast %152 : vector<32x256xbf16> to vector<2x16x256xbf16>
    %c0_75 = arith.constant 0 : index
    %c2_76 = arith.constant 2 : index
    %c0_77 = arith.constant 0 : index
    %154 = vector.load %arg12[%c0_75, %c2_76, %c0_77] : memref<2x20x256xbf16, #tpu.memory_space<vmem>>, vector<2x16x256xbf16>
    tpu.vector_store %arg12[%c0_75, %c2_76, %c0_77], %153 {strides = array<i32>} : memref<2x20x256xbf16, #tpu.memory_space<vmem>>, vector<2x16x256xbf16>,
    %c0_78 = arith.constant 0 : index
    %c0_79 = arith.constant 0 : index
    %c0_80 = arith.constant 0 : index
    %155 = vector.load %arg12[%c0_78, %c0_79, %c0_80] : memref<2x20x256xbf16, #tpu.memory_space<vmem>>, vector<2x20x256xbf16>
    %156 = vector.extract_strided_slice %155 {offsets = [0, 0, 0], sizes = [2, 16, 256], strides = [1, 1, 1]} : vector<2x20x256xbf16> to vector<2x16x256xbf16>
    %157 = vector.extract_strided_slice %155 {offsets = [0, 1, 0], sizes = [2, 16, 256], strides = [1, 1, 1]} : vector<2x20x256xbf16> to vector<2x16x256xbf16>
    %158 = vector.extract_strided_slice %155 {offsets = [0, 2, 0], sizes = [2, 16, 256], strides = [1, 1, 1]} : vector<2x20x256xbf16> to vector<2x16x256xbf16>
    %159 = vector.extract_strided_slice %155 {offsets = [0, 3, 0], sizes = [2, 16, 256], strides = [1, 1, 1]} : vector<2x20x256xbf16> to vector<2x16x256xbf16>
    %160 = vector.extract_strided_slice %155 {offsets = [0, 4, 0], sizes = [2, 16, 256], strides = [1, 1, 1]} : vector<2x20x256xbf16> to vector<2x16x256xbf16>
    %161 = tpu.concatenate %156, %157, %158, %159, %160 in 2 : vector<2x16x256xbf16>, vector<2x16x256xbf16>, vector<2x16x256xbf16>, vector<2x16x256xbf16>, vector<2x16x256xbf16> -> vector<2x16x1280xbf16>
    %162 = vector.shape_cast %161 : vector<2x16x1280xbf16> to vector<32x1280xbf16>
    %c0_81 = arith.constant 0 : index
    %c0_82 = arith.constant 0 : index
    %163 = vector.load %arg3[%c0_81, %c0_82] : memref<1280x256xbf16, #tpu.memory_space<vmem>>, vector<1280x256xbf16>
    %cst_83 = arith.constant dense<0.000000e+00> : vector<32x256xf32>
    %164 = tpu.matmul %162, %163, %cst_83 {dimension_numbers = #tpu.dot_dimension_numbers<[1], [0], [0], [1], [0, 0, 1, 1], [], []>} : vector<32x1280xbf16>, vector<1280x256xbf16>, vector<32x256xf32> -> vector<32x256xf32>
    %165 = vector.extract_strided_slice %17 {offsets = [3, 0], sizes = [1, 256], strides = [1, 1]} : vector<7x256xf32> to vector<1x256xf32>
    %166 = vector.shape_cast %165 : vector<1x256xf32> to vector<256xf32>
    %167 = vector.shape_cast %166 : vector<256xf32> to vector<1x256xf32>
    %168 = vector.broadcast %167 : vector<1x256xf32> to vector<32x256xf32>
    %169 = arith.addf %164, %168 : vector<32x256xf32>
    %cst_84 = arith.constant 0.000000e+00 : f32
    %170 = vector.broadcast %cst_84 : f32 to vector<32x256xf32>
    %171 = arith.cmpf ogt, %169, %170 : vector<32x256xf32>
    %cst_85 = arith.constant 0.000000e+00 : f32
    %172 = vector.broadcast %cst_85 : f32 to vector<32x256xf32>
    %173 = arith.minimumf %169, %172 : vector<32x256xf32>
    %174 = math.exp %173 : vector<32x256xf32>
    %cst_86 = arith.constant 1.000000e+00 : f32
    %175 = vector.broadcast %cst_86 : f32 to vector<32x256xf32>
    %176 = arith.cmpf oeq, %174, %175 : vector<32x256xf32>
    %cst_87 = arith.constant 1.000000e+00 : f32
    %177 = vector.broadcast %cst_87 : f32 to vector<32x256xf32>
    %178 = arith.subf %174, %177 : vector<32x256xf32>
    %179 = arith.mulf %178, %173 : vector<32x256xf32>
    %180 = math.log %174 : vector<32x256xf32>
    %181 = arith.divf %179, %180 : vector<32x256xf32>
    %182 = arith.select %176, %173, %181 : vector<32x256xi1>, vector<32x256xf32>
    %cst_88 = arith.constant 0.000000e+00 : f32
    %183 = vector.broadcast %cst_88 : f32 to vector<32x256xf32>
    %184 = arith.cmpf oeq, %174, %183 : vector<32x256xf32>
    %cst_89 = arith.constant -1.000000e+00 : f32
    %185 = vector.broadcast %cst_89 : f32 to vector<32x256xf32>
    %186 = arith.select %184, %185, %182 : vector<32x256xi1>, vector<32x256xf32>
    %187 = arith.select %171, %169, %186 : vector<32x256xi1>, vector<32x256xf32>
    %188 = arith.truncf %187 : vector<32x256xf32> to vector<32x256xbf16>
    %189 = vector.shape_cast %188 : vector<32x256xbf16> to vector<2x16x256xbf16>
    %c0_90 = arith.constant 0 : index
    %c2_91 = arith.constant 2 : index
    %c0_92 = arith.constant 0 : index
    %190 = vector.load %arg13[%c0_90, %c2_91, %c0_92] : memref<2x20x256xbf16, #tpu.memory_space<vmem>>, vector<2x16x256xbf16>
    tpu.vector_store %arg13[%c0_90, %c2_91, %c0_92], %189 {strides = array<i32>} : memref<2x20x256xbf16, #tpu.memory_space<vmem>>, vector<2x16x256xbf16>,
    %c0_93 = arith.constant 0 : index
    %c0_94 = arith.constant 0 : index
    %c0_95 = arith.constant 0 : index
    %191 = vector.load %arg13[%c0_93, %c0_94, %c0_95] : memref<2x20x256xbf16, #tpu.memory_space<vmem>>, vector<2x20x256xbf16>
    %192 = vector.extract_strided_slice %191 {offsets = [0, 0, 0], sizes = [2, 16, 256], strides = [1, 1, 1]} : vector<2x20x256xbf16> to vector<2x16x256xbf16>
    %193 = vector.extract_strided_slice %191 {offsets = [0, 1, 0], sizes = [2, 16, 256], strides = [1, 1, 1]} : vector<2x20x256xbf16> to vector<2x16x256xbf16>
    %194 = vector.extract_strided_slice %191 {offsets = [0, 2, 0], sizes = [2, 16, 256], strides = [1, 1, 1]} : vector<2x20x256xbf16> to vector<2x16x256xbf16>
    %195 = vector.extract_strided_slice %191 {offsets = [0, 3, 0], sizes = [2, 16, 256], strides = [1, 1, 1]} : vector<2x20x256xbf16> to vector<2x16x256xbf16>
    %196 = vector.extract_strided_slice %191 {offsets = [0, 4, 0], sizes = [2, 16, 256], strides = [1, 1, 1]} : vector<2x20x256xbf16> to vector<2x16x256xbf16>
    %197 = tpu.concatenate %192, %193, %194, %195, %196 in 2 : vector<2x16x256xbf16>, vector<2x16x256xbf16>, vector<2x16x256xbf16>, vector<2x16x256xbf16>, vector<2x16x256xbf16> -> vector<2x16x1280xbf16>
    %198 = vector.shape_cast %197 : vector<2x16x1280xbf16> to vector<32x1280xbf16>
    %c0_96 = arith.constant 0 : index
    %c0_97 = arith.constant 0 : index
    %199 = vector.load %arg4[%c0_96, %c0_97] : memref<1280x128xbf16, #tpu.memory_space<vmem>>, vector<1280x128xbf16>
    %cst_98 = arith.constant dense<0.000000e+00> : vector<32x128xf32>
    %200 = tpu.matmul %198, %199, %cst_98 {dimension_numbers = #tpu.dot_dimension_numbers<[1], [0], [0], [1], [0, 0, 1, 1], [], []>} : vector<32x1280xbf16>, vector<1280x128xbf16>, vector<32x128xf32> -> vector<32x128xf32>
    %201 = vector.extract_strided_slice %17 {offsets = [4, 0], sizes = [1, 128], strides = [1, 1]} : vector<7x256xf32> to vector<1x128xf32>
    %202 = vector.shape_cast %201 : vector<1x128xf32> to vector<128xf32>
    %203 = vector.shape_cast %202 : vector<128xf32> to vector<1x128xf32>
    %204 = vector.broadcast %203 : vector<1x128xf32> to vector<32x128xf32>
    %205 = arith.addf %200, %204 : vector<32x128xf32>
    %cst_99 = arith.constant 0.000000e+00 : f32
    %206 = vector.broadcast %cst_99 : f32 to vector<32x128xf32>
    %207 = arith.cmpf ogt, %205, %206 : vector<32x128xf32>
    %cst_100 = arith.constant 0.000000e+00 : f32
    %208 = vector.broadcast %cst_100 : f32 to vector<32x128xf32>
    %209 = arith.minimumf %205, %208 : vector<32x128xf32>
    %210 = math.exp %209 : vector<32x128xf32>
    %cst_101 = arith.constant 1.000000e+00 : f32
    %211 = vector.broadcast %cst_101 : f32 to vector<32x128xf32>
    %212 = arith.cmpf oeq, %210, %211 : vector<32x128xf32>
    %cst_102 = arith.constant 1.000000e+00 : f32
    %213 = vector.broadcast %cst_102 : f32 to vector<32x128xf32>
    %214 = arith.subf %210, %213 : vector<32x128xf32>
    %215 = arith.mulf %214, %209 : vector<32x128xf32>
    %216 = math.log %210 : vector<32x128xf32>
    %217 = arith.divf %215, %216 : vector<32x128xf32>
    %218 = arith.select %212, %209, %217 : vector<32x128xi1>, vector<32x128xf32>
    %cst_103 = arith.constant 0.000000e+00 : f32
    %219 = vector.broadcast %cst_103 : f32 to vector<32x128xf32>
    %220 = arith.cmpf oeq, %210, %219 : vector<32x128xf32>
    %cst_104 = arith.constant -1.000000e+00 : f32
    %221 = vector.broadcast %cst_104 : f32 to vector<32x128xf32>
    %222 = arith.select %220, %221, %218 : vector<32x128xi1>, vector<32x128xf32>
    %223 = arith.select %207, %205, %222 : vector<32x128xi1>, vector<32x128xf32>
    %224 = arith.truncf %223 : vector<32x128xf32> to vector<32x128xbf16>
    %225 = vector.shape_cast %224 : vector<32x128xbf16> to vector<2x16x128xbf16>
    %c0_105 = arith.constant 0 : index
    %c2_106 = arith.constant 2 : index
    %c0_107 = arith.constant 0 : index
    %226 = vector.load %arg14[%c0_105, %c2_106, %c0_107] : memref<2x20x128xbf16, #tpu.memory_space<vmem>>, vector<2x16x128xbf16>
    tpu.vector_store %arg14[%c0_105, %c2_106, %c0_107], %225 {strides = array<i32>} : memref<2x20x128xbf16, #tpu.memory_space<vmem>>, vector<2x16x128xbf16>,
    %c0_108 = arith.constant 0 : index
    %c0_109 = arith.constant 0 : index
    %c0_110 = arith.constant 0 : index
    %227 = vector.load %arg14[%c0_108, %c0_109, %c0_110] : memref<2x20x128xbf16, #tpu.memory_space<vmem>>, vector<2x20x128xbf16>
    %228 = vector.extract_strided_slice %227 {offsets = [0, 0, 0], sizes = [2, 16, 128], strides = [1, 1, 1]} : vector<2x20x128xbf16> to vector<2x16x128xbf16>
    %229 = vector.extract_strided_slice %227 {offsets = [0, 1, 0], sizes = [2, 16, 128], strides = [1, 1, 1]} : vector<2x20x128xbf16> to vector<2x16x128xbf16>
    %230 = vector.extract_strided_slice %227 {offsets = [0, 2, 0], sizes = [2, 16, 128], strides = [1, 1, 1]} : vector<2x20x128xbf16> to vector<2x16x128xbf16>
    %231 = vector.extract_strided_slice %227 {offsets = [0, 3, 0], sizes = [2, 16, 128], strides = [1, 1, 1]} : vector<2x20x128xbf16> to vector<2x16x128xbf16>
    %232 = vector.extract_strided_slice %227 {offsets = [0, 4, 0], sizes = [2, 16, 128], strides = [1, 1, 1]} : vector<2x20x128xbf16> to vector<2x16x128xbf16>
    %233 = tpu.concatenate %228, %229, %230, %231, %232 in 2 : vector<2x16x128xbf16>, vector<2x16x128xbf16>, vector<2x16x128xbf16>, vector<2x16x128xbf16>, vector<2x16x128xbf16> -> vector<2x16x640xbf16>
    %234 = vector.shape_cast %233 : vector<2x16x640xbf16> to vector<32x640xbf16>
    %c0_111 = arith.constant 0 : index
    %c0_112 = arith.constant 0 : index
    %235 = vector.load %arg5[%c0_111, %c0_112] : memref<640x64xbf16, #tpu.memory_space<vmem>>, vector<640x64xbf16>
    %cst_113 = arith.constant dense<0.000000e+00> : vector<32x64xf32>
    %236 = tpu.matmul %234, %235, %cst_113 {dimension_numbers = #tpu.dot_dimension_numbers<[1], [0], [0], [1], [0, 0, 1, 1], [], []>} : vector<32x640xbf16>, vector<640x64xbf16>, vector<32x64xf32> -> vector<32x64xf32>
    %237 = vector.extract_strided_slice %17 {offsets = [5, 0], sizes = [1, 64], strides = [1, 1]} : vector<7x256xf32> to vector<1x64xf32>
    %238 = vector.shape_cast %237 : vector<1x64xf32> to vector<64xf32>
    %239 = vector.shape_cast %238 : vector<64xf32> to vector<1x64xf32>
    %240 = vector.broadcast %239 : vector<1x64xf32> to vector<32x64xf32>
    %241 = arith.addf %236, %240 : vector<32x64xf32>
    %cst_114 = arith.constant 0.000000e+00 : f32
    %242 = vector.broadcast %cst_114 : f32 to vector<32x64xf32>
    %243 = arith.cmpf ogt, %241, %242 : vector<32x64xf32>
    %cst_115 = arith.constant 0.000000e+00 : f32
    %244 = vector.broadcast %cst_115 : f32 to vector<32x64xf32>
    %245 = arith.minimumf %241, %244 : vector<32x64xf32>
    %246 = math.exp %245 : vector<32x64xf32>
    %cst_116 = arith.constant 1.000000e+00 : f32
    %247 = vector.broadcast %cst_116 : f32 to vector<32x64xf32>
    %248 = arith.cmpf oeq, %246, %247 : vector<32x64xf32>
    %cst_117 = arith.constant 1.000000e+00 : f32
    %249 = vector.broadcast %cst_117 : f32 to vector<32x64xf32>
    %250 = arith.subf %246, %249 : vector<32x64xf32>
    %251 = arith.mulf %250, %245 : vector<32x64xf32>
    %252 = math.log %246 : vector<32x64xf32>
    %253 = arith.divf %251, %252 : vector<32x64xf32>
    %254 = arith.select %248, %245, %253 : vector<32x64xi1>, vector<32x64xf32>
    %cst_118 = arith.constant 0.000000e+00 : f32
    %255 = vector.broadcast %cst_118 : f32 to vector<32x64xf32>
    %256 = arith.cmpf oeq, %246, %255 : vector<32x64xf32>
    %cst_119 = arith.constant -1.000000e+00 : f32
    %257 = vector.broadcast %cst_119 : f32 to vector<32x64xf32>
    %258 = arith.select %256, %257, %254 : vector<32x64xi1>, vector<32x64xf32>
    %259 = arith.select %243, %241, %258 : vector<32x64xi1>, vector<32x64xf32>
    %260 = arith.truncf %259 : vector<32x64xf32> to vector<32x64xbf16>
    %261 = vector.shape_cast %260 : vector<32x64xbf16> to vector<2x16x64xbf16>
    %c0_120 = arith.constant 0 : index
    %c2_121 = arith.constant 2 : index
    %c0_122 = arith.constant 0 : index
    %262 = vector.load %arg15[%c0_120, %c2_121, %c0_122] : memref<2x20x64xbf16, #tpu.memory_space<vmem>>, vector<2x16x64xbf16>
    tpu.vector_store %arg15[%c0_120, %c2_121, %c0_122], %261 {strides = array<i32>} : memref<2x20x64xbf16, #tpu.memory_space<vmem>>, vector<2x16x64xbf16>,
    %c0_123 = arith.constant 0 : index
    %c0_124 = arith.constant 0 : index
    %c0_125 = arith.constant 0 : index
    %263 = vector.load %arg15[%c0_123, %c0_124, %c0_125] : memref<2x20x64xbf16, #tpu.memory_space<vmem>>, vector<2x20x64xbf16>
    %264 = arith.extf %263 : vector<2x20x64xbf16> to vector<2x20x64xf32>
    %265 = vector.extract_strided_slice %264 {offsets = [0, 0, 0], sizes = [2, 16, 64], strides = [1, 1, 1]} : vector<2x20x64xf32> to vector<2x16x64xf32>
    %266 = vector.extract_strided_slice %16 {offsets = [1, 0, 0], sizes = [1, 1, 64], strides = [1, 1, 1]} : vector<2x5x64xf32> to vector<1x1x64xf32>
    %267 = vector.shape_cast %266 : vector<1x1x64xf32> to vector<64xf32>
    %268 = vector.shape_cast %267 : vector<64xf32> to vector<1x1x64xf32>
    %269 = vector.broadcast %268 : vector<1x1x64xf32> to vector<2x16x64xf32>
    %270 = arith.mulf %265, %269 : vector<2x16x64xf32>
    %271 = vector.extract_strided_slice %264 {offsets = [0, 1, 0], sizes = [2, 16, 64], strides = [1, 1, 1]} : vector<2x20x64xf32> to vector<2x16x64xf32>
    %272 = vector.extract_strided_slice %16 {offsets = [1, 1, 0], sizes = [1, 1, 64], strides = [1, 1, 1]} : vector<2x5x64xf32> to vector<1x1x64xf32>
    %273 = vector.shape_cast %272 : vector<1x1x64xf32> to vector<64xf32>
    %274 = vector.shape_cast %273 : vector<64xf32> to vector<1x1x64xf32>
    %275 = vector.broadcast %274 : vector<1x1x64xf32> to vector<2x16x64xf32>
    %276 = arith.mulf %271, %275 : vector<2x16x64xf32>
    %277 = arith.addf %270, %276 : vector<2x16x64xf32>
    %278 = vector.extract_strided_slice %264 {offsets = [0, 2, 0], sizes = [2, 16, 64], strides = [1, 1, 1]} : vector<2x20x64xf32> to vector<2x16x64xf32>
    %279 = vector.extract_strided_slice %16 {offsets = [1, 2, 0], sizes = [1, 1, 64], strides = [1, 1, 1]} : vector<2x5x64xf32> to vector<1x1x64xf32>
    %280 = vector.shape_cast %279 : vector<1x1x64xf32> to vector<64xf32>
    %281 = vector.shape_cast %280 : vector<64xf32> to vector<1x1x64xf32>
    %282 = vector.broadcast %281 : vector<1x1x64xf32> to vector<2x16x64xf32>
    %283 = arith.mulf %278, %282 : vector<2x16x64xf32>
    %284 = arith.addf %277, %283 : vector<2x16x64xf32>
    %285 = vector.extract_strided_slice %264 {offsets = [0, 3, 0], sizes = [2, 16, 64], strides = [1, 1, 1]} : vector<2x20x64xf32> to vector<2x16x64xf32>
    %286 = vector.extract_strided_slice %16 {offsets = [1, 3, 0], sizes = [1, 1, 64], strides = [1, 1, 1]} : vector<2x5x64xf32> to vector<1x1x64xf32>
    %287 = vector.shape_cast %286 : vector<1x1x64xf32> to vector<64xf32>
    %288 = vector.shape_cast %287 : vector<64xf32> to vector<1x1x64xf32>
    %289 = vector.broadcast %288 : vector<1x1x64xf32> to vector<2x16x64xf32>
    %290 = arith.mulf %285, %289 : vector<2x16x64xf32>
    %291 = arith.addf %284, %290 : vector<2x16x64xf32>
    %292 = vector.extract_strided_slice %264 {offsets = [0, 4, 0], sizes = [2, 16, 64], strides = [1, 1, 1]} : vector<2x20x64xf32> to vector<2x16x64xf32>
    %293 = vector.extract_strided_slice %16 {offsets = [1, 4, 0], sizes = [1, 1, 64], strides = [1, 1, 1]} : vector<2x5x64xf32> to vector<1x1x64xf32>
    %294 = vector.shape_cast %293 : vector<1x1x64xf32> to vector<64xf32>
    %295 = vector.shape_cast %294 : vector<64xf32> to vector<1x1x64xf32>
    %296 = vector.broadcast %295 : vector<1x1x64xf32> to vector<2x16x64xf32>
    %297 = arith.mulf %292, %296 : vector<2x16x64xf32>
    %298 = arith.addf %291, %297 : vector<2x16x64xf32>
    %cst_126 = arith.constant dense<0.000000e+00> : vector<2x16xf32>
    %299 = vector.multi_reduction <add>, %298, %cst_126 [2] : vector<2x16x64xf32> to vector<2x16xf32>
    %300 = vector.extract_strided_slice %17 {offsets = [6, 0], sizes = [1, 1], strides = [1, 1]} : vector<7x256xf32> to vector<1x1xf32>
    %301 = vector.shape_cast %300 : vector<1x1xf32> to vector<1xf32>
    %302 = vector.shape_cast %301 : vector<1xf32> to vector<1x1xf32>
    %303 = vector.broadcast %302 : vector<1x1xf32> to vector<2x16xf32>
    %304 = arith.addf %299, %303 : vector<2x16xf32>
    %c0_127 = arith.constant 0 : index
    %c0_128 = arith.constant 0 : index
    %305 = vector.load %arg8[%c0_127, %c0_128] : memref<2x16xf32, #tpu.memory_space<vmem>>, vector<2x16xf32>
    tpu.vector_store %arg8[%c0_127, %c0_128], %304 {strides = array<i32>} : memref<2x16xf32, #tpu.memory_space<vmem>>, vector<2x16xf32>,
    return
  }
}

</mosaic_0001>

<bundles_post_ra>
// kernel: complex_model_forward.1
= control target key start
LH: loop header
LB: loop body
LE: loop exit
PB: predicated region body
PF: predicated region fallthrough
CT: control target
= control target key end

     0   :  { %13 = vsyncpa [#allocation10], 0  ;;  %s10561_s0 = inlined_call_operand.vmem [shape: f32[2,16,1], index: 0, kind: input, shape index: {}]   ;;  %s10562_s1 = inlined_call_operand.vmem [shape: bf16[640,128], index: 1, kind: input, shape index: {}]   ;;  %s10563_s2 = inlined_call_operand.hbm [shape: bf16[640,256], index: 2, kind: input, shape index: {}]   ;;  %s10564_s3 = inlined_call_operand.hbm [shape: bf16[1280,256], index: 3, kind: input, shape index: {}]   ;;  %s10565_s4 = inlined_call_operand.hbm [shape: bf16[1280,128], index: 4, kind: input, shape index: {}]   ;;  %s10566_s5 = inlined_call_operand.vmem [shape: bf16[640,64], index: 5, kind: input, shape index: {}]   ;;  %s10567_s6 = inlined_call_operand.vmem [shape: f32[2,5,64], index: 6, kind: input, shape index: {}]   ;;  %s10568_s7 = inlined_call_operand.vmem [shape: f32[7,256], index: 7, kind: input, shape index: {}]   ;;  %s10569_s8 = inlined_call_operand.hbm [shape: f32[2,16], index: 8, kind: output, shape index: {}]  }
   0x1   :  { %14 = vsyncpa [#allocation13], 0 }
   0x2   :  { %15 = vsyncpa [#allocation11], 0  ;;  %s37_s29 = sshll.u32 %s10564_s3, 4  ;;  %s8286_s30 = smov [#allocation12]   ;;  %s38_s29 = int_to_ptr.hbm [resolvable:$true] %s37_s29 }
   0x3   :  { %s39_s9 = sshll.u32 %s8286_s30, 4  ;;  %s24_s12 = sshll.u32 %s10563_s2, 4  ;;  %s40_s9 = int_to_ptr.vmem [resolvable:$true] %s39_s9  ;;  %s25_s12 = int_to_ptr.hbm [resolvable:$true] %s24_s12 }
   0x4   :  { %s8287_s13 = smov 128   ;;  %s8288_s14 = smov 8  }
   0x5   :  { %45 = dma.hbm_to_vmem [thread:$0]  %s38_s29, 20480, %s40_s9, [#allocation13], %s8287_s13, %s8287_s13, %s8288_s14  }
   0x6   :  { %s8289_s15 = smov [#allocation9]   ;;  %s50_s19 = sshll.u32 %s10565_s4, 4  ;;  %s51_s19 = int_to_ptr.hbm [resolvable:$true] %s50_s19 }
   0x7   :  { %s26_s16 = sshll.u32 %s8289_s15, 4  ;;  %s8290_s3 = smov [#allocation14]   ;;  %s27_s16 = int_to_ptr.vmem [resolvable:$true] %s26_s16 }
   0x8   :  { %32 = dma.hbm_to_vmem [thread:$0]  %s25_s12, 10240, %s27_s16, [#allocation10], %s8287_s13, %s8287_s13, %s8288_s14  }
   0x9   :  { %s52_s20 = sshll.u32 %s8290_s3, 4  ;;  %s8291_s21 = smov 64   ;;  %s53_s20 = int_to_ptr.vmem [resolvable:$true] %s52_s20 }
   0xa   :  { %s8292_s22 = smov 4  }
   0xb   :  { %58 = dma.hbm_to_vmem [thread:$0]  %s51_s19, 10240, %s53_s20, [#allocation13], %s8291_s21, %s8291_s21, %s8292_s22  }
   0xc   :  { %8280 = dma.done.wait [#allocation10], 10240  }
   0xd   :  { %8281 = vsyncadd [#allocation10], 4294957056 }
   0xe   :  { %8282 = dma.done.wait [#allocation13], 30720  }
   0xf   :  { %8283 = vsyncadd [#allocation13], 4294936576  ;;  %v8293_v0 = vmov 0   ;;  %vm78_vm0 = vcmask 7168   ;;  %vm81_vm1 = vcmask 3072   ;;  %v8294_v1 = vmov 0.0  }
  0x10   :  { %7986 = vset.pattern.permute.xlu2 %v8293_v0  ;;  %86 = vst [vmem:[#allocation3] sm:$0xf] %v8293_v0  ;;  %7985 = vset.pattern.permute.xlu1 %v8293_v0  ;;  %v126_v2 = vld [vmem:[%s10561_s0 + $0x10] sm:$0xff]  ;;  %v127_v3 = vld [vmem:[%s10561_s0 + $0x18] sm:$0xff]  ;;  %v125_v4 = vld [vmem:[%s10561_s0 + $0x8] sm:$0xff]  ;;  %vm190_vm2 = vcmask 1046528  }
  0x11   :  { %87 = vst [vmem:[#allocation3 + $0x4] sm:$0xf] %v8293_v0  ;;  %7984 = vset.pattern.permute.xlu0 %v8293_v0  ;;  %v124_v5 = vld [vmem:[%s10561_s0] sm:$0xff]  ;;  %vm10575_vm3 = vcmask 1045504   ;;  %vm10571_vm4 = vcmask 1044480   ;;  %vm10570_vm5 = vcmask 1043456  }
  0x12   :  { %88 = vst [vmem:[#allocation3 + $0x8] sm:$0x3] %v8293_v0  ;;  %v132_v12 = vld [vmem:[%s10567_s6] sm:$0x1f]  ;;  %vm10573_vm6 = vcmask 519168   ;;  %vm10572_vm14 = vcmask 516096  }
  0x13   :  { %89 = vst [vmem:[#allocation3 + $0xc] sm:$0xf] %v8293_v0  ;;  %v177_v13 = vperm.slane %v132_v12, 1  ;;  %v209_v14 = vperm.slane %v132_v12, 2  ;;  %v8402_v16 = vperm.slane %v132_v12, 3  ;;  %v8404_v17 = vperm.slane %v132_v12, 4 }
  0x14   :  { %90 = vst [vmem:[#allocation3 + $0x10] sm:$0xf] %v8293_v0  ;;  %v8410_v20 = vperm.slane %v132_v12, 0  ;;  %v8430_v40 = vld [vmem:[%s10568_s7] sm:$0x7f]  ;;  %s8295_s21 = smov [#allocation15]  }
  0x15   :  { %91 = vst [vmem:[#allocation3 + $0x14] sm:$0x3] %v8293_v0  ;;  %v8439_v44 = vperm.slane %v8430_v40, 0  ;;  %s5837_s22 = sshll.u32 %s8295_s21, 4  ;;  %s5839_s23 = sshll.u32 %s10569_s8, 4  ;;  %s5838_s22 = int_to_ptr.vmem [resolvable:$true] %s5837_s22  ;;  %s5840_s23 = int_to_ptr.hbm [resolvable:$true] %s5839_s23 }
  0x16   :  { %92 = vst [vmem:[#allocation4] sm:$0xf] %v8293_v0 }
  0x17   :  { %93 = vst [vmem:[#allocation4 + $0x4] sm:$0xf] %v8293_v0 }
  0x18   :  { %94 = vst [vmem:[#allocation4 + $0x8] sm:$0x3] %v8293_v0 }
  0x19   :  { %95 = vst [vmem:[#allocation4 + $0xc] sm:$0xf] %v8293_v0 }
  0x1a   :  { %96 = vst [vmem:[#allocation4 + $0x10] sm:$0xf] %v8293_v0 }
  0x1b   :  { %97 = vst [vmem:[#allocation4 + $0x14] sm:$0x3] %v8293_v0 }
  0x1c   :  { %98 = vst [vmem:[#allocation5] sm:$0xff] %v8293_v0 }
  0x1d   :  { %100 = vst [vmem:[#allocation5 + $0x10] sm:$0x33] %v8293_v0 }
  0x1e   :  { %101 = vst [vmem:[#allocation5 + $0x18] sm:$0xff] %v8293_v0 }
  0x1f   :  { %103 = vst [vmem:[#allocation5 + $0x28] sm:$0x33] %v8293_v0 }
  0x20   :  { %104 = vst [vmem:[#allocation6] sm:$0xff] %v8293_v0 }
  0x21   :  { %106 = vst [vmem:[#allocation6 + $0x10] sm:$0x33] %v8293_v0 }
  0x22   :  { %107 = vst [vmem:[#allocation6 + $0x18] sm:$0xff] %v8293_v0 }
  0x23   :  { %109 = vst [vmem:[#allocation6 + $0x28] sm:$0x33] %v8293_v0 }
  0x24   :  { %110 = vst [vmem:[#allocation7] sm:$0xf] %v8293_v0 }
  0x25   :  { %111 = vst [vmem:[#allocation7 + $0x4] sm:$0xf] %v8293_v0 }
  0x26   :  { %112 = vst [vmem:[#allocation7 + $0x8] sm:$0x3] %v8293_v0 }
  0x27   :  { %113 = vst [vmem:[#allocation7 + $0xc] sm:$0xf] %v8293_v0 }
  0x28   :  { %114 = vst [vmem:[#allocation7 + $0x10] sm:$0xf] %v8293_v0 }
  0x29   :  { %115 = vst [vmem:[#allocation7 + $0x14] sm:$0x3] %v8293_v0 }
  0x2a   :  { %83 = vst.msk [vmem:[#allocation2 + $0x18] sm:$0xff] %vm78_vm0, %v8294_v1 }
  0x2b   :  { %84 = vst.msk [vmem:[#allocation2 + $0x20] sm:$0xff] %vm78_vm0, %v8294_v1 }
  0x2c   :  { %85 = vst.msk [vmem:[#allocation2 + $0x28] sm:$0xf] %vm81_vm1, %v8294_v1 }
  0x2d   :  { %130 = vst.msk [vmem:[#allocation2 + $0x1a] sm:$0xff] %vm78_vm0, %v126_v2 }
  0x2e   :  { %131 = vst.msk [vmem:[#allocation2 + $0x22] sm:$0xff] %vm78_vm0, %v127_v3 }
  0x2f   :  { %79 = vst.msk [vmem:[#allocation2] sm:$0xff] %vm78_vm0, %v8294_v1 }
  0x30   :  { %80 = vst.msk [vmem:[#allocation2 + $0x8] sm:$0xff] %vm78_vm0, %v8294_v1 }
  0x31   :  { %82 = vst.msk [vmem:[#allocation2 + $0x10] sm:$0xf] %vm81_vm1, %v8294_v1 }
  0x32   :  { %129 = vst.msk [vmem:[#allocation2 + $0xa] sm:$0xff] %vm78_vm0, %v125_v4 }
  0x33   :  { %128 = vst.msk [vmem:[#allocation2 + $0x2] sm:$0xff] %vm78_vm0, %v124_v5 }
  0x34   :  { %v139_v10 = vld [vmem:[#allocation2 + $0x18] sm:$0xff]  ;;  %117 = vst.msk [vmem:[#allocation8] sm:$0xf] %vm10573_vm6, %v8293_v0 }
  0x35   :  { %v140_v6 = vld [vmem:[#allocation2 + $0x20] sm:$0xff]  ;;  %v141_v9 = vld [vmem:[#allocation2 + $0x28] sm:$0xf]  ;;  %118 = vst.msk [vmem:[#allocation8 + $0x4] sm:$0xf] %vm10573_vm6, %v8293_v0 }
  0x36   :  { %159 = vperm.xlu2 %7986, %v140_v6   ;;  %121 = vst.msk [vmem:[#allocation8 + $0xc] sm:$0xf] %vm10573_vm6, %v8293_v0 }
  0x37   :  { %122 = vst.msk [vmem:[#allocation8 + $0x10] sm:$0xf] %vm10573_vm6, %v8293_v0 }
  0x39   :  { %v138_v7 = vld [vmem:[#allocation2 + $0x10] sm:$0xf] }
  0x3a   :  { %169 = vperm.xlu1 %7985, %v138_v7   ;;  %v136_v8 = vld [vmem:[#allocation2] sm:$0xff]  ;;  %v137_v11 = vld [vmem:[#allocation2 + $0x8] sm:$0xff] }
  0x3b   :  { %144 = vperm.xlu0 %7984, %v136_v8  }
  0x3e   :  { %174 = vperm.xlu2 %7986, %v141_v9  }
  0x42   :  { %154 = vperm.xlu1 %7985, %v139_v10  }
  0x43   :  { %149 = vperm.xlu0 %7984, %v137_v11  }
  0x90   :  { %v160_v15 = vpop.permute.xlu2 %159 }
  0x91   :  { %v8406_v18 = vmul.f32 %v177_v13, %v160_v15  ;;  %v8408_v19 = vmul.f32 %v209_v14, %v160_v15  ;;  %v8413_v21 = vmul.f32 %v8402_v16, %v160_v15  ;;  %v8418_v24 = vmul.f32 %v8404_v17, %v160_v15 }
  0x92   :  { %v166_v30 = vmul.f32 %v8410_v20, %v160_v15 }
  0x93   :  { %v197_v22 = vrot.slane %v8406_v18, 1  ;;  %v229_v23 = vrot.slane %v8408_v19, 2  ;;  %v261_v31 = vrot.slane %v8413_v21, 3  ;;  %v293_v35 = vrot.slane %v8418_v24, 4 }
  0x98   :  { %v175_v25 = vpop.permute.xlu2 %174 }
  0x99   :  { %v183_v26 = vmul.f32 %v177_v13, %v175_v25  ;;  %v215_v27 = vmul.f32 %v209_v14, %v175_v25  ;;  %v247_v28 = vmul.f32 %v8402_v16, %v175_v25  ;;  %v279_v29 = vmul.f32 %v8404_v17, %v175_v25 }
  0x9b   :  { %v199_v32 = vrot.slane %v183_v26, 1  ;;  %v231_v33 = vrot.slane %v215_v27, 2  ;;  %v263_v34 = vrot.slane %v247_v28, 3  ;;  %v295_v38 = vrot.slane %v279_v29, 4 }
  0x9d   :  { %v200_v36 = vsel %vm190_vm2, %v197_v22, %v199_v32  ;;  %v232_v37 = vsel %vm10575_vm3, %v229_v23, %v231_v33  ;;  %v264_v41 = vsel %vm10571_vm4, %v261_v31, %v263_v34  ;;  %v296_v43 = vsel %vm10570_vm5, %v293_v35, %v295_v38 }
  0x9e   :  { %v208_v39 = vadd.f32 %v200_v36, %v166_v30 }
  0xa0   :  { %v240_v42 = vadd.f32 %v232_v37, %v208_v39 }
  0xa2   :  { %v272_v45 = vadd.f32 %v264_v41, %v240_v42 }
  0xa4   :  { %v304_v46 = vadd.f32 %v296_v43, %v272_v45 }
  0xa6   :  { %v8442_v47 = vadd.f32 %v8439_v44, %v304_v46 }
  0xa8   :  { %v8445_v48 = vmin.f32 %v8442_v47, 0.0  ;;  %vm313_vm13 = vcmp.gt.f32.partialorder %v8442_v47, 0.0 }
  0xaa   :  { %v324_v49 = vmul.f32 1.442695, %v8445_v48 }
  0xac   :  { %7987 = vpow2.f32 %v324_v49  ;;  %v170_v50 = vpop.permute.xlu1 %169 }
  0xad   :  { %v145_v51 = vpop.permute.xlu0 %144  ;;  %v180_v53 = vmul.f32 %v177_v13, %v170_v50  ;;  %v212_v54 = vmul.f32 %v209_v14, %v170_v50  ;;  %v244_v55 = vmul.f32 %v8402_v16, %v170_v50  ;;  %v8453_v56 = vmul.f32 %v8404_v17, %v170_v50 }
  0xae   :  { %v163_v58 = vmul.f32 %v8410_v20, %v145_v51  ;;  %v178_v59 = vmul.f32 %v177_v13, %v145_v51  ;;  %v210_v63 = vmul.f32 %v209_v14, %v145_v51  ;;  %v242_v4 = vmul.f32 %v8402_v16, %v145_v51 }
  0xaf   :  { %v194_v8 = vrot.slane %v180_v53, 1  ;;  %v226_v9 = vrot.slane %v212_v54, 2  ;;  %v258_v12 = vrot.slane %v244_v55, 3  ;;  %v274_v29 = vmul.f32 %v8404_v17, %v145_v51 }
  0xb0   :  { %v191_v27 = vrot.slane %v178_v59, 1  ;;  %v223_v28 = vrot.slane %v210_v63, 2  ;;  %v290_v37 = vrot.slane %v8453_v56, 4  ;;  %v255_v42 = vrot.slane %v242_v4, 3  ;;  %v7547_v4 = vld [vmem:[%s10562_s1 + $0x38] sm:$0xff] }
  0xb1   :  { %v287_v51 = vrot.slane %v274_v29, 4  ;;  %868 = vmatpush.bf16.msra.mxu0 %v7547_v4  ;;  %v7557_v4 = vld [vmem:[%s10562_s1 + $0x88] sm:$0xff] }
  0xb2   :  { %v8448_v52 = vpop.eup %7987 }
  0xb3   :  { %7989 = vlog2.f32 %v8448_v52  ;;  %vm329_vm11 = vcmp.eq.f32.partialorder %v8448_v52, 1.0  ;;  %vm413_vm12 = vcmp.eq.f32.partialorder %v8448_v52, 0.0 }
  0xb4   :  { %v155_v57 = vpop.permute.xlu1 %154 }
  0xb5   :  { %v181_v60 = vmul.f32 %v177_v13, %v155_v57  ;;  %v213_v61 = vmul.f32 %v209_v14, %v155_v57  ;;  %v150_v62 = vpop.permute.xlu0 %149  ;;  %v165_v1 = vmul.f32 %v8410_v20, %v155_v57  ;;  %v245_v2 = vmul.f32 %v8402_v16, %v155_v57 }
  0xb6   :  { %v179_v3 = vmul.f32 %v177_v13, %v150_v62  ;;  %v211_v7 = vmul.f32 %v209_v14, %v150_v62  ;;  %v277_v10 = vmul.f32 %v8404_v17, %v155_v57  ;;  %v243_v13 = vmul.f32 %v8402_v16, %v150_v62 }
  0xb7   :  { %v196_v5 = vrot.slane %v181_v60, 1  ;;  %v228_v6 = vrot.slane %v213_v61, 2  ;;  %v260_v26 = vrot.slane %v245_v2, 3  ;;  %v164_v16 = vmul.f32 %v8410_v20, %v150_v62 }
  0xb8   :  { %v192_v14 = vrot.slane %v179_v3, 1  ;;  %v275_v30 = vmul.f32 %v8404_v17, %v150_v62  ;;  %v256_v36 = vrot.slane %v243_v13, 3 }
  0xb9   :  { %v7990_v11 = vpop.eup %7989  ;;  %v198_v15 = vsel %vm190_vm2, %v196_v5, %v197_v22  ;;  %v230_v18 = vsel %vm10575_vm3, %v228_v6, %v229_v23  ;;  %v224_v22 = vrot.slane %v211_v7, 2  ;;  %v292_v23 = vrot.slane %v277_v10, 4 }
  0xba   :  { %v345_v19 = vmul.f32 0.6931472, %v7990_v11  ;;  %v207_v25 = vadd.f32 %v198_v15, %v165_v1  ;;  %v193_v33 = vsel %vm190_vm2, %v191_v27, %v192_v14  ;;  %v195_v34 = vsel %vm190_vm2, %v192_v14, %v194_v8  ;;  %v7555_v27 = vld [vmem:[%s10562_s1 + $0x78] sm:$0xff] }
  0xbb   :  { %v262_v38 = vsel %vm10571_vm4, %v260_v26, %v261_v31  ;;  %v205_v39 = vadd.f32 %v193_v33, %v163_v58  ;;  %v206_v41 = vadd.f32 %v195_v34, %v164_v16  ;;  %v225_v20 = vsel %vm10575_vm3, %v223_v28, %v224_v22  ;;  %v7545_v28 = vld [vmem:[%s10562_s1 + $0x28] sm:$0xff]  ;;  %887 = vmatpush.bf16.msra.mxu1 %v7555_v27  ;;  %v7544_v34 = vld [vmem:[%s10562_s1 + $0x20] sm:$0xff] }
  0xbc   :  { %7991 = vrcp.f32 %v345_v19  ;;  %v239_v32 = vadd.f32 %v230_v18, %v207_v25  ;;  %v227_v17 = vsel %vm10575_vm3, %v224_v22, %v226_v9  ;;  %v294_v45 = vsel %vm10570_vm5, %v292_v23, %v293_v35  ;;  %v7546_v18 = vld [vmem:[%s10562_s1 + $0x30] sm:$0xff]  ;;  %v7563_v25 = vld [vmem:[%s10562_s1 + $0xb8] sm:$0xff] }
  0xbd   :  { %v237_v46 = vadd.f32 %v225_v20, %v205_v39  ;;  %v238_v49 = vadd.f32 %v227_v17, %v206_v41  ;;  %v288_v50 = vrot.slane %v275_v30, 4  ;;  %v257_v21 = vsel %vm10571_vm4, %v255_v42, %v256_v36  ;;  %869 = vmatpush.bf16.msra.mxu0 %v7546_v18  ;;  %906 = vmatpush.bf16.msra.mxu2 %v7563_v25  ;;  %v7562_v23 = vld [vmem:[%s10562_s1 + $0xb0] sm:$0xff]  ;;  %v7553_v39 = vld [vmem:[%s10562_s1 + $0x68] sm:$0xff]  ;;  %v7560_v17 = vld [vmem:[%s10562_s1 + $0xa0] sm:$0xff] }
  0xbe   :  { %v271_v43 = vadd.f32 %v262_v38, %v239_v32  ;;  %v259_v31 = vsel %vm10571_vm4, %v256_v36, %v258_v12  ;;  %vm396_vm7 = vweird.f32 %v345_v19  ;;  %v402_v59 = vand.u32 2147483648, %v345_v19  ;;  %v7549_v18 = vld [vmem:[%s10562_s1 + $0x48] sm:$0xff] }
  0xbf   :  { %v269_v55 = vadd.f32 %v257_v21, %v237_v46  ;;  %v270_v56 = vadd.f32 %v259_v31, %v238_v49  ;;  %v289_v24 = vsel %vm10570_vm5, %v287_v51, %v288_v50  ;;  %v291_v35 = vsel %vm10570_vm5, %v288_v50, %v290_v37  ;;  %v7570_v37 = vld [vmem:[%s10562_s1 + $0xf0] sm:$0xff]  ;;  %v7552_v49 = vld [vmem:[%s10562_s1 + $0x60] sm:$0xff]  ;;  %v7559_v21 = vld [vmem:[%s10562_s1 + $0x98] sm:$0xff] }
  0xc0   :  { %v303_v53 = vadd.f32 %v294_v45, %v271_v43  ;;  %v400_v63 = vand.u32 2147483647, %v345_v19  ;;  %v5853_v5 = vadd.f32 -1.0, %v8448_v52  ;;  %v403_v9 = vor.u32 1.1754944e-38, %v402_v59  ;;  %v7571_v52 = vld [vmem:[%s10562_s1 + $0xf8] sm:$0xff]  ;;  %v7569_v45 = vld [vmem:[%s10562_s1 + $0xe8] sm:$0xff] }
  0xc1   :  { %v301_v60 = vadd.f32 %v289_v24, %v269_v55  ;;  %v302_v61 = vadd.f32 %v291_v35, %v270_v56  ;;  %870 = vmatpush.bf16.msra.mxu0 %v7545_v28  ;;  %907 = vmatpush.bf16.msra.mxu2 %v7562_v23  ;;  %v7543_v43 = vld [vmem:[%s10562_s1 + $0x18] sm:$0xff]  ;;  %v7568_v31 = vld [vmem:[%s10562_s1 + $0xe0] sm:$0xff]  ;;  %v7541_v56 = vld [vmem:[%s10562_s1 + $0x8] sm:$0xff] }
  0xc2   :  { %v7992_v54 = vpop.eup %7991  ;;  %v8488_v58 = vadd.f32 %v8439_v44, %v303_v53  ;;  %vm401_vm10 = vcmp.eq.f32.partialorder %v400_v63, 8.507059e+37  ;;  %v337_v13 = vmul.f32 %v5853_v5, %v8445_v48  ;;  %925 = vmatpush.bf16.msra.mxu3 %v7571_v52  ;;  %v7542_v53 = vld [vmem:[%s10562_s1 + $0x10] sm:$0xff]  ;;  %v7551_v55 = vld [vmem:[%s10562_s1 + $0x58] sm:$0xff]  ;;  %v7556_v28 = vld [vmem:[%s10562_s1 + $0x80] sm:$0xff] }
  0xc3   :  { %v392_v57 = vmul.f32 %v7992_v54, %v345_v19  ;;  %vm397_vm8 = vweird.f32 %v7992_v54  ;;  %v8496_v2 = vadd.f32 %v8439_v44, %v301_v60  ;;  %v8499_v3 = vadd.f32 %v8439_v44, %v302_v61  ;;  %v7567_v24 = vld [vmem:[%s10562_s1 + $0xd8] sm:$0xff]  ;;  %v7550_v60 = vld [vmem:[%s10562_s1 + $0x50] sm:$0xff] }
  0xc4   :  { %v8493_v1 = vmin.f32 %v8488_v58, 0.0  ;;  %vm8506_vm9 = vmor %vm396_vm7, %vm397_vm8  ;;  %v7566_v5 = vld [vmem:[%s10562_s1 + $0xd0] sm:$0xff] }
  0xc5   :  { %v393_v62 = vsub.f32 1.0, %v392_v57  ;;  %v8511_v10 = vmin.f32 %v8496_v2, 0.0  ;;  %v8514_v44 = vmin.f32 %v8499_v3, 0.0  ;;  %871 = vmatpush.bf16.msra.mxu0 %v7544_v34  ;;  %v7558_v57 = vld [vmem:[%s10562_s1 + $0x90] sm:$0xff] }
  0xc6   :  { %v322_v7 = vmul.f32 1.442695, %v8493_v1  ;;  %926 = vmatpush.bf16.msra.mxu3 %v7570_v37 }
  0xc7   :  { %v394_v6 = vmul.f32 %v7992_v54, %v393_v62  ;;  %v318_v12 = vmul.f32 1.442695, %v8511_v10  ;;  %v320_v15 = vmul.f32 1.442695, %v8514_v44  ;;  %v7540_v62 = vld [vmem:[%s10562_s1] sm:$0xff] }
  0xc8   :  { %7993 = vpow2.f32 %v322_v7 }
  0xc9   :  { %v395_v11 = vadd.f32 %v7992_v54, %v394_v6  ;;  %7995 = vpow2.f32 %v318_v12  ;;  %872 = vmatpush.bf16.msra.mxu0 %v7543_v43 }
  0xca   :  { %7997 = vpow2.f32 %v320_v15  ;;  %927 = vmatpush.bf16.msra.mxu3 %v7569_v45  ;;  %v7564_v45 = vld [vmem:[%s10562_s1 + $0xc0] sm:$0xff] }
  0xcb   :  { %v399_v19 = vsel %vm8506_vm9, %v7992_v54, %v395_v11  ;;  %vm430_vm9 = vcmask 1040384  }
  0xcc   :  { %v404_v26 = vsel %vm401_vm10, %v403_v9, %v399_v19  ;;  %v7579_v9 = vld [vmem:[%s10562_s1 + $0x138] sm:$0xff]  ;;  %vm431_vm10 = vcmask 1044484  }
  0xcd   :  { %v405_v14 = vmul.f32 %v404_v26, %v337_v13  ;;  %873 = vmatpush.bf16.msra.mxu0 %v7542_v53 }
  0xce   :  { %v8535_v29 = vpop.eup %7993  ;;  %928 = vmatpush.bf16.msra.mxu3 %v7568_v31 }
  0xcf   :  { %v409_v22 = vsel %vm329_vm11, %v8445_v48, %v405_v14  ;;  %7999 = vlog2.f32 %v8535_v29  ;;  %v7554_v48 = vld [vmem:[%s10562_s1 + $0x70] sm:$0xff]  ;;  %v8550_v32 = vpop.eup %7995  ;;  %v5852_v59 = vadd.f32 -1.0, %v8535_v29  ;;  %vm328_vm15 = vcmp.eq.f32.partialorder %v8535_v29, 1.0 }
  0xd0   :  { %v417_v16 = vsel %vm413_vm12, -1.0, %v409_v22  ;;  %v8555_v36 = vpop.eup %7997  ;;  %8001 = vlog2.f32 %v8550_v32  ;;  %888 = vmatpush.bf16.msra.mxu1 %v7554_v48  ;;  %vm412_vm1 = vcmp.eq.f32.partialorder %v8535_v29, 0.0  ;;  %v5850_v19 = vadd.f32 -1.0, %v8550_v32  ;;  %v7565_v22 = vld [vmem:[%s10562_s1 + $0xc8] sm:$0xff] }
  0xd1   :  { %v421_v30 = vsel %vm313_vm13, %v8442_v47, %v417_v16  ;;  %v7561_v47 = vld [vmem:[%s10562_s1 + $0xa8] sm:$0xff]  ;;  %8003 = vlog2.f32 %v8555_v36  ;;  %874 = vmatpush.bf16.msra.mxu0 %v7541_v56  ;;  %v336_v12 = vmul.f32 %v5852_v59, %v8493_v1  ;;  %v5851_v14 = vadd.f32 -1.0, %v8555_v36 }
  0xd2   :  { %v425_v33 = vpack.c.bf16 %v421_v30, %v421_v30  ;;  %908 = vmatpush.bf16.msra.mxu2 %v7561_v47  ;;  %929 = vmatpush.bf16.msra.mxu3 %v7567_v24  ;;  %v7548_v47 = vld [vmem:[%s10562_s1 + $0x40] sm:$0xff]  ;;  %v334_v43 = vmul.f32 %v5850_v19, %v8511_v10 }
  0xd4   :  { %v8564_v38 = vrot.slane %v425_v33, 7  ;;  %889 = vmatpush.bf16.msra.mxu1 %v7553_v39 }
  0xd5   :  { %v8000_v41 = vpop.eup %7999  ;;  %875 = vmatpush.bf16.msra.mxu0 %v7540_v62  ;;  %v7576_v62 = vld [vmem:[%s10562_s1 + $0x120] sm:$0xff] }
  0xd6   :  { %v442_v42 = vrot.slane %v8564_v38, 4  ;;  %v8574_v20 = vmul.f32 0.6931472, %v8000_v41  ;;  %v8002_v46 = vpop.eup %8001  ;;  %909 = vmatpush.bf16.msra.mxu2 %v7560_v17  ;;  %930 = vmatpush.bf16.msra.mxu3 %v7566_v5  ;;  %v7578_v17 = vld [vmem:[%s10562_s1 + $0x130] sm:$0xff] }
  0xd7   :  { %v8004_v50 = vpop.eup %8003  ;;  %v8587_v51 = vmul.f32 0.6931472, %v8002_v46 }
  0xd8   :  { %456 = vst.msk [vmem:[#allocation3 + $0x14] sm:$0x1] %vm10572_vm14, %v442_v42  ;;  %8005 = vrcp.f32 %v8574_v20  ;;  %v8598_v54 = vmul.f32 0.6931472, %v8004_v50  ;;  %890 = vmatpush.bf16.msra.mxu1 %v7552_v49  ;;  %v385_v63 = vand.u32 2147483647, %v8574_v20  ;;  %vm381_vm7 = vweird.f32 %v8574_v20 }
  0xd9   :  { %8007 = vrcp.f32 %v8587_v51  ;;  %v387_v8 = vand.u32 2147483648, %v8574_v20  ;;  %v357_v16 = vand.u32 2147483648, %v8587_v51  ;;  %944 = vmatpush.bf16.msrb.mxu0 %v7579_v9  ;;  %v355_v33 = vand.u32 2147483647, %v8587_v51 }
  0xda   :  { %8009 = vrcp.f32 %v8598_v54  ;;  %910 = vmatpush.bf16.msra.mxu2 %v7559_v21  ;;  %vm8649_vm8 = vcmp.eq.f32.partialorder %v385_v63, 8.507059e+37  ;;  %v372_v34 = vand.u32 2147483648, %v8598_v54  ;;  %v370_v41 = vand.u32 2147483647, %v8598_v54  ;;  %931 = vmatpush.bf16.msra.mxu3 %v7565_v22 }
  0xdb   :  { %v388_v52 = vor.u32 1.1754944e-38, %v387_v8  ;;  %v358_v49 = vor.u32 1.1754944e-38, %v357_v16  ;;  %v7575_v8 = vld [vmem:[%s10562_s1 + $0x118] sm:$0xff] }
  0xdc   :  { %891 = vmatpush.bf16.msra.mxu1 %v7551_v55  ;;  %v373_v21 = vor.u32 1.1754944e-38, %v372_v34 }
  0xdd   :  { %945 = vmatpush.bf16.msrb.mxu0 %v7578_v17 }
  0xde   :  { %v8006_v35 = vpop.eup %8005  ;;  %911 = vmatpush.bf16.msra.mxu2 %v7558_v57  ;;  %932 = vmatpush.bf16.msra.mxu3 %v7564_v45 }
  0xdf   :  { %v377_v61 = vmul.f32 %v8006_v35, %v8574_v20  ;;  %v8629_v6 = vpop.eup %8007  ;;  %vm382_vm0 = vweird.f32 %v8006_v35 }
  0xe0   :  { %v8635_v11 = vpop.eup %8009  ;;  %v347_v15 = vmul.f32 %v8629_v6, %v8587_v51  ;;  %892 = vmatpush.bf16.msra.mxu1 %v7550_v60  ;;  %vm383_vm11 = vmor %vm381_vm7, %vm382_vm0  ;;  %vm352_vm12 = vweird.f32 %v8629_v6  ;;  %vm351_vm0 = vweird.f32 %v8587_v51  ;;  %v335_v51 = vmul.f32 %v5851_v14, %v8514_v44 }
  0xe1   :  { %v378_v7 = vsub.f32 1.0, %v377_v61  ;;  %v362_v25 = vmul.f32 %v8635_v11, %v8598_v54  ;;  %vm367_vm13 = vweird.f32 %v8635_v11  ;;  %vm353_vm7 = vmor %vm351_vm0, %vm352_vm12  ;;  %vm371_vm12 = vcmp.eq.f32.partialorder %v370_v41, 8.507059e+37 }
  0xe2   :  { %v348_v27 = vsub.f32 1.0, %v347_v15  ;;  %912 = vmatpush.bf16.msra.mxu2 %v7557_v4  ;;  %vm312_vm0 = vcmp.gt.f32.partialorder %v8488_v58, 0.0  ;;  %v7574_v15 = vld [vmem:[%s10562_s1 + $0x110] sm:$0xff] }
  0xe3   :  { %v379_v13 = vmul.f32 %v8006_v35, %v378_v7  ;;  %v363_v30 = vsub.f32 1.0, %v362_v25 }
  0xe4   :  { %v349_v48 = vmul.f32 %v8629_v6, %v348_v27  ;;  %893 = vmatpush.bf16.msra.mxu1 %v7549_v18 }
  0xe5   :  { %v380_v23 = vadd.f32 %v8006_v35, %v379_v13  ;;  %v364_v39 = vmul.f32 %v8635_v11, %v363_v30  ;;  %v7572_v13 = vld [vmem:[%s10562_s1 + $0x100] sm:$0xff] }
  0xe6   :  { %v350_v20 = vadd.f32 %v8629_v6, %v349_v48  ;;  %913 = vmatpush.bf16.msra.mxu2 %v7556_v28 }
  0xe7   :  { %v384_v37 = vsel %vm383_vm11, %v8006_v35, %v380_v23  ;;  %v365_v50 = vadd.f32 %v8635_v11, %v364_v39  ;;  %vm356_vm11 = vcmp.eq.f32.partialorder %v355_v33, 8.507059e+37  ;;  %v462_v39 = vld [vmem:[#allocation3 + $0x14] sm:$0x3] }
  0xe8   :  { %v389_v42 = vsel %vm8649_vm8, %v388_v52, %v384_v37  ;;  %vm366_vm8 = vweird.f32 %v8598_v54  ;;  %v354_v53 = vsel %vm353_vm7, %v8629_v6, %v350_v20  ;;  %894 = vmatpush.bf16.msra.mxu1 %v7548_v47  ;;  %vm326_vm7 = vcmp.eq.f32.partialorder %v8550_v32, 1.0 }
  0xe9   :  { %v390_v46 = vmul.f32 %v389_v42, %v336_v12  ;;  %vm368_vm5 = vmor %vm366_vm8, %vm367_vm13  ;;  %v359_v55 = vsel %vm356_vm11, %v358_v49, %v354_v53  ;;  %vm10574_vm13 = vcmask 519169   ;;  %vm411_vm8 = vcmp.eq.f32.partialorder %v8555_v36, 0.0 }
  0xea   :  { %v369_v56 = vsel %vm368_vm5, %v8635_v11, %v365_v50  ;;  %v360_v57 = vmul.f32 %v359_v55, %v334_v43  ;;  %vm327_vm5 = vcmp.eq.f32.partialorder %v8555_v36, 1.0  ;;  %vm311_vm11 = vcmp.gt.f32.partialorder %v8499_v3, 0.0 }
  0xeb   :  { %v408_v31 = vsel %vm328_vm15, %v8493_v1, %v390_v46  ;;  %v374_v24 = vsel %vm371_vm12, %v373_v21, %v369_v56  ;;  %v7577_v1 = vld [vmem:[%s10562_s1 + $0x128] sm:$0xff]  ;;  %vm410_vm15 = vcmp.eq.f32.partialorder %v8550_v32, 0.0  ;;  %vm8718_vm12 = vmor %vm430_vm9, %vm431_vm10  ;;  %vm481_vm9 = vsmask.f32 7424  ;;  %v8183_v32 = vld [vmem:[%s10568_s7] sm:$0x7f] }
  0xec   :  { %v416_v54 = vsel %vm412_vm1, -1.0, %v408_v31  ;;  %v375_v59 = vmul.f32 %v374_v24, %v335_v51  ;;  %v406_v61 = vsel %vm326_vm7, %v8511_v10, %v360_v57  ;;  %vm310_vm1 = vcmp.gt.f32.partialorder %v8496_v2, 0.0  ;;  %946 = vmatpush.bf16.msrb.mxu0 %v7577_v1 }
  0xed   :  { %v420_v35 = vsel %vm312_vm0, %v8488_v58, %v416_v54  ;;  %v414_v58 = vsel %vm410_vm15, -1.0, %v406_v61  ;;  %v478_v45 = vunpack.c.l.b16 %v462_v39  ;;  %vm517_vm10 = vsmask.f32 6400 }
  0xee   :  { %v424_v60 = vpack.c.bf16 %v420_v35, %v420_v35  ;;  %v407_v29 = vsel %vm327_vm5, %v8514_v44, %v375_v59  ;;  %v418_v10 = vsel %vm310_vm1, %v8496_v2, %v414_v58 }
  0xef   :  { %v415_v4 = vsel %vm411_vm8, -1.0, %v407_v29  ;;  %v422_v36 = vpack.c.bf16 %v418_v10, %v418_v10  ;;  %v480_v50 = vpack.c.b16 %v478_v45, %v478_v45 }
  0xf0   :  { %v438_v63 = vrot.slane %v424_v60, 7  ;;  %v419_v44 = vsel %vm311_vm11, %v8499_v3, %v415_v4  ;;  %947 = vmatpush.bf16.msrb.mxu0 %v7576_v62 }
  0xf1   :  { %v423_v6 = vpack.c.bf16 %v419_v44, %v419_v44  ;;  %v433_v7 = vrot.slane %v422_v36, 7  ;;  %v502_v21 = vshll.u32 %v480_v50, 16  ;;  %v530_v31 = vshrl.u32 %v480_v50, 16 }
  0xf2   :  { %v439_v5 = vrot.slane %v438_v63, 4  ;;  %454 = vst.msk [vmem:[#allocation3 + $0xc] sm:$0xe] %vm10574_vm13, %v438_v63  ;;  %v513_v57 = vrot.slane %v480_v50, 1  ;;  %v543_v36 = vrot.slane %v480_v50, 2 }
  0xf3   :  { %v435_v9 = vrot.slane %v423_v6, 7  ;;  %v434_v11 = vrot.slane %v433_v7, 4  ;;  %450 = vst.msk [vmem:[#allocation3] sm:$0xe] %vm10574_vm13, %v433_v7  ;;  %v532_v35 = vrot.slane %v530_v31, 1  ;;  %v533_v59 = vrot.slane %v502_v21, 2 }
  0xf4   :  { %v441_v2 = vsel %vm8718_vm12, %v439_v5, %v8564_v38  ;;  %948 = vmatpush.bf16.msrb.mxu0 %v7575_v8  ;;  %v7573_v38 = vld [vmem:[%s10562_s1 + $0x108] sm:$0xff]  ;;  %v504_v60 = vrot.slane %v502_v21, 1  ;;  %v6076_v31 = vld [vmem:[#allocation9 + $0x50] sm:$0xf] }
  0xf5   :  { %455 = vst.msk [vmem:[#allocation3 + $0x10] sm:$0xf] %vm10573_vm6, %v441_v2  ;;  %v437_v3 = vrot.slane %v435_v9, 4  ;;  %v436_v12 = vsel %vm8718_vm12, %v434_v11, %v435_v9  ;;  %v534_v58 = vor.u32 %v533_v59, %v532_v35  ;;  %v627_v11 = vperm.slane %v8430_v40, 1  ;;  %v7629_v21 = vld [vmem:[#allocation9 + $0x174] sm:$0xf0] }
  0xf6   :  { %451 = vst.msk [vmem:[#allocation3 + $0x4] sm:$0xf] %vm10573_vm6, %v436_v12 }
  0xf7   :  { %453 = vst.msk [vmem:[#allocation3 + $0x8] sm:$0x1] %vm10572_vm14, %v437_v3 }
  0xf8   :  { %949 = vmatpush.bf16.msrb.mxu0 %v7574_v15 }
  0xfc   :  { %950 = vmatpush.bf16.msrb.mxu0 %v7573_v38  ;;  %v7539_v43 = vld [vmem:[#allocation3 + $0xc] sm:$0xff] }
  0xfd   :  { %v7538_v18 = vld [vmem:[#allocation3] sm:$0xff]  ;;  %v497_v49 = vshll.u32 %v7539_v43, 16  ;;  %v495_v51 = vshrl.u32 %v7539_v43, 16  ;;  %v512_v55 = vrot.slane %v7539_v43, 1  ;;  %v542_v44 = vrot.slane %v7539_v43, 2 }
  0xfe   :  { %v459_v19 = vld [vmem:[#allocation3 + $0x8] sm:$0x3]  ;;  %876 = vmatmul.bf16.vlgmr.msra.gmra.mxu0 %v7538_v18  ;;  %v485_v26 = vshll.u32 %v7538_v18, 16  ;;  %v483_v14 = vshrl.u32 %v7538_v18, 16  ;;  %v509_v22 = vrot.slane %v7538_v18, 1  ;;  %v539_v4 = vrot.slane %v7538_v18, 2 }
  0xff   :  { %v477_v25 = vunpack.c.l.b16 %v459_v19  ;;  %v499_v53 = vrot.slane %v497_v49, 1  ;;  %v527_v56 = vrot.slane %v495_v51, 1  ;;  %v528_v54 = vrot.slane %v497_v49, 2 }
 0x100   :  { %v487_v28 = vrot.slane %v485_v26, 1  ;;  %951 = vmatpush.bf16.msrb.mxu0 %v7572_v13  ;;  %v518_v30 = vrot.slane %v483_v14, 1  ;;  %v519_v48 = vrot.slane %v485_v26, 2  ;;  %v514_v1 = vsel %vm190_vm2, %v512_v55, %v513_v57  ;;  %v7613_v57 = vld [vmem:[#allocation9 + $0xf4] sm:$0xf0] }
 0x101   :  { %v479_v27 = vpack.c.b16 %v477_v25, %v477_v25  ;;  %v500_v24 = vor.u32 %v499_v53, %v495_v51  ;;  %v529_v61 = vor.u32 %v528_v54, %v527_v56  ;;  %v544_v5 = vsel %vm10575_vm3, %v542_v44, %v543_v36  ;;  %v6220_v53 = vld [vmem:[#allocation9 + $0x170] sm:$0xf]  ;;  %v7645_v44 = vld [vmem:[#allocation9 + $0x1f4] sm:$0xf0]  ;;  %v6068_v36 = vld [vmem:[#allocation9 + $0x40] sm:$0xf] }
 0x102   :  { %v488_v52 = vor.u32 %v487_v28, %v483_v14  ;;  %v520_v20 = vor.u32 %v519_v48, %v518_v30  ;;  %v6092_v30 = vld [vmem:[#allocation9 + $0x70] sm:$0xf]  ;;  %v7597_v48 = vld [vmem:[#allocation9 + $0x74] sm:$0xf0]  ;;  %v6221_v56 = vor.u32 %v7629_v21, %v6220_v53  ;;  %v6132_v21 = vld [vmem:[#allocation9 + $0xc0] sm:$0xf] }
 0x103   :  { %v510_v23 = vrot.slane %v479_v27, 1  ;;  %v490_v16 = vshll.u32 %v479_v27, 16  ;;  %v521_v33 = vshrl.u32 %v479_v27, 16  ;;  %v505_v29 = vsel %vm481_vm9, %v500_v24, %v504_v60  ;;  %v6156_v54 = vld [vmem:[#allocation9 + $0xf0] sm:$0xf] }
 0x104   :  { %v535_v62 = vsel %vm517_vm10, %v529_v61, %v534_v58  ;;  %v540_v63 = vrot.slane %v479_v27, 2  ;;  %v7593_v24 = vld [vmem:[#allocation9 + $0x54] sm:$0xf0]  ;;  %1711 = vmatpush.bf16.msrb.mxu3 %v6221_v56  ;;  %v6212_v58 = vld [vmem:[#allocation9 + $0x160] sm:$0xf] }
 0x105   :  { %v511_v34 = vsel %vm190_vm2, %v509_v22, %v510_v23  ;;  %v492_v47 = vrot.slane %v490_v16, 1  ;;  %v524_v37 = vrot.slane %v490_v16, 2  ;;  %v523_v41 = vrot.slane %v521_v33, 1  ;;  %v7641_v53 = vld [vmem:[#allocation9 + $0x1d4] sm:$0xf0] }
 0x106   :  { %914 = vmatmul.bf16.vlgmr.msra.gmra.mxu2 %v511_v34  ;;  %v541_v10 = vsel %vm10575_vm3, %v539_v4, %v540_v63  ;;  %v6093_v34 = vor.u32 %v7597_v48, %v6092_v30  ;;  %v6077_v60 = vor.u32 %v7593_v24, %v6076_v31  ;;  %v6284_v63 = vld [vmem:[#allocation9 + $0x1f0] sm:$0xf]  ;;  %v7609_v30 = vld [vmem:[#allocation9 + $0xd4] sm:$0xf0]  ;;  %v7607_v56 = vld [vmem:[#allocation9 + $0xc4] sm:$0xf0] }
 0x107   :  { %v493_v42 = vsel %vm481_vm9, %v488_v52, %v492_v47  ;;  %v525_v17 = vor.u32 %v524_v37, %v523_v41 }
 0x108   :  { %895 = vmatmul.bf16.vlgmr.msra.gmra.mxu1 %v493_v42 }
 0x109   :  { %v526_v46 = vsel %vm517_vm10, %v520_v20, %v525_v17  ;;  %1673 = vmatpush.bf16.msrb.mxu1 %v6093_v34  ;;  %v7595_v20 = vld [vmem:[#allocation9 + $0x64] sm:$0xf0] }
 0x10a   :  { %933 = vmatmul.bf16.vlgmr.msra.gmra.mxu3 %v526_v46 }
 0x10e   :  { %881 = vmatmul.bf16.gmra.mxu0 %v7539_v43  ;;  %v6084_v43 = vld [vmem:[#allocation9 + $0x60] sm:$0xf] }
 0x10f   :  { %v6085_v46 = vor.u32 %v7595_v20, %v6084_v43  ;;  %v6196_v43 = vld [vmem:[#allocation9 + $0x140] sm:$0xf]  ;;  %v7623_v20 = vld [vmem:[#allocation9 + $0x144] sm:$0xf0] }
 0x111   :  { %1674 = vmatpush.bf16.msrb.mxu1 %v6085_v46 }
 0x115   :  { %1675 = vmatpush.bf16.msrb.mxu1 %v6077_v60 }
 0x116   :  { %919 = vmatmul.bf16.gmra.mxu2 %v514_v1  ;;  %v6157_v1 = vor.u32 %v7613_v57, %v6156_v54  ;;  %v6052_v54 = vld [vmem:[#allocation9 + $0x20] sm:$0xf]  ;;  %v7587_v57 = vld [vmem:[#allocation9 + $0x24] sm:$0xf0] }
 0x117   :  { %v6053_v60 = vor.u32 %v7587_v57, %v6052_v54  ;;  %v7635_v54 = vld [vmem:[#allocation9 + $0x1a4] sm:$0xf0]  ;;  %v6348_v57 = vld [vmem:[#allocation9 + $0x270] sm:$0xf] }
 0x118   :  { %900 = vmatmul.bf16.gmra.mxu1 %v505_v29  ;;  %1692 = vmatpush.bf16.msrb.mxu2 %v6157_v1  ;;  %v6133_v1 = vor.u32 %v7607_v56, %v6132_v21 }
 0x11a   :  { %938 = vmatmul.bf16.gmra.mxu3 %v535_v62  ;;  %v7627_v62 = vld [vmem:[#allocation9 + $0x164] sm:$0xf0] }
 0x11e   :  { %952 = vmatmul.bf16.vlgmr.msrb.gmra.mxu0 %v541_v10  ;;  %v6213_v10 = vor.u32 %v7627_v62, %v6212_v58 }
 0x120   :  { %1712 = vmatpush.bf16.msrb.mxu3 %v6213_v10  ;;  %v7621_v10 = vld [vmem:[#allocation9 + $0x134] sm:$0xf0] }
 0x12e   :  { %957 = vmatmul.bf16.gmra.mxu0 %v544_v5  ;;  %v7591_v5 = vld [vmem:[#allocation9 + $0x44] sm:$0xf0] }
 0x17b   :  { %v877_v6 = vpop.f32.mrf.mxu0 }
 0x17c   :  { %v878_v15 = vadd.f32 %v877_v6, %v627_v11 }
 0x183   :  { %v879_v7 = vpop.f32.mrf.mxu0 }
 0x184   :  { %v880_v27 = vadd.f32 %v879_v7, %v627_v11 }
 0x185   :  { %v896_v2 = vpop.f32.mrf.mxu1 }
 0x186   :  { %v897_v38 = vadd.f32 %v896_v2, %v878_v15  ;;  %v6148_v2 = vld [vmem:[#allocation9 + $0xe0] sm:$0xf] }
 0x189   :  { %v915_v9 = vpop.f32.mrf.mxu2 }
 0x18a   :  { %v916_v13 = vadd.f32 %v915_v9, %v897_v38  ;;  %v7611_v9 = vld [vmem:[#allocation9 + $0xe4] sm:$0xf0] }
 0x18b   :  { %v882_v8 = vpop.f32.mrf.mxu0  ;;  %v6149_v15 = vor.u32 %v7611_v9, %v6148_v2  ;;  %v7605_v2 = vld [vmem:[#allocation9 + $0xb4] sm:$0xf0]  ;;  %v7615_v9 = vld [vmem:[#allocation9 + $0x104] sm:$0xf0] }
 0x18c   :  { %v883_v39 = vadd.f32 %v882_v8, %v627_v11  ;;  %v6285_v8 = vor.u32 %v7645_v44, %v6284_v63  ;;  %v6260_v44 = vld [vmem:[#allocation9 + $0x1c0] sm:$0xf] }
 0x18d   :  { %v934_v3 = vpop.f32.mrf.mxu3  ;;  %v898_v18 = vpop.f32.mrf.mxu1  ;;  %1693 = vmatpush.bf16.msrb.mxu2 %v6149_v15  ;;  %v6044_v15 = vld [vmem:[#allocation9 + $0x10] sm:$0xf] }
 0x18e   :  { %v935_v25 = vadd.f32 %v934_v3, %v916_v13  ;;  %v899_v22 = vadd.f32 %v898_v18, %v880_v27  ;;  %1730 = vmatpush.bf16.msra.mxu0 %v6285_v8  ;;  %v6276_v27 = vld [vmem:[#allocation9 + $0x1e0] sm:$0xf]  ;;  %v6124_v8 = vld [vmem:[#allocation9 + $0xb0] sm:$0xf] }
 0x191   :  { %v917_v19 = vpop.f32.mrf.mxu2 }
 0x192   :  { %v918_v52 = vadd.f32 %v917_v19, %v899_v22 }
 0x193   :  { %v884_v12 = vpop.f32.mrf.mxu0 }
 0x194   :  { %v885_v61 = vadd.f32 %v884_v12, %v627_v11  ;;  %v6069_v11 = vor.u32 %v7591_v5, %v6068_v36  ;;  %v7639_v36 = vld [vmem:[#allocation9 + $0x1c4] sm:$0xf0] }
 0x195   :  { %v936_v26 = vpop.f32.mrf.mxu3  ;;  %v901_v16 = vpop.f32.mrf.mxu1 }
 0x196   :  { %v937_v33 = vadd.f32 %v936_v26, %v918_v52  ;;  %v902_v17 = vadd.f32 %v901_v16, %v883_v39  ;;  %1676 = vmatpush.bf16.msrb.mxu1 %v6069_v11  ;;  %v7625_v26 = vld [vmem:[#allocation9 + $0x154] sm:$0xf0]  ;;  %v6140_v16 = vld [vmem:[#allocation9 + $0xd0] sm:$0xf] }
 0x197   :  { %v6141_v39 = vor.u32 %v7609_v30, %v6140_v16  ;;  %v6116_v16 = vld [vmem:[#allocation9 + $0xa0] sm:$0xf] }
 0x199   :  { %v920_v47 = vpop.f32.mrf.mxu2  ;;  %1694 = vmatpush.bf16.msrb.mxu2 %v6141_v39  ;;  %v7583_v39 = vld [vmem:[#allocation9 + $0x4] sm:$0xf0] }
 0x19a   :  { %v921_v50 = vadd.f32 %v920_v47, %v902_v17  ;;  %v6060_v47 = vld [vmem:[#allocation9 + $0x30] sm:$0xf] }
 0x19b   :  { %v953_v14 = vpop.f32.mrf.mxu0  ;;  %v6268_v17 = vld [vmem:[#allocation9 + $0x1d0] sm:$0xf] }
 0x19c   :  { %v8754_v28 = vadd.f32 %v953_v14, %v935_v25  ;;  %v6204_v25 = vld [vmem:[#allocation9 + $0x150] sm:$0xf] }
 0x19d   :  { %v939_v42 = vpop.f32.mrf.mxu3  ;;  %v903_v35 = vpop.f32.mrf.mxu1  ;;  %v6205_v52 = vor.u32 %v7625_v26, %v6204_v25  ;;  %1695 = vmatpush.bf16.msrb.mxu2 %v6133_v1  ;;  %v7585_v25 = vld [vmem:[#allocation9 + $0x14] sm:$0xf0]  ;;  %v6180_v26 = vld [vmem:[#allocation9 + $0x120] sm:$0xf] }
 0x19e   :  { %v8757_v23 = vmin.f32 %v8754_v28, 0.0  ;;  %v940_v55 = vadd.f32 %v939_v42, %v921_v50  ;;  %v904_v6 = vadd.f32 %v903_v35, %v885_v61  ;;  %vm963_vm11 = vcmp.gt.f32.partialorder %v8754_v28, 0.0 }
 0x19f   :  { %1713 = vmatpush.bf16.msrb.mxu3 %v6205_v52  ;;  %v6252_v52 = vld [vmem:[#allocation9 + $0x1b0] sm:$0xf] }
 0x1a0   :  { %v971_v40 = vmul.f32 1.442695, %v8757_v23 }
 0x1a1   :  { %v922_v4 = vpop.f32.mrf.mxu2 }
 0x1a2   :  { %8011 = vpow2.f32 %v971_v40  ;;  %v923_v13 = vadd.f32 %v922_v4, %v904_v6  ;;  %v7643_v40 = vld [vmem:[#allocation9 + $0x1e4] sm:$0xf0]  ;;  %v6188_v4 = vld [vmem:[#allocation9 + $0x130] sm:$0xf]  ;;  %v6164_v6 = vld [vmem:[#allocation9 + $0x100] sm:$0xf] }
 0x1a3   :  { %v955_v37 = vpop.f32.mrf.mxu0  ;;  %v6277_v34 = vor.u32 %v7643_v40, %v6276_v27  ;;  %v6125_v27 = vor.u32 %v7605_v2, %v6124_v8  ;;  %v7637_v40 = vld [vmem:[#allocation9 + $0x1b4] sm:$0xf0] }
 0x1a4   :  { %v8760_v41 = vadd.f32 %v955_v37, %v937_v33  ;;  %v7589_v37 = vld [vmem:[#allocation9 + $0x34] sm:$0xf0] }
 0x1a5   :  { %v941_v12 = vpop.f32.mrf.mxu3  ;;  %v6061_v42 = vor.u32 %v7589_v37, %v6060_v47  ;;  %1731 = vmatpush.bf16.msra.mxu0 %v6277_v34  ;;  %v6253_v34 = vor.u32 %v7637_v40, %v6252_v52  ;;  %v7603_v47 = vld [vmem:[#allocation9 + $0xa4] sm:$0xf0]  ;;  %v6036_v37 = vld [vmem:[#allocation9] sm:$0xf]  ;;  %1696 = vmatpush.bf16.msrb.mxu2 %v6125_v27  ;;  %v6165_v40 = vor.u32 %v7615_v9, %v6164_v6  ;;  %v6086_v9 = vld [vmem:[#allocation9 + $0x68] sm:$0xf0] }
 0x1a6   :  { %v8763_v45 = vmin.f32 %v8760_v41, 0.0  ;;  %v942_v14 = vadd.f32 %v941_v12, %v923_v13  ;;  %v6189_v13 = vor.u32 %v7621_v10, %v6188_v4  ;;  %vm964_vm4 = vcmp.gt.f32.partialorder %v8760_v41, 0.0  ;;  %v6340_v27 = vld [vmem:[#allocation9 + $0x260] sm:$0xf] }
 0x1a7   :  { %1677 = vmatpush.bf16.msrb.mxu1 %v6061_v42 }
 0x1a8   :  { %v8765_v49 = vpop.eup %8011  ;;  %v973_v51 = vmul.f32 1.442695, %v8763_v45 }
 0x1a9   :  { %8013 = vlog2.f32 %v8765_v49  ;;  %v6022_v58 = vadd.f32 -1.0, %v8765_v49  ;;  %vm979_vm15 = vcmp.eq.f32.partialorder %v8765_v49, 1.0  ;;  %vm1063_vm8 = vcmp.eq.f32.partialorder %v8765_v49, 0.0 }
 0x1aa   :  { %8015 = vpow2.f32 %v973_v51  ;;  %v6197_v51 = vor.u32 %v7623_v20, %v6196_v43  ;;  %v6117_v43 = vor.u32 %v7603_v47, %v6116_v16  ;;  %v6037_v20 = vor.u32 %v7583_v39, %v6036_v37  ;;  %v6158_v37 = vld [vmem:[#allocation9 + $0xf8] sm:$0xf0]  ;;  %v6332_v39 = vld [vmem:[#allocation9 + $0x250] sm:$0xf] }
 0x1ab   :  { %v958_v59 = vpop.f32.mrf.mxu0  ;;  %1678 = vmatpush.bf16.msrb.mxu1 %v6053_v60  ;;  %v987_v21 = vmul.f32 %v6022_v58, %v8757_v23 }
 0x1ac   :  { %v8769_v29 = vadd.f32 %v958_v59, %v940_v55  ;;  %v6269_v55 = vor.u32 %v7641_v53, %v6268_v17  ;;  %1714 = vmatpush.bf16.msrb.mxu3 %v6197_v51  ;;  %v6172_v17 = vld [vmem:[#allocation9 + $0x110] sm:$0xf]  ;;  %v6244_v51 = vld [vmem:[#allocation9 + $0x1a0] sm:$0xf]  ;;  %1697 = vmatpush.bf16.msrb.mxu2 %v6117_v43  ;;  %v7657_v43 = vld [vmem:[#allocation9 + $0x254] sm:$0xf0] }
 0x1ae   :  { %v8772_v7 = vmin.f32 %v8769_v29, 0.0  ;;  %1732 = vmatpush.bf16.msra.mxu0 %v6269_v55 }
 0x1af   :  { %v8014_v3 = vpop.eup %8013 }
 0x1b0   :  { %v8774_v38 = vpop.eup %8015  ;;  %v8776_v18 = vmul.f32 0.6931472, %v8014_v3  ;;  %v975_v19 = vmul.f32 1.442695, %v8772_v7  ;;  %1715 = vmatpush.bf16.msrb.mxu3 %v6189_v13 }
 0x1b1   :  { %8017 = vlog2.f32 %v8774_v38  ;;  %v8800_v63 = vadd.f32 -1.0, %v8774_v38 }
 0x1b2   :  { %8019 = vrcp.f32 %v8776_v18  ;;  %v1008_v48 = vand.u32 2147483647, %v8776_v18  ;;  %v1010_v46 = vand.u32 2147483648, %v8776_v18  ;;  %vm1004_vm7 = vweird.f32 %v8776_v18 }
 0x1b3   :  { %8021 = vpow2.f32 %v975_v19  ;;  %v960_v22 = vpop.f32.mrf.mxu0  ;;  %v6261_v19 = vor.u32 %v7639_v36, %v6260_v44  ;;  %v6245_v44 = vor.u32 %v7635_v54, %v6244_v51  ;;  %v6108_v36 = vld [vmem:[#allocation9 + $0x90] sm:$0xf] }
 0x1b4   :  { %v8782_v33 = vadd.f32 %v960_v22, %v942_v14  ;;  %vm8804_vm5 = vcmp.eq.f32.partialorder %v1008_v48, 8.507059e+37  ;;  %v1011_v11 = vor.u32 1.1754944e-38, %v1010_v46  ;;  %v7619_v14 = vld [vmem:[#allocation9 + $0x124] sm:$0xf0]  ;;  %v6045_v22 = vor.u32 %v7585_v25, %v6044_v15  ;;  %v7617_v46 = vld [vmem:[#allocation9 + $0x114] sm:$0xf0] }
 0x1b5   :  { %1733 = vmatpush.bf16.msra.mxu0 %v6261_v19  ;;  %v6181_v48 = vor.u32 %v7619_v14, %v6180_v26  ;;  %v6173_v10 = vor.u32 %v7617_v46, %v6172_v17  ;;  %v6100_v19 = vld [vmem:[#allocation9 + $0x80] sm:$0xf]  ;;  %v7599_v14 = vld [vmem:[#allocation9 + $0x84] sm:$0xf0] }
 0x1b6   :  { %v8786_v50 = vmin.f32 %v8782_v33, 0.0  ;;  %1679 = vmatpush.bf16.msrb.mxu1 %v6045_v22  ;;  %v7659_v22 = vld [vmem:[#allocation9 + $0x264] sm:$0xf0] }
 0x1b7   :  { %v8018_v31 = vpop.eup %8017  ;;  %1716 = vmatpush.bf16.msrb.mxu3 %v6181_v48  ;;  %v988_v48 = vmul.f32 %v8800_v63, %v8763_v45  ;;  %v6341_v47 = vor.u32 %v7659_v22, %v6340_v27  ;;  %v7596_v63 = vld [vmem:[#allocation9 + $0x74] sm:$0xf]  ;;  %v7626_v27 = vld [vmem:[#allocation9 + $0x164] sm:$0xf]  ;;  %v6214_v22 = vld [vmem:[#allocation9 + $0x168] sm:$0xf0] }
 0x1b8   :  { %v8788_v24 = vpop.eup %8019  ;;  %v8790_v35 = vmul.f32 0.6931472, %v8018_v31  ;;  %v977_v59 = vmul.f32 1.442695, %v8786_v50 }
 0x1b9   :  { %v8793_v61 = vpop.eup %8021  ;;  %v1000_v62 = vmul.f32 %v8788_v24, %v8776_v18  ;;  %vm1005_vm0 = vweird.f32 %v8788_v24  ;;  %1734 = vmatpush.bf16.msra.mxu0 %v6253_v34  ;;  %v6101_v34 = vor.u32 %v7599_v14, %v6100_v19 }
 0x1ba   :  { %8023 = vrcp.f32 %v8790_v35  ;;  %vm8812_vm1 = vmor %vm1004_vm7, %vm1005_vm0  ;;  %v1023_v3 = vand.u32 2147483647, %v8790_v35  ;;  %v1025_v12 = vand.u32 2147483648, %v8790_v35  ;;  %1680 = vmatpush.bf16.msrb.mxu1 %v6037_v20 }
 0x1bb   :  { %v1001_v5 = vsub.f32 1.0, %v1000_v62  ;;  %8025 = vlog2.f32 %v8793_v61  ;;  %1717 = vmatpush.bf16.msrb.mxu3 %v6173_v10 }
 0x1bc   :  { %8027 = vpow2.f32 %v977_v59  ;;  %vm8830_vm0 = vcmp.eq.f32.partialorder %v1023_v3, 8.507059e+37  ;;  %v7661_v59 = vld [vmem:[#allocation9 + $0x274] sm:$0xf0] }
 0x1bd   :  { %v1002_v18 = vmul.f32 %v8788_v24, %v1001_v5  ;;  %v7601_v5 = vld [vmem:[#allocation9 + $0x94] sm:$0xf0]  ;;  %1735 = vmatpush.bf16.msra.mxu0 %v6245_v44 }
 0x1be   :  { %v7633_v3 = vld [vmem:[#allocation9 + $0x194] sm:$0xf0]  ;;  %v6109_v26 = vor.u32 %v7601_v5, %v6108_v36  ;;  %v6222_v36 = vld [vmem:[#allocation9 + $0x178] sm:$0xf0]  ;;  %v7594_v5 = vld [vmem:[#allocation9 + $0x64] sm:$0xf] }
 0x1bf   :  { %v1003_v30 = vadd.f32 %v8788_v24, %v1002_v18  ;;  %1718 = vmatpush.bf16.msrb.mxu3 %v6165_v40 }
 0x1c0   :  { %v8822_v42 = vpop.eup %8023  ;;  %1698 = vmatpush.bf16.msrb.mxu2 %v6109_v26 }
 0x1c1   :  { %v8026_v53 = vpop.eup %8025  ;;  %v1007_v31 = vsel %vm8812_vm1, %v8788_v24, %v1003_v30  ;;  %v1015_v55 = vmul.f32 %v8822_v42, %v8790_v35  ;;  %vm1020_vm7 = vweird.f32 %v8822_v42  ;;  %v6349_v24 = vor.u32 %v7661_v59, %v6348_v57  ;;  %v7612_v30 = vld [vmem:[#allocation9 + $0xf4] sm:$0xf]  ;;  %v7610_v59 = vld [vmem:[#allocation9 + $0xe4] sm:$0xf] }
 0x1c2   :  { %v8834_v1 = vpop.eup %8027  ;;  %v1012_v60 = vsel %vm8804_vm5, %v1011_v11, %v1007_v31  ;;  %v8839_v58 = vmul.f32 0.6931472, %v8026_v53  ;;  %vm980_vm1 = vcmp.eq.f32.partialorder %v8774_v38, 1.0  ;;  %vm1019_vm5 = vweird.f32 %v8790_v35  ;;  %v6236_v11 = vld [vmem:[#allocation9 + $0x190] sm:$0xf] }
 0x1c3   :  { %v1013_v62 = vmul.f32 %v1012_v60, %v987_v21  ;;  %v1016_v4 = vsub.f32 1.0, %v1015_v55  ;;  %1749 = vmatpush.bf16.msra.mxu1 %v6349_v24  ;;  %vm8854_vm14 = vmor %vm1019_vm5, %vm1020_vm7  ;;  %v6237_v16 = vor.u32 %v7633_v3, %v6236_v11  ;;  %v6228_v35 = vld [vmem:[#allocation9 + $0x180] sm:$0xf]  ;;  %v6161_v53 = vor.u32 %v7612_v30, %v6158_v37  ;;  %v6094_v21 = vld [vmem:[#allocation9 + $0x78] sm:$0xf0] }
 0x1c4   :  { %8029 = vrcp.f32 %v8839_v58  ;;  %v1038_v13 = vand.u32 2147483647, %v8839_v58  ;;  %v1040_v54 = vand.u32 2147483648, %v8839_v58  ;;  %v6097_v57 = vor.u32 %v7596_v63, %v6094_v21  ;;  %v6150_v60 = vld [vmem:[#allocation9 + $0xe8] sm:$0xf0]  ;;  %1699 = vmatpush.bf16.msrb.mxu2 %v6101_v34 }
 0x1c5   :  { %v1059_v8 = vsel %vm979_vm15, %v8757_v23, %v1013_v62  ;;  %v1017_v2 = vmul.f32 %v8822_v42, %v1016_v4  ;;  %8031 = vlog2.f32 %v8834_v1  ;;  %v1026_v23 = vor.u32 1.1754944e-38, %v1025_v12  ;;  %v7631_v12 = vld [vmem:[#allocation9 + $0x184] sm:$0xf0]  ;;  %1736 = vmatpush.bf16.msra.mxu0 %v6237_v16  ;;  %1787 = vmatpush.bf16.msra.mxu3 %v6161_v53  ;;  %v7628_v4 = vld [vmem:[#allocation9 + $0x174] sm:$0xf] }
 0x1c6   :  { %v1067_v15 = vsel %vm1063_vm8, -1.0, %v1059_v8  ;;  %v6229_v51 = vor.u32 %v7631_v12, %v6228_v35  ;;  %v6333_v24 = vor.u32 %v7657_v43, %v6332_v39  ;;  %v6153_v62 = vor.u32 %v7610_v59, %v6150_v60  ;;  %v6324_v3 = vld [vmem:[#allocation9 + $0x240] sm:$0xf]  ;;  %v7592_v35 = vld [vmem:[#allocation9 + $0x54] sm:$0xf] }
 0x1c7   :  { %v1071_v25 = vsel %vm963_vm11, %v8754_v28, %v1067_v15  ;;  %v1018_v49 = vadd.f32 %v8822_v42, %v1017_v2  ;;  %1750 = vmatpush.bf16.msra.mxu1 %v6341_v47  ;;  %vm981_vm15 = vcmp.eq.f32.partialorder %v8793_v61, 1.0  ;;  %v6024_v8 = vadd.f32 -1.0, %v8793_v61  ;;  %v7655_v15 = vld [vmem:[#allocation9 + $0x244] sm:$0xf0]  ;;  %v6078_v12 = vld [vmem:[#allocation9 + $0x58] sm:$0xf0] }
 0x1c8   :  { %v1075_v52 = vpack.c.bf16 %v1071_v25, %v1071_v25  ;;  %vm8888_vm8 = vcmp.eq.f32.partialorder %v1038_v13, 8.507059e+37  ;;  %1768 = vmatpush.bf16.msra.mxu2 %v6097_v57  ;;  %v6225_v11 = vor.u32 %v7628_v4, %v6222_v36  ;;  %vm965_vm7 = vcmp.gt.f32.partialorder %v8769_v29, 0.0  ;;  %v7608_v25 = vld [vmem:[#allocation9 + $0xd4] sm:$0xf]  ;;  %v7653_v34 = vld [vmem:[#allocation9 + $0x234] sm:$0xf0] }
 0x1c9   :  { %v1022_v28 = vsel %vm8854_vm14, %v8822_v42, %v1018_v49  ;;  %vm1064_vm14 = vcmp.eq.f32.partialorder %v8774_v38, 0.0  ;;  %1737 = vmatpush.bf16.msra.mxu0 %v6229_v51  ;;  %1788 = vmatpush.bf16.msra.mxu3 %v6153_v62  ;;  %v6089_v13 = vor.u32 %v7594_v5, %v6086_v9  ;;  %v6325_v19 = vor.u32 %v7655_v15, %v6324_v3  ;;  %v7606_v47 = vld [vmem:[#allocation9 + $0xc4] sm:$0xf]  ;;  %v6134_v51 = vld [vmem:[#allocation9 + $0xc8] sm:$0xf0] }
 0x1ca   :  { %v8870_v20 = vpop.eup %8029  ;;  %v8872_v17 = vrot.slane %v1075_v52, 7  ;;  %v1027_v46 = vsel %vm8830_vm0, %v1026_v23, %v1022_v28  ;;  %vm1065_vm0 = vcmp.eq.f32.partialorder %v8793_v61, 0.0  ;;  %v1041_v23 = vor.u32 1.1754944e-38, %v1040_v54  ;;  %v6316_v28 = vld [vmem:[#allocation9 + $0x230] sm:$0xf] }
 0x1cb   :  { %v8032_v31 = vpop.eup %8031  ;;  %v1028_v55 = vmul.f32 %v1027_v46, %v988_v48  ;;  %v1030_v42 = vmul.f32 %v8870_v20, %v8839_v58  ;;  %vm1035_vm11 = vweird.f32 %v8870_v20  ;;  %1751 = vmatpush.bf16.msra.mxu1 %v6333_v24  ;;  %v6217_v16 = vor.u32 %v7626_v27, %v6214_v22  ;;  %v7624_v53 = vld [vmem:[#allocation9 + $0x154] sm:$0xf]  ;;  %v6070_v54 = vld [vmem:[#allocation9 + $0x48] sm:$0xf0]  ;;  %v6308_v57 = vld [vmem:[#allocation9 + $0x220] sm:$0xf] }
 0x1cc   :  { %1099 = vst [vmem:[#allocation4] sm:$0xe] %v8872_v17  ;;  %v8880_v56 = vmul.f32 0.6931472, %v8032_v31  ;;  %v1084_v52 = vrot.slane %v8872_v17, 4  ;;  %1769 = vmatpush.bf16.msra.mxu2 %v6089_v13  ;;  %v989_v30 = vmul.f32 %v6024_v8, %v8772_v7  ;;  %v6081_v48 = vor.u32 %v7592_v35, %v6078_v12 }
 0x1cd   :  { %v1060_v10 = vsel %vm980_vm1, %v8763_v45, %v1028_v55  ;;  %v1031_v44 = vsub.f32 1.0, %v1030_v42  ;;  %1806 = vmatpush.bf16.msrb.mxu0 %v6225_v11  ;;  %v6317_v46 = vor.u32 %v7653_v34, %v6316_v28  ;;  %v6137_v21 = vor.u32 %v7606_v47, %v6134_v51  ;;  %v6206_v31 = vld [vmem:[#allocation9 + $0x158] sm:$0xf0]  ;;  %v7590_v55 = vld [vmem:[#allocation9 + $0x44] sm:$0xf] }
 0x1ce   :  { %v1068_v6 = vsel %vm1064_vm14, -1.0, %v1060_v10  ;;  %8033 = vrcp.f32 %v8880_v56  ;;  %v1053_v26 = vand.u32 2147483647, %v8880_v56  ;;  %v6209_v42 = vor.u32 %v7624_v53, %v6206_v31  ;;  %v7651_v4 = vld [vmem:[#allocation9 + $0x224] sm:$0xf0] }
 0x1cf   :  { %v1072_v45 = vsel %vm964_vm4, %v8760_v41, %v1068_v6  ;;  %v1032_v38 = vmul.f32 %v8870_v20, %v1031_v44  ;;  %v6142_v41 = vld [vmem:[#allocation9 + $0xd8] sm:$0xf0]  ;;  %vm1034_vm4 = vweird.f32 %v8839_v58  ;;  %1752 = vmatpush.bf16.msra.mxu1 %v6325_v19  ;;  %v1055_v24 = vand.u32 2147483648, %v8880_v56  ;;  %v7604_v5 = vld [vmem:[#allocation9 + $0xb4] sm:$0xf] }
 0x1d0   :  { %v1076_v18 = vpack.c.bf16 %v1072_v45, %v1072_v45  ;;  %v6145_v14 = vor.u32 %v7608_v25, %v6142_v41  ;;  %vm1036_vm1 = vmor %vm1034_vm4, %vm1035_vm11  ;;  %1770 = vmatpush.bf16.msra.mxu2 %v6081_v48  ;;  %v6073_v62 = vor.u32 %v7590_v55, %v6070_v54  ;;  %vm982_vm5 = vcmp.eq.f32.partialorder %v8834_v1, 1.0  ;;  %v6126_v6 = vld [vmem:[#allocation9 + $0xb8] sm:$0xf0]  ;;  %v7622_v2 = vld [vmem:[#allocation9 + $0x144] sm:$0xf] }
 0x1d1   :  { %v1033_v49 = vadd.f32 %v8870_v20, %v1032_v38  ;;  %1807 = vmatpush.bf16.msrb.mxu0 %v6217_v16  ;;  %v6025_v44 = vadd.f32 -1.0, %v8834_v1  ;;  %v6309_v36 = vor.u32 %v7651_v4, %v6308_v57  ;;  %v6129_v61 = vor.u32 %v7604_v5, %v6126_v6  ;;  %v6198_v9 = vld [vmem:[#allocation9 + $0x148] sm:$0xf0]  ;;  %v6300_v45 = vld [vmem:[#allocation9 + $0x210] sm:$0xf] }
 0x1d2   :  { %v1085_v40 = vrot.slane %v1076_v18, 7  ;;  %1789 = vmatpush.bf16.msra.mxu3 %v6145_v14  ;;  %v6201_v11 = vor.u32 %v7622_v2, %v6198_v9  ;;  %v7588_v3 = vld [vmem:[#allocation9 + $0x34] sm:$0xf]  ;;  %v6062_v15 = vld [vmem:[#allocation9 + $0x38] sm:$0xf0]  ;;  %v1056_v19 = vor.u32 1.1754944e-38, %v1055_v24 }
 0x1d3   :  { %v1037_v58 = vsel %vm1036_vm1, %v8870_v20, %v1033_v49  ;;  %1753 = vmatpush.bf16.msra.mxu1 %v6317_v46  ;;  %v7649_v18 = vld [vmem:[#allocation9 + $0x214] sm:$0xf0]  ;;  %v6065_v25 = vor.u32 %v7588_v3, %v6062_v15  ;;  %v7602_v27 = vld [vmem:[#allocation9 + $0xa4] sm:$0xf]  ;;  %v6118_v22 = vld [vmem:[#allocation9 + $0xa8] sm:$0xf0] }
 0x1d4   :  { %v8908_v37 = vpop.eup %8033  ;;  %v1086_v39 = vsel %vm8718_vm12, %v1084_v52, %v1085_v40  ;;  %v1087_v43 = vrot.slane %v1085_v40, 4  ;;  %v1042_v17 = vsel %vm8888_vm8, %v1041_v23, %v1037_v58  ;;  %vm1049_vm8 = vweird.f32 %v8880_v56  ;;  %1771 = vmatpush.bf16.msra.mxu2 %v6073_v62  ;;  %v7620_v16 = vld [vmem:[#allocation9 + $0x134] sm:$0xf]  ;;  %v6190_v35 = vld [vmem:[#allocation9 + $0x138] sm:$0xf0] }
 0x1d5   :  { %1100 = vst [vmem:[#allocation4 + $0x4] sm:$0xf] %v1086_v39  ;;  %v1043_v20 = vmul.f32 %v1042_v17, %v989_v30  ;;  %v1045_v63 = vmul.f32 %v8908_v37, %v8880_v56  ;;  %vm1050_vm14 = vweird.f32 %v8908_v37  ;;  %1808 = vmatpush.bf16.msrb.mxu0 %v6209_v42  ;;  %v6301_v14 = vor.u32 %v7649_v18, %v6300_v45  ;;  %v7586_v48 = vld [vmem:[#allocation9 + $0x24] sm:$0xf]  ;;  %v6054_v39 = vld [vmem:[#allocation9 + $0x28] sm:$0xf0] }
 0x1d6   :  { %1101 = vst [vmem:[#allocation4 + $0x8] sm:$0x1] %v1087_v43  ;;  %1790 = vmatpush.bf16.msra.mxu3 %v6137_v21  ;;  %vm8934_vm11 = vmor %vm1049_vm8, %vm1050_vm14  ;;  %v990_v52 = vmul.f32 %v6025_v44, %v8786_v50  ;;  %v6121_v40 = vor.u32 %v7602_v27, %v6118_v22  ;;  %v6292_v43 = vld [vmem:[#allocation9 + $0x200] sm:$0xf]  ;;  %v6057_v46 = vor.u32 %v7586_v48, %v6054_v39  ;;  %v7647_v51 = vld [vmem:[#allocation9 + $0x204] sm:$0xf0] }
 0x1d7   :  { %v1061_v59 = vsel %vm981_vm15, %v8772_v7, %v1043_v20  ;;  %v1046_v60 = vsub.f32 1.0, %v1045_v63  ;;  %vm966_vm15 = vcmp.gt.f32.partialorder %v8782_v33, 0.0  ;;  %1754 = vmatpush.bf16.msra.mxu1 %v6309_v36  ;;  %v7600_v53 = vld [vmem:[#allocation9 + $0x94] sm:$0xf]  ;;  %v6110_v20 = vld [vmem:[#allocation9 + $0x98] sm:$0xf0]  ;;  %v6293_v4 = vor.u32 %v7647_v51, %v6292_v43 }
 0x1d8   :  { %v1069_v10 = vsel %vm1065_vm0, -1.0, %v1061_v59  ;;  %vm8940_vm0 = vcmp.eq.f32.partialorder %v1053_v26, 8.507059e+37  ;;  %1772 = vmatpush.bf16.msra.mxu2 %v6065_v25  ;;  %v7618_v42 = vld [vmem:[#allocation9 + $0x124] sm:$0xf]  ;;  %v6182_v24 = vld [vmem:[#allocation9 + $0x128] sm:$0xf0] }
 0x1d9   :  { %v1073_v7 = vsel %vm965_vm7, %v8769_v29, %v1069_v10  ;;  %v1047_v8 = vmul.f32 %v8908_v37, %v1046_v60  ;;  %1809 = vmatpush.bf16.msrb.mxu0 %v6201_v11  ;;  %vm1066_vm7 = vcmp.eq.f32.partialorder %v8834_v1, 0.0  ;;  %v7584_v10 = vld [vmem:[#allocation9 + $0x14] sm:$0xf]  ;;  %v6046_v44 = vld [vmem:[#allocation9 + $0x18] sm:$0xf0]  ;;  %v6185_v45 = vor.u32 %v7618_v42, %v6182_v24 }
 0x1da   :  { %v1077_v38 = vpack.c.bf16 %v1073_v7, %v1073_v7  ;;  %1791 = vmatpush.bf16.msra.mxu3 %v6129_v61  ;;  %v7644_v36 = vld [vmem:[#allocation9 + $0x1f4] sm:$0xf]  ;;  %v7598_v61 = vld [vmem:[#allocation9 + $0x84] sm:$0xf]  ;;  %v6174_v29 = vld [vmem:[#allocation9 + $0x118] sm:$0xf0] }
 0x1db   :  { %v1048_v23 = vadd.f32 %v8908_v37, %v1047_v8  ;;  %1755 = vmatpush.bf16.msra.mxu1 %v6301_v14  ;;  %v6286_v8 = vld [vmem:[#allocation9 + $0x1f8] sm:$0xf0]  ;;  %v7616_v11 = vld [vmem:[#allocation9 + $0x114] sm:$0xf]  ;;  %v7582_v13 = vld [vmem:[#allocation9 + $0x4] sm:$0xf] }
 0x1dc   :  { %v8944_v41 = vrot.slane %v1077_v38, 7  ;;  %v8946_v49 = vld [vmem:[#allocation4] sm:$0xff]  ;;  %1773 = vmatpush.bf16.msra.mxu2 %v6057_v46  ;;  %v6102_v38 = vld [vmem:[#allocation9 + $0x88] sm:$0xf0]  ;;  %v6289_v25 = vor.u32 %v7644_v36, %v6286_v8  ;;  %v7642_v27 = vld [vmem:[#allocation9 + $0x1e4] sm:$0xf] }
 0x1dd   :  { %v1052_v56 = vsel %vm8934_vm11, %v8908_v37, %v1048_v23  ;;  %v1107_v26 = vld [vmem:[#allocation4 + $0x8] sm:$0x3]  ;;  %1681 = vmatmul.bf16.vlgmr.msrb.gmra.mxu1 %v8946_v49  ;;  %v1155_v58 = vrot.slane %v8946_v49, 1  ;;  %v1130_v34 = vshrl.u32 %v8946_v49, 16  ;;  %v1132_v47 = vshll.u32 %v8946_v49, 16 }
 0x1de   :  { %1102 = vst [vmem:[#allocation4 + $0xc] sm:$0xe] %v8944_v41  ;;  %v1057_v12 = vsel %vm8940_vm0, %v1056_v19, %v1052_v56  ;;  %v1125_v30 = vunpack.c.l.b16 %v1107_v26  ;;  %v6193_v37 = vor.u32 %v7620_v16, %v6190_v35  ;;  %1792 = vmatpush.bf16.msra.mxu3 %v6121_v40  ;;  %v1089_v2 = vrot.slane %v8944_v41, 4  ;;  %v6038_v14 = vld [vmem:[#allocation9 + $0x8] sm:$0xf0] }
 0x1df   :  { %v1058_v28 = vmul.f32 %v1057_v12, %v990_v52  ;;  %v1134_v21 = vrot.slane %v1132_v47, 1  ;;  %v1163_v31 = vrot.slane %v1130_v34, 1  ;;  %v1164_v55 = vrot.slane %v1132_v47, 2  ;;  %1756 = vmatpush.bf16.msra.mxu1 %v6293_v4  ;;  %v6278_v22 = vld [vmem:[#allocation9 + $0x1e8] sm:$0xf0] }
 0x1e0   :  { %v8960_v17 = vpack.c.b16 %v1125_v30, %v1125_v30  ;;  %1810 = vmatpush.bf16.msrb.mxu0 %v6193_v37  ;;  %v6049_v23 = vor.u32 %v7584_v10, %v6046_v44  ;;  %v6105_v41 = vor.u32 %v7598_v61, %v6102_v38  ;;  %v6177_v26 = vor.u32 %v7616_v11, %v6174_v29  ;;  %v7614_v12 = vld [vmem:[#allocation9 + $0x104] sm:$0xf]  ;;  %v6166_v30 = vld [vmem:[#allocation9 + $0x108] sm:$0xf0]  ;;  %v6350_v48 = vld [vmem:[#allocation9 + $0x278] sm:$0xf0] }
 0x1e1   :  { %v1062_v63 = vsel %vm982_vm5, %v8786_v50, %v1058_v28  ;;  %v1135_v62 = vor.u32 %v1134_v21, %v1130_v34  ;;  %v1165_v18 = vor.u32 %v1164_v55, %v1163_v31  ;;  %v6041_v16 = vor.u32 %v7582_v13, %v6038_v14  ;;  %v7640_v28 = vld [vmem:[#allocation9 + $0x1d4] sm:$0xf]  ;;  %v6270_v37 = vld [vmem:[#allocation9 + $0x1d8] sm:$0xf0]  ;;  %v7658_v43 = vld [vmem:[#allocation9 + $0x264] sm:$0xf] }
 0x1e2   :  { %v1070_v54 = vsel %vm1066_vm7, -1.0, %v1062_v63  ;;  %v1156_v57 = vrot.slane %v8960_v17, 1  ;;  %v1137_v59 = vshll.u32 %v8960_v17, 16  ;;  %v1166_v60 = vshrl.u32 %v8960_v17, 16  ;;  %1774 = vmatpush.bf16.msra.mxu2 %v6049_v23  ;;  %v6342_v46 = vld [vmem:[#allocation9 + $0x268] sm:$0xf0] }
 0x1e3   :  { %v1074_v50 = vsel %vm966_vm15, %v8782_v33, %v1070_v54  ;;  %v6113_v33 = vor.u32 %v7600_v53, %v6110_v20  ;;  %1825 = vmatpush.bf16.msrb.mxu1 %v6289_v25  ;;  %v6281_v35 = vor.u32 %v7642_v27, %v6278_v22  ;;  %v6169_v34 = vor.u32 %v7614_v12, %v6166_v30  ;;  %v7638_v51 = vld [vmem:[#allocation9 + $0x1c4] sm:$0xf]  ;;  %v6262_v20 = vld [vmem:[#allocation9 + $0x1c8] sm:$0xf0]  ;;  %v7656_v54 = vld [vmem:[#allocation9 + $0x254] sm:$0xf] }
 0x1e4   :  { %v1078_v5 = vpack.c.bf16 %v1074_v50, %v1074_v50  ;;  %v8974_v1 = vsel %vm190_vm2, %v1155_v58, %v1156_v57  ;;  %v1139_v6 = vrot.slane %v1137_v59, 1  ;;  %v1168_v7 = vrot.slane %v1166_v60, 1  ;;  %1811 = vmatpush.bf16.msrb.mxu0 %v6185_v45  ;;  %v7660_v58 = vld [vmem:[#allocation9 + $0x274] sm:$0xf]  ;;  %v7654_v36 = vld [vmem:[#allocation9 + $0x244] sm:$0xf] }
 0x1e5   :  { %1719 = vmatmul.bf16.vlgmr.msrb.gmra.mxu3 %v8974_v1  ;;  %v1169_v9 = vrot.slane %v1137_v59, 2  ;;  %v6353_v47 = vor.u32 %v7660_v58, %v6350_v48  ;;  %v6273_v39 = vor.u32 %v7640_v28, %v6270_v37  ;;  %v6345_v53 = vor.u32 %v7658_v43, %v6342_v46  ;;  %v6334_v59 = vld [vmem:[#allocation9 + $0x258] sm:$0xf0]  ;;  %v7636_v60 = vld [vmem:[#allocation9 + $0x1b4] sm:$0xf] }
 0x1e6   :  { %v1090_v3 = vrot.slane %v1078_v5, 7  ;;  %v8979_v15 = vsel %vm481_vm9, %v1135_v62, %v1139_v6  ;;  %1793 = vmatpush.bf16.msra.mxu3 %v6113_v33  ;;  %1775 = vmatpush.bf16.msra.mxu2 %v6041_v16  ;;  %v6265_v31 = vor.u32 %v7638_v51, %v6262_v20  ;;  %v6254_v62 = vld [vmem:[#allocation9 + $0x1b8] sm:$0xf0]  ;;  %v6337_v10 = vor.u32 %v7656_v54, %v6334_v59  ;;  %v6326_v5 = vld [vmem:[#allocation9 + $0x248] sm:$0xf0] }
 0x1e7   :  { %1700 = vmatmul.bf16.vlgmr.msrb.gmra.mxu2 %v8979_v15  ;;  %v1170_v19 = vor.u32 %v1169_v9, %v1168_v7  ;;  %1826 = vmatpush.bf16.msrb.mxu1 %v6281_v35  ;;  %v6257_v44 = vor.u32 %v7636_v60, %v6254_v62  ;;  %v7634_v8 = vld [vmem:[#allocation9 + $0x1a4] sm:$0xf]  ;;  %v6246_v61 = vld [vmem:[#allocation9 + $0x1a8] sm:$0xf0]  ;;  %v6318_v14 = vld [vmem:[#allocation9 + $0x238] sm:$0xf0] }
 0x1e8   :  { %v1091_v52 = vsel %vm8718_vm12, %v1089_v2, %v1090_v3  ;;  %v1092_v56 = vrot.slane %v1090_v3, 4  ;;  %1812 = vmatpush.bf16.msrb.mxu0 %v6177_v26  ;;  %v6249_v29 = vor.u32 %v7634_v8, %v6246_v61  ;;  %v7632_v27 = vld [vmem:[#allocation9 + $0x194] sm:$0xf]  ;;  %v1184_v26 = vrot.slane %v8960_v17, 2  ;;  %v7650_v35 = vld [vmem:[#allocation9 + $0x224] sm:$0xf] }
 0x1e9   :  { %1103 = vst [vmem:[#allocation4 + $0x10] sm:$0xf] %v1091_v52  ;;  %v8985_v40 = vsel %vm517_vm10, %v1165_v18, %v1170_v19  ;;  %v6329_v18 = vor.u32 %v7654_v36, %v6326_v5  ;;  %v6238_v52 = vld [vmem:[#allocation9 + $0x198] sm:$0xf0]  ;;  %v6310_v12 = vld [vmem:[#allocation9 + $0x228] sm:$0xf0] }
 0x1ea   :  { %1104 = vst [vmem:[#allocation4 + $0x14] sm:$0x1] %v1092_v56  ;;  %1738 = vmatmul.bf16.vlgmr.msra.gmra.mxu0 %v8985_v40  ;;  %1794 = vmatpush.bf16.msra.mxu3 %v6105_v41  ;;  %v7652_v41 = vld [vmem:[#allocation9 + $0x234] sm:$0xf]  ;;  %v6241_v16 = vor.u32 %v7632_v27, %v6238_v52  ;;  %v7630_v30 = vld [vmem:[#allocation9 + $0x184] sm:$0xf]  ;;  %v6313_v28 = vor.u32 %v7650_v35, %v6310_v12 }
 0x1eb   :  { %1844 = vmatpush.bf16.msrb.mxu2 %v6353_v47  ;;  %1827 = vmatpush.bf16.msrb.mxu1 %v6273_v39  ;;  %v6321_v22 = vor.u32 %v7652_v41, %v6318_v14  ;;  %v1183_v58 = vrot.slane %v8946_v49, 2  ;;  %v6230_v48 = vld [vmem:[#allocation9 + $0x188] sm:$0xf0]  ;;  %v7648_v37 = vld [vmem:[#allocation9 + $0x214] sm:$0xf] }
 0x1ec   :  { %1813 = vmatpush.bf16.msrb.mxu0 %v6169_v34  ;;  %v6233_v47 = vor.u32 %v7630_v30, %v6230_v48  ;;  %v6302_v39 = vld [vmem:[#allocation9 + $0x218] sm:$0xf0]  ;;  %v7646_v43 = vld [vmem:[#allocation9 + $0x204] sm:$0xf]  ;;  %v6294_v46 = vld [vmem:[#allocation9 + $0x208] sm:$0xf0] }
 0x1ed   :  { %v1185_v34 = vsel %vm10575_vm3, %v1183_v58, %v1184_v26  ;;  %v6305_v17 = vor.u32 %v7648_v37, %v6302_v39  ;;  %v6297_v51 = vor.u32 %v7646_v43, %v6294_v46  ;;  %v135_v43 = vld [vmem:[%s10568_s7 + $0x8] sm:$0x7f] }
 0x1ef   :  { %1845 = vmatpush.bf16.msrb.mxu2 %v6345_v53  ;;  %1828 = vmatpush.bf16.msrb.mxu1 %v6265_v31 }
 0x1f0   :  { %v8988_v63 = vld [vmem:[#allocation4 + $0xc] sm:$0xff] }
 0x1f1   :  { %v1110_v21 = vld [vmem:[#allocation4 + $0x14] sm:$0x3]  ;;  %1686 = vmatmul.bf16.gmra.mxu1 %v8988_v63  ;;  %v1144_v42 = vshll.u32 %v8988_v63, 16  ;;  %v1142_v57 = vshrl.u32 %v8988_v63, 16  ;;  %v1158_v4 = vrot.slane %v8988_v63, 1  ;;  %v1186_v20 = vrot.slane %v8988_v63, 2 }
 0x1f2   :  { %v1126_v55 = vunpack.c.l.b16 %v1110_v21 }
 0x1f3   :  { %v1146_v50 = vrot.slane %v1144_v42, 1  ;;  %v1172_v9 = vrot.slane %v1142_v57, 1  ;;  %v1173_v33 = vrot.slane %v1144_v42, 2  ;;  %1846 = vmatpush.bf16.msrb.mxu2 %v6337_v10  ;;  %1829 = vmatpush.bf16.msrb.mxu1 %v6257_v44 }
 0x1f4   :  { %v8993_v24 = vpack.c.b16 %v1126_v55, %v1126_v55 }
 0x1f5   :  { %v1147_v2 = vor.u32 %v1146_v50, %v1142_v57  ;;  %v1174_v19 = vor.u32 %v1173_v33, %v1172_v9 }
 0x1f6   :  { %v1159_v6 = vrot.slane %v8993_v24, 1  ;;  %v1149_v7 = vshll.u32 %v8993_v24, 16  ;;  %v1175_v45 = vshrl.u32 %v8993_v24, 16  ;;  %v1187_v53 = vrot.slane %v8993_v24, 2 }
 0x1f7   :  { %1847 = vmatpush.bf16.msrb.mxu2 %v6329_v18  ;;  %1830 = vmatpush.bf16.msrb.mxu1 %v6249_v29 }
 0x1f8   :  { %v1160_v38 = vsel %vm190_vm2, %v1158_v4, %v1159_v6  ;;  %v1151_v11 = vrot.slane %v1149_v7, 1  ;;  %v1178_v3 = vrot.slane %v1149_v7, 2  ;;  %v1177_v23 = vrot.slane %v1175_v45, 1 }
 0x1f9   :  { %1724 = vmatmul.bf16.gmra.mxu3 %v1160_v38  ;;  %v1188_v21 = vsel %vm10575_vm3, %v1186_v20, %v1187_v53 }
 0x1fa   :  { %v1152_v13 = vsel %vm481_vm9, %v1147_v2, %v1151_v11  ;;  %v1179_v25 = vor.u32 %v1178_v3, %v1177_v23 }
 0x1fb   :  { %1705 = vmatmul.bf16.gmra.mxu2 %v1152_v13  ;;  %1831 = vmatpush.bf16.msrb.mxu1 %v6241_v16 }
 0x1fc   :  { %v1180_v56 = vsel %vm517_vm10, %v1174_v19, %v1179_v25  ;;  %1848 = vmatpush.bf16.msrb.mxu2 %v6321_v22 }
 0x1fd   :  { %1743 = vmatmul.bf16.gmra.mxu0 %v1180_v56 }
 0x1ff   :  { %1832 = vmatpush.bf16.msrb.mxu1 %v6233_v47 }
 0x200   :  { %1849 = vmatpush.bf16.msrb.mxu2 %v6313_v28 }
 0x201   :  { %1757 = vmatmul.bf16.vlgmr.msra.gmra.mxu1 %v1185_v34 }
 0x204   :  { %1850 = vmatpush.bf16.msrb.mxu2 %v6305_v17 }
 0x208   :  { %1851 = vmatpush.bf16.msrb.mxu2 %v6297_v51 }
 0x209   :  { %1795 = vmatmul.bf16.vlgmr.msra.gmra.mxu3 %v8979_v15 }
 0x20b   :  { %1776 = vmatmul.bf16.vlgmr.msra.gmra.mxu2 %v8946_v49 }
 0x20d   :  { %1814 = vmatmul.bf16.vlgmr.msrb.gmra.mxu0 %v8974_v1  ;;  %v8179_v1 = vld [vmem:[%s10568_s7] sm:$0x7f] }
 0x20e   :  { %v1271_v42 = vperm.slane %v8179_v1, 2 }
 0x211   :  { %1762 = vmatmul.bf16.gmra.mxu1 %v1188_v21 }
 0x219   :  { %1800 = vmatmul.bf16.gmra.mxu3 %v1152_v13 }
 0x21b   :  { %1781 = vmatmul.bf16.gmra.mxu2 %v8988_v63 }
 0x21d   :  { %1819 = vmatmul.bf16.gmra.mxu0 %v1160_v38 }
 0x221   :  { %1833 = vmatmul.bf16.vlgmr.msrb.gmra.mxu1 %v8985_v40 }
 0x22b   :  { %1852 = vmatmul.bf16.vlgmr.msrb.gmra.mxu2 %v1185_v34 }
 0x231   :  { %1838 = vmatmul.bf16.gmra.mxu1 %v1180_v56 }
 0x23b   :  { %1857 = vmatmul.bf16.gmra.mxu2 %v1188_v21 }
 0x25a   :  { %v1682_v49 = vpop.f32.mrf.mxu1 }
 0x25b   :  { %v1683_v57 = vadd.f32 %v1682_v49, %v1271_v42  ;;  %v9056_v49 = vperm.slane %v135_v43, 2 }
 0x262   :  { %v1684_v15 = vpop.f32.mrf.mxu1 }
 0x263   :  { %v1685_v40 = vadd.f32 %v1684_v15, %v1271_v42 }
 0x267   :  { %v1739_v63 = vpop.f32.mrf.mxu0 }
 0x268   :  { %v1720_v54 = vpop.f32.mrf.mxu3 }
 0x26a   :  { %v1701_v31 = vpop.f32.mrf.mxu2 }
 0x26b   :  { %v1702_v60 = vadd.f32 %v1701_v31, %v1683_v57 }
 0x26d   :  { %v1721_v50 = vadd.f32 %v1720_v54, %v1702_v60 }
 0x26e   :  { %v1687_v55 = vpop.f32.mrf.mxu1 }
 0x26f   :  { %v1740_v44 = vadd.f32 %v1739_v63, %v1721_v50  ;;  %v1741_v6 = vpop.f32.mrf.mxu0  ;;  %v1688_v61 = vadd.f32 %v1687_v55, %v1271_v42 }
 0x270   :  { %v1722_v62 = vpop.f32.mrf.mxu3 }
 0x272   :  { %v1703_v59 = vpop.f32.mrf.mxu2 }
 0x273   :  { %v1704_v4 = vadd.f32 %v1703_v59, %v1685_v40 }
 0x275   :  { %v1723_v7 = vadd.f32 %v1722_v62, %v1704_v4 }
 0x276   :  { %v1689_v24 = vpop.f32.mrf.mxu1 }
 0x277   :  { %v1742_v45 = vadd.f32 %v1741_v6, %v1723_v7  ;;  %v1690_v13 = vadd.f32 %v1689_v24, %v1271_v42 }
 0x27a   :  { %v1744_v29 = vpop.f32.mrf.mxu0 }
 0x27c   :  { %v1725_v38 = vpop.f32.mrf.mxu3 }
 0x27e   :  { %v1706_v10 = vpop.f32.mrf.mxu2  ;;  %v1758_v36 = vpop.f32.mrf.mxu1 }
 0x27f   :  { %v9016_v5 = vadd.f32 %v1758_v36, %v1740_v44  ;;  %v1707_v9 = vadd.f32 %v1706_v10, %v1688_v61 }
 0x281   :  { %v9019_v8 = vmin.f32 %v9016_v5, 0.0  ;;  %v1726_v18 = vadd.f32 %v1725_v38, %v1707_v9 }
 0x282   :  { %v1746_v30 = vpop.f32.mrf.mxu0 }
 0x283   :  { %v1879_v2 = vmul.f32 1.442695, %v9019_v8  ;;  %v1745_v27 = vadd.f32 %v1744_v29, %v1726_v18 }
 0x284   :  { %v1727_v56 = vpop.f32.mrf.mxu3 }
 0x285   :  { %8035 = vpow2.f32 %v1879_v2 }
 0x286   :  { %v1708_v33 = vpop.f32.mrf.mxu2  ;;  %v1760_v11 = vpop.f32.mrf.mxu1 }
 0x287   :  { %v9022_v3 = vadd.f32 %v1760_v11, %v1742_v45  ;;  %v1709_v41 = vadd.f32 %v1708_v33, %v1690_v13 }
 0x289   :  { %v9025_v23 = vmin.f32 %v9022_v3, 0.0  ;;  %v1728_v26 = vadd.f32 %v1727_v56, %v1709_v41 }
 0x28a   :  { %v1815_v55 = vpop.f32.mrf.mxu0 }
 0x28b   :  { %v1883_v19 = vmul.f32 1.442695, %v9025_v23  ;;  %v9028_v25 = vpop.eup %8035  ;;  %v1747_v48 = vadd.f32 %v1746_v30, %v1728_v26 }
 0x28c   :  { %v1796_v21 = vpop.f32.mrf.mxu3  ;;  %v6354_v6 = vadd.f32 -1.0, %v9028_v25 }
 0x28d   :  { %8037 = vpow2.f32 %v1883_v19 }
 0x28e   :  { %v1777_v14 = vpop.f32.mrf.mxu2  ;;  %v1763_v22 = vpop.f32.mrf.mxu1  ;;  %8039 = vlog2.f32 %v9028_v25  ;;  %v9092_v41 = vmul.f32 %v6354_v6, %v9019_v8 }
 0x28f   :  { %v9030_v52 = vadd.f32 %v1763_v22, %v1745_v27  ;;  %v1778_v15 = vadd.f32 %v1777_v14, %v9056_v49 }
 0x291   :  { %v9034_v16 = vmin.f32 %v9030_v52, 0.0  ;;  %v1797_v60 = vadd.f32 %v1796_v21, %v1778_v15 }
 0x292   :  { %v1817_v7 = vpop.f32.mrf.mxu0 }
 0x293   :  { %v9036_v35 = vpop.eup %8037  ;;  %v1887_v12 = vmul.f32 1.442695, %v9034_v16  ;;  %v1816_v62 = vadd.f32 %v1815_v55, %v1797_v60  ;;  %v7697_v60 = vld [vmem:[#allocation12 + $0xf4] sm:$0xf0] }
 0x294   :  { %8041 = vlog2.f32 %v9036_v35  ;;  %v8040_v28 = vpop.eup %8039  ;;  %v1798_v50 = vpop.f32.mrf.mxu3  ;;  %v9103_v56 = vadd.f32 -1.0, %v9036_v35 }
 0x295   :  { %8043 = vpow2.f32 %v1887_v12  ;;  %v9042_v37 = vmul.f32 0.6931472, %v8040_v28 }
 0x296   :  { %v1779_v58 = vpop.f32.mrf.mxu2  ;;  %v1765_v34 = vpop.f32.mrf.mxu1 }
 0x297   :  { %v9040_v47 = vadd.f32 %v1765_v34, %v1747_v48  ;;  %8045 = vrcp.f32 %v9042_v37  ;;  %v1780_v40 = vadd.f32 %v1779_v58, %v9056_v49  ;;  %v1944_v9 = vand.u32 2147483647, %v9042_v37 }
 0x298   :  { %v1946_v14 = vand.u32 2147483648, %v9042_v37  ;;  %vm1940_vm5 = vweird.f32 %v9042_v37 }
 0x299   :  { %v9045_v39 = vmin.f32 %v9040_v47, 0.0  ;;  %v1799_v33 = vadd.f32 %v1798_v50, %v1780_v40  ;;  %vm9098_vm4 = vcmp.eq.f32.partialorder %v1944_v9, 8.507059e+37 }
 0x29a   :  { %v8042_v17 = vpop.eup %8041  ;;  %v1947_v21 = vor.u32 1.1754944e-38, %v1946_v14  ;;  %v1820_v6 = vpop.f32.mrf.mxu0 }
 0x29b   :  { %v1891_v46 = vmul.f32 1.442695, %v9045_v39  ;;  %v9051_v51 = vpop.eup %8043  ;;  %v9054_v20 = vmul.f32 0.6931472, %v8042_v17  ;;  %v1818_v12 = vadd.f32 %v1817_v7, %v1799_v33  ;;  %v1913_v7 = vmul.f32 %v9103_v56, %v9025_v23 }
 0x29c   :  { %8047 = vlog2.f32 %v9051_v51  ;;  %v1801_v26 = vpop.f32.mrf.mxu3  ;;  %v9120_v50 = vadd.f32 -1.0, %v9051_v51 }
 0x29d   :  { %8049 = vpow2.f32 %v1891_v46  ;;  %v9061_v31 = vpop.eup %8045  ;;  %v1974_v28 = vand.u32 2147483647, %v9054_v20  ;;  %v1976_v34 = vand.u32 2147483648, %v9054_v20  ;;  %v6436_v46 = vld [vmem:[#allocation12 + $0x70] sm:$0xf]  ;;  %vm1970_vm15 = vweird.f32 %v9054_v20 }
 0x29e   :  { %v1782_v53 = vpop.f32.mrf.mxu2  ;;  %8051 = vrcp.f32 %v9054_v20  ;;  %v1834_v42 = vpop.f32.mrf.mxu1  ;;  %v1936_v63 = vmul.f32 %v9061_v31, %v9042_v37  ;;  %vm1941_vm1 = vweird.f32 %v9061_v31 }
 0x29f   :  { %v1835_v44 = vadd.f32 %v1834_v42, %v1816_v62  ;;  %v1783_v13 = vadd.f32 %v1782_v53, %v9056_v49  ;;  %v7681_v53 = vld [vmem:[#allocation12 + $0x74] sm:$0xf0]  ;;  %v6500_v42 = vld [vmem:[#allocation12 + $0xf0] sm:$0xf]  ;;  %vm9114_vm14 = vmor %vm1940_vm5, %vm1941_vm1  ;;  %vm9132_vm11 = vcmp.eq.f32.partialorder %v1974_v28, 8.507059e+37 }
 0x2a0   :  { %v1937_v4 = vsub.f32 1.0, %v1936_v63  ;;  %v6501_v37 = vor.u32 %v7697_v60, %v6500_v42  ;;  %v6420_v42 = vld [vmem:[#allocation12 + $0x50] sm:$0xf]  ;;  %v7677_v60 = vld [vmem:[#allocation12 + $0x54] sm:$0xf0] }
 0x2a1   :  { %v1802_v17 = vadd.f32 %v1801_v26, %v1783_v13  ;;  %v7695_v26 = vld [vmem:[#allocation12 + $0xe4] sm:$0xf0] }
 0x2a2   :  { %v8048_v1 = vpop.eup %8047  ;;  %v1938_v11 = vmul.f32 %v9061_v31, %v1937_v4  ;;  %3258 = vmatpush.bf16.msra.mxu0 %v6501_v37 }
 0x2a3   :  { %v9063_v54 = vpop.eup %8049  ;;  %v9065_v57 = vmul.f32 0.6931472, %v8048_v1  ;;  %v6437_v1 = vor.u32 %v7681_v53, %v6436_v46  ;;  %v1821_v9 = vadd.f32 %v1820_v6, %v1802_v17  ;;  %v6564_v6 = vld [vmem:[#allocation12 + $0x170] sm:$0xf] }
 0x2a4   :  { %v9072_v24 = vpop.eup %8051  ;;  %v1939_v58 = vadd.f32 %v9061_v31, %v1938_v11 }
 0x2a5   :  { %8053 = vrcp.f32 %v9065_v57  ;;  %v1966_v10 = vmul.f32 %v9072_v24, %v9054_v20  ;;  %vm1971_vm8 = vweird.f32 %v9072_v24  ;;  %3239 = vmatpush.bf16.msrb.mxu3 %v6437_v1  ;;  %vm2000_vm1 = vweird.f32 %v9065_v57  ;;  %v7729_v1 = vld [vmem:[#allocation12 + $0x1f4] sm:$0xf0] }
 0x2a6   :  { %v9067_v59 = vpop.f32.mrf.mxu2  ;;  %8055 = vlog2.f32 %v9063_v54  ;;  %v1836_v45 = vpop.f32.mrf.mxu1  ;;  %v1943_v4 = vsel %vm9114_vm14, %v9061_v31, %v1939_v58  ;;  %v6428_v31 = vld [vmem:[#allocation12 + $0x60] sm:$0xf]  ;;  %vm9152_vm0 = vmor %vm1970_vm15, %vm1971_vm8  ;;  %vm1897_vm14 = vcmp.eq.f32.partialorder %v9036_v35, 1.0  ;;  %vm2063_vm8 = vcmp.eq.f32.partialorder %v9028_v25, 0.0 }
 0x2a7   :  { %v1967_v18 = vsub.f32 1.0, %v1966_v10  ;;  %v1837_v43 = vadd.f32 %v1836_v45, %v1818_v12  ;;  %v7679_v45 = vld [vmem:[#allocation12 + $0x64] sm:$0xf0] }
 0x2a8   :  { %v6429_v14 = vor.u32 %v7679_v45, %v6428_v31  ;;  %v7713_v31 = vld [vmem:[#allocation12 + $0x174] sm:$0xf0] }
 0x2a9   :  { %v1968_v48 = vmul.f32 %v9072_v24, %v1967_v18  ;;  %v1785_v18 = vadd.f32 %v9067_v59, %v9056_v49  ;;  %v9157_v49 = vadd.f32 -1.0, %v9063_v54 }
 0x2aa   :  { %3240 = vmatpush.bf16.msrb.mxu3 %v6429_v14  ;;  %v6620_v14 = vld [vmem:[#allocation12 + $0x1e0] sm:$0xf] }
 0x2ab   :  { %v9078_v36 = vpop.eup %8053  ;;  %v1969_v10 = vadd.f32 %v9072_v24, %v1968_v48 }
 0x2ac   :  { %v8056_v2 = vpop.eup %8055  ;;  %v1996_v27 = vmul.f32 %v9078_v36, %v9065_v57  ;;  %vm2001_vm5 = vweird.f32 %v9078_v36 }
 0x2ad   :  { %v9085_v29 = vmul.f32 0.6931472, %v8056_v2  ;;  %v1973_v28 = vsel %vm9152_vm0, %v9072_v24, %v1969_v10  ;;  %v6484_v10 = vld [vmem:[#allocation12 + $0xd0] sm:$0xf]  ;;  %vm2065_vm0 = vcmp.eq.f32.partialorder %v9036_v35, 0.0 }
 0x2ae   :  { %v1853_v61 = vpop.f32.mrf.mxu2  ;;  %v1997_v15 = vsub.f32 1.0, %v1996_v27  ;;  %v1839_v33 = vpop.f32.mrf.mxu1  ;;  %v6492_v27 = vld [vmem:[#allocation12 + $0xe0] sm:$0xf] }
 0x2af   :  { %v9082_v38 = vadd.f32 %v1853_v61, %v1835_v44  ;;  %8057 = vrcp.f32 %v9085_v29  ;;  %v2004_v44 = vand.u32 2147483647, %v9065_v57  ;;  %v1977_v61 = vor.u32 1.1754944e-38, %v1976_v34  ;;  %v6540_v35 = vld [vmem:[#allocation12 + $0x140] sm:$0xf] }
 0x2b0   :  { %v1998_v11 = vmul.f32 %v9078_v36, %v1997_v15  ;;  %v6493_v48 = vor.u32 %v7695_v26, %v6492_v27  ;;  %v2006_v34 = vand.u32 2147483648, %v9065_v57  ;;  %v2034_v17 = vand.u32 2147483647, %v9085_v29  ;;  %v7727_v27 = vld [vmem:[#allocation12 + $0x1e4] sm:$0xf0] }
 0x2b1   :  { %v9089_v19 = vmin.f32 %v9082_v38, 0.0  ;;  %vm9162_vm7 = vcmp.eq.f32.partialorder %v2004_v44, 8.507059e+37  ;;  %v1840_v46 = vadd.f32 %v1839_v33, %v1821_v9  ;;  %v1978_v63 = vsel %vm9132_vm11, %v1977_v61, %v1973_v28  ;;  %v7693_v44 = vld [vmem:[#allocation12 + $0xd4] sm:$0xf0]  ;;  %vm9189_vm11 = vmor %vm2000_vm1, %vm2001_vm5  ;;  %v6476_v28 = vld [vmem:[#allocation12 + $0xc0] sm:$0xf] }
 0x2b2   :  { %3259 = vmatpush.bf16.msra.mxu0 %v6493_v48  ;;  %v1999_v24 = vadd.f32 %v9078_v36, %v1998_v11  ;;  %v6421_v9 = vor.u32 %v7677_v60, %v6420_v42  ;;  %v6485_v33 = vor.u32 %v7693_v44, %v6484_v10  ;;  %v2036_v45 = vand.u32 2147483648, %v9085_v29  ;;  %v7675_v48 = vld [vmem:[#allocation12 + $0x44] sm:$0xf0] }
 0x2b3   :  { %v1881_v30 = vmul.f32 1.442695, %v9089_v19  ;;  %vm2030_vm1 = vweird.f32 %v9085_v29  ;;  %v6621_v58 = vor.u32 %v7727_v27, %v6620_v14  ;;  %v1915_v10 = vmul.f32 %v9120_v50, %v9034_v16  ;;  %v7673_v50 = vld [vmem:[#allocation12 + $0x34] sm:$0xf0] }
 0x2b4   :  { %v2003_v57 = vsel %vm9189_vm11, %v9078_v36, %v1999_v24  ;;  %3241 = vmatpush.bf16.msrb.mxu3 %v6421_v9  ;;  %vm1899_vm11 = vcmp.eq.f32.partialorder %v9051_v51, 1.0  ;;  %v1917_v9 = vmul.f32 %v9157_v49, %v9045_v39 }
 0x2b5   :  { %8059 = vpow2.f32 %v1881_v30  ;;  %v9124_v62 = vpop.eup %8057  ;;  %v1948_v30 = vsel %vm9098_vm4, %v1947_v21, %v1943_v4  ;;  %v6628_v21 = vld [vmem:[#allocation12 + $0x1f0] sm:$0xf]  ;;  %vm1895_vm4 = vcmp.eq.f32.partialorder %v9028_v25, 1.0 }
 0x2b6   :  { %v1855_v55 = vpop.f32.mrf.mxu2  ;;  %v2026_v2 = vmul.f32 %v9124_v62, %v9085_v29  ;;  %v6629_v4 = vor.u32 %v7729_v1, %v6628_v21  ;;  %vm2031_vm15 = vweird.f32 %v9124_v62  ;;  %v1949_v56 = vmul.f32 %v1948_v30, %v9092_v41  ;;  %3260 = vmatpush.bf16.msra.mxu0 %v6485_v33  ;;  %v1822_v30 = vpop.f32.mrf.mxu0  ;;  %v7691_v21 = vld [vmem:[#allocation12 + $0xc4] sm:$0xf0]  ;;  %v6404_v29 = vld [vmem:[#allocation12 + $0x30] sm:$0xf] }
 0x2b7   :  { %v9122_v40 = vadd.f32 %v1855_v55, %v1837_v43  ;;  %v1803_v43 = vpop.f32.mrf.mxu3  ;;  %vm9205_vm5 = vmor %vm2030_vm1, %vm2031_vm15  ;;  %v1841_v36 = vpop.f32.mrf.mxu1  ;;  %v6477_v1 = vor.u32 %v7691_v21, %v6476_v28  ;;  %vm1901_vm15 = vcmp.eq.f32.partialorder %v9063_v54, 1.0  ;;  %vm9223_vm1 = vcmp.eq.f32.partialorder %v2034_v17, 8.507059e+37  ;;  %v6396_v28 = vld [vmem:[#allocation12 + $0x20] sm:$0xf] }
 0x2b8   :  { %v2027_v59 = vsub.f32 1.0, %v2026_v2  ;;  %v1804_v15 = vadd.f32 %v1803_v43, %v1785_v18  ;;  %3296 = vmatpush.bf16.msra.mxu2 %v6629_v4  ;;  %v6565_v18 = vor.u32 %v7713_v31, %v6564_v6  ;;  %v2007_v43 = vor.u32 1.1754944e-38, %v2006_v34  ;;  %v6612_v6 = vld [vmem:[#allocation12 + $0x1d0] sm:$0xf] }
 0x2b9   :  { %v9142_v13 = vmin.f32 %v9122_v40, 0.0  ;;  %v2037_v4 = vor.u32 1.1754944e-38, %v2036_v45  ;;  %v2055_v17 = vsel %vm1895_vm4, %v9019_v8, %v1949_v56  ;;  %v6468_v31 = vld [vmem:[#allocation12 + $0xb0] sm:$0xf]  ;;  %v7689_v8 = vld [vmem:[#allocation12 + $0xb4] sm:$0xf0]  ;;  %v6405_v27 = vor.u32 %v7673_v50, %v6404_v29 }
 0x2ba   :  { %v2028_v20 = vmul.f32 %v9124_v62, %v2027_v59  ;;  %v6412_v59 = vld [vmem:[#allocation12 + $0x40] sm:$0xf]  ;;  %3277 = vmatpush.bf16.msra.mxu1 %v6565_v18  ;;  %v1823_v34 = vadd.f32 %v1822_v30, %v1804_v15  ;;  %v2008_v60 = vsel %vm9162_vm7, %v2007_v43, %v2003_v57  ;;  %v7711_v15 = vld [vmem:[#allocation12 + $0x164] sm:$0xf0]  ;;  %3261 = vmatpush.bf16.msra.mxu0 %v6477_v1  ;;  %vm2067_vm7 = vcmp.eq.f32.partialorder %v9051_v51, 0.0 }
 0x2bb   :  { %v9144_v12 = vpop.eup %8059  ;;  %v1885_v53 = vmul.f32 1.442695, %v9142_v13  ;;  %v2009_v61 = vmul.f32 %v2008_v60, %v1915_v10  ;;  %v6548_v18 = vld [vmem:[#allocation12 + $0x150] sm:$0xf]  ;;  %v7709_v56 = vld [vmem:[#allocation12 + $0x154] sm:$0xf0] }
 0x2bc   :  { %8061 = vlog2.f32 %v9144_v12  ;;  %v2029_v2 = vadd.f32 %v9124_v62, %v2028_v20  ;;  %v1979_v20 = vmul.f32 %v1978_v63, %v1913_v7  ;;  %3297 = vmatpush.bf16.msra.mxu2 %v6621_v58  ;;  %v1842_v44 = vadd.f32 %v1841_v36, %v1823_v34  ;;  %v6604_v57 = vld [vmem:[#allocation12 + $0x1c0] sm:$0xf]  ;;  %v7723_v58 = vld [vmem:[#allocation12 + $0x1c4] sm:$0xf0]  ;;  %v6452_v50 = vld [vmem:[#allocation12 + $0x90] sm:$0xf] }
 0x2bd   :  { %8063 = vpow2.f32 %v1885_v53  ;;  %v6413_v53 = vor.u32 %v7675_v48, %v6412_v59  ;;  %v9246_v59 = vsel %vm2063_vm8, -1.0, %v2055_v17  ;;  %vm2069_vm4 = vcmp.eq.f32.partialorder %v9063_v54, 0.0  ;;  %v6460_v36 = vld [vmem:[#allocation12 + $0xa0] sm:$0xf]  ;;  %v7707_v1 = vld [vmem:[#allocation12 + $0x144] sm:$0xf0] }
 0x2be   :  { %v1858_v55 = vpop.f32.mrf.mxu2  ;;  %v2033_v24 = vsel %vm9205_vm5, %v9124_v62, %v2029_v2  ;;  %v6556_v62 = vld [vmem:[#allocation12 + $0x160] sm:$0xf]  ;;  %v7725_v2 = vld [vmem:[#allocation12 + $0x1d4] sm:$0xf0]  ;;  %v2057_v7 = vsel %vm1897_vm14, %v9025_v23, %v1979_v20  ;;  %v7671_v20 = vld [vmem:[#allocation12 + $0x24] sm:$0xf0]  ;;  %v6549_v30 = vor.u32 %v7709_v56, %v6548_v18  ;;  %v6605_v25 = vor.u32 %v7723_v58, %v6604_v57 }
 0x2bf   :  { %v9178_v37 = vadd.f32 %v1858_v55, %v1840_v46  ;;  %3242 = vmatpush.bf16.msrb.mxu3 %v6413_v53  ;;  %v2038_v33 = vsel %vm9223_vm1, %v2037_v4, %v2033_v24  ;;  %v6557_v49 = vor.u32 %v7711_v15, %v6556_v62  ;;  %v6613_v14 = vor.u32 %v7725_v2, %v6612_v6  ;;  %v7687_v53 = vld [vmem:[#allocation12 + $0xa4] sm:$0xf0]  ;;  %v6596_v62 = vld [vmem:[#allocation12 + $0x1b0] sm:$0xf]  ;;  %v7721_v15 = vld [vmem:[#allocation12 + $0x1b4] sm:$0xf0] }
 0x2c0   :  { %v2039_v23 = vmul.f32 %v2038_v33, %v1917_v9  ;;  %v9255_v41 = vsel %vm2065_vm0, -1.0, %v2057_v7  ;;  %v6397_v34 = vor.u32 %v7671_v20, %v6396_v28  ;;  %v2059_v63 = vsel %vm1899_vm11, %v9034_v16, %v2009_v61  ;;  %v6388_v2 = vld [vmem:[#allocation12 + $0x10] sm:$0xf]  ;;  %v7669_v9 = vld [vmem:[#allocation12 + $0x14] sm:$0xf0] }
 0x2c1   :  { %v9195_v11 = vmin.f32 %v9178_v37, 0.0  ;;  %3278 = vmatpush.bf16.msra.mxu1 %v6557_v49  ;;  %3298 = vmatpush.bf16.msra.mxu2 %v6613_v14  ;;  %vm1863_vm14 = vcmp.gt.f32.partialorder %v9016_v5, 0.0  ;;  %v6541_v16 = vor.u32 %v7707_v1, %v6540_v35  ;;  %v6597_v17 = vor.u32 %v7721_v15, %v6596_v62  ;;  %v6532_v18 = vld [vmem:[#allocation12 + $0x130] sm:$0xf]  ;;  %v7705_v49 = vld [vmem:[#allocation12 + $0x134] sm:$0xf0] }
 0x2c2   :  { %v8062_v26 = vpop.eup %8061  ;;  %v6355_v33 = vadd.f32 -1.0, %v9144_v12  ;;  %v9281_v7 = vsel %vm2067_vm7, -1.0, %v2059_v63  ;;  %vm1864_vm0 = vcmp.gt.f32.partialorder %v9082_v38, 0.0  ;;  %vm1896_vm5 = vcmp.eq.f32.partialorder %v9144_v12, 1.0  ;;  %v6588_v51 = vld [vmem:[#allocation12 + $0x1a0] sm:$0xf] }
 0x2c3   :  { %v9209_v46 = vmul.f32 0.6931472, %v8062_v26  ;;  %v1889_v55 = vmul.f32 1.442695, %v9195_v11  ;;  %v9216_v42 = vpop.eup %8063  ;;  %v6469_v26 = vor.u32 %v7689_v8, %v6468_v31  ;;  %3243 = vmatpush.bf16.msrb.mxu3 %v6405_v27  ;;  %v7685_v31 = vld [vmem:[#allocation12 + $0x94] sm:$0xf0]  ;;  %v6389_v61 = vor.u32 %v7669_v9, %v6388_v2 }
 0x2c4   :  { %v6453_v8 = vor.u32 %v7685_v31, %v6452_v50  ;;  %v6533_v58 = vor.u32 %v7705_v49, %v6532_v18  ;;  %v7667_v28 = vld [vmem:[#allocation12 + $0x4] sm:$0xf0]  ;;  %v6357_v35 = vadd.f32 -1.0, %v9216_v42  ;;  %v6580_v15 = vld [vmem:[#allocation12 + $0x190] sm:$0xf]  ;;  %v2079_v9 = vsel %vm1863_vm14, %v9016_v5, %v9246_v59 }
 0x2c5   :  { %8065 = vrcp.f32 %v9209_v46  ;;  %3262 = vmatpush.bf16.msra.mxu0 %v6469_v26  ;;  %v1959_v4 = vand.u32 2147483647, %v9209_v46  ;;  %v1961_v29 = vand.u32 2147483648, %v9209_v46  ;;  %3279 = vmatpush.bf16.msra.mxu1 %v6549_v30  ;;  %vm1955_vm11 = vweird.f32 %v9209_v46  ;;  %v7719_v26 = vld [vmem:[#allocation12 + $0x1a4] sm:$0xf0] }
 0x2c6   :  { %v1860_v22 = vpop.f32.mrf.mxu2  ;;  %8067 = vlog2.f32 %v9216_v42  ;;  %3299 = vmatpush.bf16.msra.mxu2 %v6605_v25  ;;  %v1912_v30 = vmul.f32 %v6355_v33, %v9089_v19  ;;  %v7745_v50 = vld [vmem:[#allocation12 + $0x274] sm:$0xf0]  ;;  %v6756_v31 = vld [vmem:[#allocation12 + $0x2f0] sm:$0xf]  ;;  %vm1898_vm14 = vcmp.eq.f32.partialorder %v9216_v42, 1.0 }
 0x2c7   :  { %8069 = vpow2.f32 %v1889_v55  ;;  %v9242_v45 = vadd.f32 %v1860_v22, %v1842_v44  ;;  %v6461_v55 = vor.u32 %v7687_v53, %v6460_v36  ;;  %v2061_v44 = vsel %vm1901_vm15, %v9045_v39, %v2039_v23  ;;  %3244 = vmatpush.bf16.msrb.mxu3 %v6397_v34  ;;  %v6444_v53 = vld [vmem:[#allocation12 + $0x80] sm:$0xf]  ;;  %v7761_v18 = vld [vmem:[#allocation12 + $0x2f4] sm:$0xf0] }
 0x2c8   :  { %v9287_v14 = vsel %vm2069_vm4, -1.0, %v2061_v44  ;;  %vm2064_vm15 = vcmp.eq.f32.partialorder %v9144_v12, 0.0  ;;  %vm9298_vm7 = vcmp.eq.f32.partialorder %v1959_v4, 8.507059e+37  ;;  %v1962_v54 = vor.u32 1.1754944e-38, %v1961_v29  ;;  %v7717_v44 = vld [vmem:[#allocation12 + $0x194] sm:$0xf0] }
 0x2c9   :  { %v9249_v48 = vmin.f32 %v9242_v45, 0.0  ;;  %3263 = vmatpush.bf16.msra.mxu0 %v6461_v55  ;;  %3280 = vmatpush.bf16.msra.mxu1 %v6541_v16  ;;  %v6589_v23 = vor.u32 %v7719_v26, %v6588_v51  ;;  %v6516_v29 = vld [vmem:[#allocation12 + $0x110] sm:$0xf]  ;;  %v7701_v16 = vld [vmem:[#allocation12 + $0x114] sm:$0xf0]  ;;  %vm1865_vm4 = vcmp.gt.f32.partialorder %v9022_v3, 0.0  ;;  %v6581_v59 = vor.u32 %v7717_v44, %v6580_v15 }
 0x2ca   :  { %3300 = vmatpush.bf16.msra.mxu2 %v6597_v17  ;;  %v6692_v17 = vld [vmem:[#allocation12 + $0x270] sm:$0xf]  ;;  %v6517_v49 = vor.u32 %v7701_v16, %v6516_v29  ;;  %v6572_v51 = vld [vmem:[#allocation12 + $0x180] sm:$0xf]  ;;  %v7715_v26 = vld [vmem:[#allocation12 + $0x184] sm:$0xf0] }
 0x2cb   :  { %v9251_v43 = vpop.eup %8065  ;;  %v1893_v24 = vmul.f32 1.442695, %v9249_v48  ;;  %3245 = vmatpush.bf16.msrb.mxu3 %v6389_v61 }
 0x2cc   :  { %v1951_v21 = vmul.f32 %v9251_v43, %v9209_v46  ;;  %v8068_v60 = vpop.eup %8067  ;;  %vm1956_vm8 = vweird.f32 %v9251_v43  ;;  %v6380_v46 = vld [vmem:[#allocation12] sm:$0xf] }
 0x2cd   :  { %v9265_v10 = vpop.eup %8069  ;;  %v9270_v6 = vmul.f32 0.6931472, %v8068_v60  ;;  %8071 = vpow2.f32 %v1893_v24  ;;  %vm9294_vm1 = vmor %vm1955_vm11, %vm1956_vm8  ;;  %3264 = vmatpush.bf16.msra.mxu0 %v6453_v8  ;;  %v6381_v36 = vor.u32 %v7667_v28, %v6380_v46  ;;  %v6524_v24 = vld [vmem:[#allocation12 + $0x120] sm:$0xf]  ;;  %v7703_v60 = vld [vmem:[#allocation12 + $0x124] sm:$0xf0]  ;;  %3281 = vmatpush.bf16.msra.mxu1 %v6533_v58  ;;  %v6757_v58 = vor.u32 %v7761_v18, %v6756_v31 }
 0x2ce   :  { %v1952_v22 = vsub.f32 1.0, %v1951_v21  ;;  %8073 = vlog2.f32 %v9265_v10  ;;  %v7683_v21 = vld [vmem:[#allocation12 + $0x84] sm:$0xf0]  ;;  %v9312_v1 = vadd.f32 -1.0, %v9265_v10  ;;  %3301 = vmatpush.bf16.msra.mxu2 %v6589_v23  ;;  %v6525_v2 = vor.u32 %v7703_v60, %v6524_v24 }
 0x2cf   :  { %8075 = vrcp.f32 %v9270_v6  ;;  %v6445_v62 = vor.u32 %v7683_v21, %v6444_v53  ;;  %3246 = vmatpush.bf16.msrb.mxu3 %v6381_v36  ;;  %v1991_v5 = vand.u32 2147483648, %v9270_v6  ;;  %v7699_v23 = vld [vmem:[#allocation12 + $0x104] sm:$0xf0]  ;;  %v1914_v46 = vmul.f32 %v6357_v35, %v9142_v13 }
 0x2d0   :  { %v1953_v39 = vmul.f32 %v9251_v43, %v1952_v22  ;;  %v7743_v36 = vld [vmem:[#allocation12 + $0x264] sm:$0xf0]  ;;  %vm1985_vm11 = vweird.f32 %v9270_v6 }
 0x2d1   :  { %3265 = vmatpush.bf16.msra.mxu0 %v6445_v62  ;;  %3282 = vmatpush.bf16.msra.mxu1 %v6525_v2  ;;  %v1992_v35 = vor.u32 1.1754944e-38, %v1991_v5  ;;  %v6884_v62 = vld [vmem:[#allocation12 + $0x3f0] sm:$0xf]  ;;  %v2081_v5 = vsel %vm1865_vm4, %v9022_v3, %v9255_v41  ;;  %vm2068_vm4 = vcmp.eq.f32.partialorder %v9265_v10, 0.0  ;;  %v7791_v41 = vld [vmem:[#allocation12 + $0x3e4] sm:$0xf0] }
 0x2d2   :  { %v1954_v27 = vadd.f32 %v9251_v43, %v1953_v39  ;;  %v1989_v39 = vand.u32 2147483647, %v9270_v6  ;;  %3302 = vmatpush.bf16.msra.mxu2 %v6581_v59  ;;  %v1916_v59 = vmul.f32 %v9312_v1, %v9195_v11  ;;  %v6668_v1 = vld [vmem:[#allocation12 + $0x240] sm:$0xf] }
 0x2d3   :  { %v9302_v20 = vpop.eup %8071 }
 0x2d4   :  { %v1958_v25 = vsel %vm9294_vm1, %v9251_v43, %v1954_v27  ;;  %v8074_v34 = vpop.eup %8073  ;;  %8077 = vlog2.f32 %v9302_v20  ;;  %v6693_v27 = vor.u32 %v7745_v50, %v6692_v17  ;;  %vm1990_vm1 = vcmp.eq.f32.partialorder %v1989_v39, 8.507059e+37 }
 0x2d5   :  { %v1963_v55 = vsel %vm9298_vm7, %v1962_v54, %v1958_v25  ;;  %v9315_v63 = vpop.eup %8075  ;;  %v9317_v4 = vmul.f32 0.6931472, %v8074_v34  ;;  %v6684_v25 = vld [vmem:[#allocation12 + $0x260] sm:$0xf]  ;;  %3334 = vmatpush.bf16.msrb.mxu0 %v6757_v58  ;;  %3283 = vmatpush.bf16.msra.mxu1 %v6517_v49  ;;  %v7777_v49 = vld [vmem:[#allocation12 + $0x374] sm:$0xf0] }
 0x2d6   :  { %v1964_v43 = vmul.f32 %v1963_v55, %v1912_v30  ;;  %v1981_v22 = vmul.f32 %v9315_v63, %v9270_v6  ;;  %vm1986_vm8 = vweird.f32 %v9315_v63  ;;  %3315 = vmatpush.bf16.msra.mxu3 %v6693_v27  ;;  %v6573_v30 = vor.u32 %v7715_v26, %v6572_v51  ;;  %v6748_v34 = vld [vmem:[#allocation12 + $0x2e0] sm:$0xf]  ;;  %v7759_v55 = vld [vmem:[#allocation12 + $0x2e4] sm:$0xf0] }
 0x2d7   :  { %8079 = vrcp.f32 %v9317_v4  ;;  %v2019_v54 = vand.u32 2147483647, %v9317_v4  ;;  %v6685_v24 = vor.u32 %v7743_v36, %v6684_v25  ;;  %v2021_v16 = vand.u32 2147483648, %v9317_v4  ;;  %v6876_v27 = vld [vmem:[#allocation12 + $0x3e0] sm:$0xf] }
 0x2d8   :  { %v2056_v33 = vsel %vm1896_vm5, %v9089_v19, %v1964_v43  ;;  %v1982_v8 = vsub.f32 1.0, %v1981_v22  ;;  %vm2066_vm5 = vcmp.eq.f32.partialorder %v9216_v42, 0.0  ;;  %v9355_v43 = vadd.f32 -1.0, %v9302_v20  ;;  %3303 = vmatpush.bf16.msra.mxu2 %v6573_v30  ;;  %v7793_v22 = vld [vmem:[#allocation12 + $0x3f4] sm:$0xf0] }
 0x2d9   :  { %v2072_v61 = vsel %vm2064_vm15, -1.0, %v2056_v33  ;;  %vm1987_vm15 = vmor %vm1985_vm11, %vm1986_vm8  ;;  %vm9362_vm7 = vcmp.eq.f32.partialorder %v2019_v54, 8.507059e+37  ;;  %v6749_v17 = vor.u32 %v7759_v55, %v6748_v34  ;;  %v7741_v33 = vld [vmem:[#allocation12 + $0x254] sm:$0xf0]  ;;  %v6885_v50 = vor.u32 %v7793_v22, %v6884_v62  ;;  %v6812_v25 = vld [vmem:[#allocation12 + $0x360] sm:$0xf] }
 0x2da   :  { %v2080_v19 = vsel %vm1864_vm0, %v9082_v38, %v2072_v61  ;;  %v8078_v56 = vpop.eup %8077  ;;  %v1983_v57 = vmul.f32 %v9315_v63, %v1982_v8  ;;  %v6508_v38 = vld [vmem:[#allocation12 + $0x100] sm:$0xf]  ;;  %vm1866_vm0 = vcmp.gt.f32.partialorder %v9122_v40, 0.0  ;;  %3316 = vmatpush.bf16.msra.mxu3 %v6685_v24  ;;  %v6740_v61 = vld [vmem:[#allocation12 + $0x2d0] sm:$0xf]  ;;  %vm1900_vm8 = vcmp.eq.f32.partialorder %v9265_v10, 1.0 }
 0x2db   :  { %v2087_v12 = vpack.c.bf16 %v2080_v19, %v2079_v9  ;;  %v9344_v28 = vmul.f32 0.6931472, %v8078_v56  ;;  %v6509_v44 = vor.u32 %v7699_v23, %v6508_v38  ;;  %v6676_v9 = vld [vmem:[#allocation12 + $0x250] sm:$0xf]  ;;  %v7757_v8 = vld [vmem:[#allocation12 + $0x2d4] sm:$0xf0]  ;;  %3335 = vmatpush.bf16.msrb.mxu0 %v6749_v17  ;;  %v6877_v54 = vor.u32 %v7791_v41, %v6876_v27 }
 0x2dc   :  { %v1984_v21 = vadd.f32 %v9315_v63, %v1983_v57  ;;  %v6677_v31 = vor.u32 %v7741_v33, %v6676_v9  ;;  %v6741_v18 = vor.u32 %v7757_v8, %v6740_v61  ;;  %v6820_v19 = vld [vmem:[#allocation12 + $0x370] sm:$0xf]  ;;  %3372 = vmatpush.bf16.msrb.mxu2 %v6885_v50  ;;  %v7739_v56 = vld [vmem:[#allocation12 + $0x244] sm:$0xf0]  ;;  %v6732_v38 = vld [vmem:[#allocation12 + $0x2c0] sm:$0xf]  ;;  %v1918_v10 = vmul.f32 %v9355_v43, %v9249_v48 }
 0x2dd   :  { %v9346_v53 = vrot.slane %v2087_v12, 7  ;;  %v9350_v60 = vpop.eup %8079  ;;  %8081 = vrcp.f32 %v9344_v28  ;;  %3284 = vmatpush.bf16.msra.mxu1 %v6509_v44  ;;  %v6821_v3 = vor.u32 %v7777_v49, %v6820_v19  ;;  %v6669_v58 = vor.u32 %v7739_v56, %v6668_v1  ;;  %v7755_v23 = vld [vmem:[#allocation12 + $0x2c4] sm:$0xf0]  ;;  %v7737_v17 = vld [vmem:[#allocation12 + $0x234] sm:$0xf0] }
 0x2de   :  { %v1988_v6 = vsel %vm1987_vm15, %v9315_v63, %v1984_v21  ;;  %v2011_v15 = vmul.f32 %v9350_v60, %v9317_v4  ;;  %vm2016_vm11 = vweird.f32 %v9350_v60  ;;  %vm1867_vm15 = vcmp.gt.f32.partialorder %v9030_v52, 0.0  ;;  %3317 = vmatpush.bf16.msra.mxu3 %v6677_v31  ;;  %v7775_v36 = vld [vmem:[#allocation12 + $0x364] sm:$0xf0]  ;;  %v6868_v21 = vld [vmem:[#allocation12 + $0x3d0] sm:$0xf] }
 0x2df   :  { %2111 = vst [vmem:[#allocation5] sm:$0xee] %v9346_v53  ;;  %v1993_v2 = vsel %vm1990_vm1, %v1992_v35, %v1988_v6  ;;  %vm2015_vm1 = vweird.f32 %v9317_v4  ;;  %v2049_v34 = vand.u32 2147483647, %v9344_v28  ;;  %3336 = vmatpush.bf16.msrb.mxu0 %v6741_v18  ;;  %v6733_v55 = vor.u32 %v7755_v23, %v6732_v38  ;;  %v7789_v6 = vld [vmem:[#allocation12 + $0x3d4] sm:$0xf0] }
 0x2e0   :  { %v1994_v39 = vmul.f32 %v1993_v2, %v1914_v46  ;;  %v2012_v63 = vsub.f32 1.0, %v2011_v15  ;;  %v2051_v4 = vand.u32 2147483648, %v9344_v28  ;;  %3373 = vmatpush.bf16.msrb.mxu2 %v6877_v54  ;;  %v6660_v15 = vld [vmem:[#allocation12 + $0x230] sm:$0xf]  ;;  %v2096_v44 = vrot.slane %v9346_v53, 4 }
 0x2e1   :  { %3353 = vmatpush.bf16.msrb.mxu1 %v6821_v3  ;;  %v7753_v53 = vld [vmem:[#allocation12 + $0x2b4] sm:$0xf0]  ;;  %v7787_v18 = vld [vmem:[#allocation12 + $0x3c4] sm:$0xf0]  ;;  %v6716_v1 = vld [vmem:[#allocation12 + $0x2a0] sm:$0xf]  ;;  %v2083_v56 = vsel %vm1867_vm15, %v9030_v52, %v9281_v7 }
 0x2e2   :  { %v2058_v51 = vsel %vm1898_vm14, %v9142_v13, %v1994_v39  ;;  %v2013_v26 = vmul.f32 %v9350_v60, %v2012_v63  ;;  %vm1868_vm14 = vcmp.gt.f32.partialorder %v9178_v37, 0.0  ;;  %v2022_v13 = vor.u32 1.1754944e-38, %v2021_v16  ;;  %3318 = vmatpush.bf16.msra.mxu3 %v6669_v58  ;;  %v6804_v63 = vld [vmem:[#allocation12 + $0x350] sm:$0xf]  ;;  %v7773_v50 = vld [vmem:[#allocation12 + $0x354] sm:$0xf0] }
 0x2e3   :  { %v9380_v12 = vpop.eup %8081  ;;  %v2074_v57 = vsel %vm2066_vm5, -1.0, %v2058_v51  ;;  %vm2017_vm5 = vmor %vm2015_vm1, %vm2016_vm11  ;;  %vm1902_vm11 = vcmp.eq.f32.partialorder %v9302_v20, 1.0  ;;  %v6869_v16 = vor.u32 %v7789_v6, %v6868_v21  ;;  %vm1869_vm1 = vcmp.gt.f32.partialorder %v9040_v47, 0.0  ;;  %3337 = vmatpush.bf16.msrb.mxu0 %v6733_v55  ;;  %v6652_v51 = vld [vmem:[#allocation12 + $0x220] sm:$0xf] }
 0x2e4   :  { %v2082_v46 = vsel %vm1866_vm0, %v9122_v40, %v2074_v57  ;;  %v2014_v30 = vadd.f32 %v9350_v60, %v2013_v26  ;;  %v2041_v42 = vmul.f32 %v9380_v12, %v9344_v28  ;;  %v6813_v40 = vor.u32 %v7775_v36, %v6812_v25  ;;  %v7735_v26 = vld [vmem:[#allocation12 + $0x224] sm:$0xf0]  ;;  %v6796_v54 = vld [vmem:[#allocation12 + $0x340] sm:$0xf]  ;;  %v6852_v7 = vld [vmem:[#allocation12 + $0x3b0] sm:$0xf] }
 0x2e5   :  { %v2088_v24 = vpack.c.bf16 %v2082_v46, %v2081_v5  ;;  %vm2045_vm0 = vweird.f32 %v9344_v28  ;;  %v6661_v39 = vor.u32 %v7737_v17, %v6660_v15  ;;  %v6805_v8 = vor.u32 %v7773_v50, %v6804_v63  ;;  %v6860_v5 = vld [vmem:[#allocation12 + $0x3c0] sm:$0xf]  ;;  %3374 = vmatpush.bf16.msrb.mxu2 %v6869_v16  ;;  %v7751_v28 = vld [vmem:[#allocation12 + $0x2a4] sm:$0xf0]  ;;  %v7733_v43 = vld [vmem:[#allocation12 + $0x214] sm:$0xf0] }
 0x2e6   :  { %v2018_v35 = vsel %vm2017_vm5, %v9350_v60, %v2014_v30  ;;  %v2042_v62 = vsub.f32 1.0, %v2041_v42  ;;  %v6724_v60 = vld [vmem:[#allocation12 + $0x2b0] sm:$0xf]  ;;  %vm2046_vm5 = vweird.f32 %v9380_v12  ;;  %3354 = vmatpush.bf16.msrb.mxu1 %v6813_v40  ;;  %v6861_v27 = vor.u32 %v7787_v18, %v6860_v5  ;;  %v7771_v58 = vld [vmem:[#allocation12 + $0x344] sm:$0xf0] }
 0x2e7   :  { %v2097_v22 = vrot.slane %v2088_v24, 7  ;;  %v2023_v2 = vsel %vm9362_vm7, %v2022_v13, %v2018_v35  ;;  %v6725_v61 = vor.u32 %v7753_v53, %v6724_v60  ;;  %vm9412_vm7 = vcmp.eq.f32.partialorder %v2049_v34, 8.507059e+37  ;;  %vm2047_vm6 = vmor %vm2045_vm0, %vm2046_vm5  ;;  %3319 = vmatpush.bf16.msra.mxu3 %v6661_v39  ;;  %v7785_v30 = vld [vmem:[#allocation12 + $0x3b4] sm:$0xf0]  ;;  %v6644_v42 = vld [vmem:[#allocation12 + $0x210] sm:$0xf] }
 0x2e8   :  { %v2024_v9 = vmul.f32 %v2023_v2, %v1916_v59  ;;  %v2043_v33 = vmul.f32 %v9380_v12, %v2042_v62  ;;  %v6653_v41 = vor.u32 %v7735_v26, %v6652_v51  ;;  %v6717_v46 = vor.u32 %v7751_v28, %v6716_v1  ;;  %v6708_v36 = vld [vmem:[#allocation12 + $0x290] sm:$0xf]  ;;  %v7769_v40 = vld [vmem:[#allocation12 + $0x334] sm:$0xf0]  ;;  %v7662_v62 = vld [vmem:[#allocation5 + $0x4] sm:$0xf] }
 0x2e9   :  { %v2098_v29 = vsel %vm8718_vm12, %v2096_v44, %v2097_v22  ;;  %v2099_v31 = vrot.slane %v2097_v22, 4  ;;  %3338 = vmatpush.bf16.msrb.mxu0 %v6725_v61  ;;  %v6797_v52 = vor.u32 %v7771_v58, %v6796_v54  ;;  %3375 = vmatpush.bf16.msrb.mxu2 %v6861_v27  ;;  %v6853_v25 = vor.u32 %v7785_v30, %v6852_v7  ;;  %v6364_v24 = vld [vmem:[#allocation5] sm:$0xf]  ;;  %v6844_v6 = vld [vmem:[#allocation12 + $0x3a0] sm:$0xf] }
 0x2ea   :  { %2112 = vst [vmem:[#allocation5 + $0x8] sm:$0xff] %v2098_v29  ;;  %v2060_v59 = vsel %vm1900_vm8, %v9195_v11, %v2024_v9  ;;  %v2044_v19 = vadd.f32 %v9380_v12, %v2043_v33  ;;  %v2052_v11 = vor.u32 1.1754944e-38, %v2051_v4  ;;  %3355 = vmatpush.bf16.msrb.mxu1 %v6805_v8  ;;  %v6645_v34 = vor.u32 %v7733_v43, %v6644_v42  ;;  %v6788_v55 = vld [vmem:[#allocation12 + $0x330] sm:$0xf]  ;;  %v7783_v15 = vld [vmem:[#allocation12 + $0x3a4] sm:$0xf0] }
 0x2eb   :  { %2113 = vst [vmem:[#allocation5 + $0x10] sm:$0x11] %v2099_v31  ;;  %v2076_v3 = vsel %vm2068_vm4, -1.0, %v2060_v59  ;;  %3320 = vmatpush.bf16.msra.mxu3 %v6653_v41  ;;  %v6789_v4 = vor.u32 %v7769_v40, %v6788_v55  ;;  %v6636_v44 = vld [vmem:[#allocation12 + $0x200] sm:$0xf]  ;;  %v2085_v22 = vsel %vm1869_vm1, %v9040_v47, %v9287_v14  ;;  %vm1870_vm8 = vcmp.gt.f32.partialorder %v9242_v45, 0.0 }
 0x2ec   :  { %v2084_v57 = vsel %vm1868_vm14, %v9178_v37, %v2076_v3  ;;  %v2048_v13 = vsel %vm2047_vm6, %v9380_v12, %v2044_v19  ;;  %v7749_v12 = vld [vmem:[#allocation12 + $0x294] sm:$0xf0]  ;;  %vm2070_vm6 = vcmp.eq.f32.partialorder %v9302_v20, 0.0  ;;  %v6845_v39 = vor.u32 %v7783_v15, %v6844_v6  ;;  %v7731_v53 = vld [vmem:[#allocation12 + $0x204] sm:$0xf0] }
 0x2ed   :  { %v2089_v38 = vpack.c.bf16 %v2084_v57, %v2083_v56  ;;  %v2053_v23 = vsel %vm9412_vm7, %v2052_v11, %v2048_v13  ;;  %3339 = vmatpush.bf16.msrb.mxu0 %v6717_v46  ;;  %3376 = vmatpush.bf16.msrb.mxu2 %v6853_v25  ;;  %v6709_v33 = vor.u32 %v7749_v12, %v6708_v36  ;;  %v6700_v20 = vld [vmem:[#allocation12 + $0x280] sm:$0xf]  ;;  %v7747_v29 = vld [vmem:[#allocation12 + $0x284] sm:$0xf0]  ;;  %v6836_v27 = vld [vmem:[#allocation12 + $0x390] sm:$0xf] }
 0x2ee   :  { %v2054_v37 = vmul.f32 %v2053_v23, %v1918_v10  ;;  %3356 = vmatpush.bf16.msrb.mxu1 %v6797_v52  ;;  %v6780_v31 = vld [vmem:[#allocation12 + $0x320] sm:$0xf]  ;;  %v6637_v8 = vor.u32 %v7731_v53, %v6636_v44  ;;  %v7767_v5 = vld [vmem:[#allocation12 + $0x324] sm:$0xf0]  ;;  %v7781_v51 = vld [vmem:[#allocation12 + $0x394] sm:$0xf0]  ;;  %v6701_v11 = vor.u32 %v7747_v29, %v6700_v20 }
 0x2ef   :  { %v2100_v21 = vrot.slane %v2089_v38, 7  ;;  %3321 = vmatpush.bf16.msra.mxu3 %v6645_v34  ;;  %v6781_v41 = vor.u32 %v7767_v5, %v6780_v31  ;;  %v6772_v1 = vld [vmem:[#allocation12 + $0x310] sm:$0xf]  ;;  %v7765_v28 = vld [vmem:[#allocation12 + $0x314] sm:$0xf0]  ;;  %v6837_v23 = vor.u32 %v7781_v51, %v6836_v27 }
 0x2f0   :  { %v2062_v35 = vsel %vm1902_vm11, %v9249_v48, %v2054_v37  ;;  %v6773_v7 = vor.u32 %v7765_v28, %v6772_v1  ;;  %v6948_v42 = vld [vmem:[#allocation12 + $0x470] sm:$0xf]  ;;  %v7809_v37 = vld [vmem:[#allocation12 + $0x474] sm:$0xf0]  ;;  %v7779_v55 = vld [vmem:[#allocation12 + $0x384] sm:$0xf0] }
 0x2f1   :  { %2114 = vst [vmem:[#allocation5 + $0x18] sm:$0xee] %v2100_v21  ;;  %v2078_v2 = vsel %vm2070_vm6, -1.0, %v2062_v35  ;;  %v7663_v16 = vld [vmem:[#allocation5 + $0x4] sm:$0xf0]  ;;  %v2101_v61 = vrot.slane %v2100_v21, 4  ;;  %3340 = vmatpush.bf16.msrb.mxu0 %v6709_v33  ;;  %3377 = vmatpush.bf16.msrb.mxu2 %v6845_v39  ;;  %v6949_v43 = vor.u32 %v7809_v37, %v6948_v42 }
 0x2f2   :  { %v2086_v48 = vsel %vm1870_vm8, %v9242_v45, %v2078_v2  ;;  %v9446_v17 = vor.u32 %v7663_v16, %v6364_v24  ;;  %v6366_v60 = vld [vmem:[#allocation5 + $0x8] sm:$0xf0]  ;;  %v2119_v9 = vld [vmem:[#allocation5 + $0x10] sm:$0x33]  ;;  %3357 = vmatpush.bf16.msrb.mxu1 %v6789_v4  ;;  %v7012_v36 = vld [vmem:[#allocation12 + $0x4f0] sm:$0xf] }
 0x2f3   :  { %v2090_v63 = vpack.c.bf16 %v2086_v48, %v2085_v22  ;;  %v9448_v47 = vor.u32 %v7662_v62, %v6366_v60  ;;  %v2145_v14 = vunpack.c.l.b16 %v2119_v9  ;;  %v2146_v50 = vunpack.c.h.b16 %v2119_v9  ;;  %3322 = vmatpush.bf16.msra.mxu3 %v6637_v8  ;;  %v7825_v12 = vld [vmem:[#allocation12 + $0x4f4] sm:$0xf0]  ;;  %v6828_v21 = vld [vmem:[#allocation12 + $0x380] sm:$0xf]  ;;  %v7763_v35 = vld [vmem:[#allocation12 + $0x304] sm:$0xf0] }
 0x2f4   :  { %3247 = vmatmul.bf16.vlgmr.msrb.gmra.mxu3 %v9446_v17  ;;  %v2156_v45 = vshll.u32 %v9446_v17, 16  ;;  %v2154_v19 = vshrl.u32 %v9446_v17, 16  ;;  %v7013_v34 = vor.u32 %v7825_v12, %v7012_v36  ;;  %v6764_v40 = vld [vmem:[#allocation12 + $0x300] sm:$0xf]  ;;  %v6829_v62 = vor.u32 %v7779_v55, %v6828_v21  ;;  %v7807_v15 = vld [vmem:[#allocation12 + $0x464] sm:$0xf0] }
 0x2f5   :  { %v2102_v18 = vrot.slane %v2090_v63, 7  ;;  %3266 = vmatmul.bf16.vlgmr.msra.gmra.mxu0 %v9448_v47  ;;  %v9453_v59 = vpack.c.b16 %v2145_v14, %v2145_v14  ;;  %v9456_v49 = vpack.c.b16 %v2146_v50, %v2146_v50  ;;  %v2168_v3 = vshll.u32 %v9448_v47, 16  ;;  %3378 = vmatpush.bf16.msrb.mxu2 %v6837_v23  ;;  %v6940_v6 = vld [vmem:[#allocation12 + $0x460] sm:$0xf]  ;;  %v7823_v16 = vld [vmem:[#allocation12 + $0x4e4] sm:$0xf0] }
 0x2f6   :  { %v2158_v26 = vrot.slane %v2156_v45, 1  ;;  %v2166_v58 = vshrl.u32 %v9448_v47, 16  ;;  %3358 = vmatpush.bf16.msrb.mxu1 %v6781_v41  ;;  %3341 = vmatpush.bf16.msrb.mxu0 %v6701_v11  ;;  %v6765_v4 = vor.u32 %v7763_v35, %v6764_v40  ;;  %v7004_v44 = vld [vmem:[#allocation12 + $0x4e0] sm:$0xf]  ;;  %v6941_v2 = vor.u32 %v7807_v15, %v6940_v6  ;;  %v7696_v20 = vld [vmem:[#allocation12 + $0xf4] sm:$0xf] }
 0x2f7   :  { %v2103_v56 = vsel %vm8718_vm12, %v2101_v61, %v2102_v18  ;;  %v2104_v57 = vrot.slane %v2102_v18, 4  ;;  %v2161_v10 = vshll.u32 %v9453_v59, 16  ;;  %v2173_v13 = vshll.u32 %v9456_v49, 16  ;;  %3391 = vmatpush.bf16.msrb.mxu3 %v6949_v43  ;;  %v6502_v29 = vld [vmem:[#allocation12 + $0xf8] sm:$0xf0] }
 0x2f8   :  { %2115 = vst [vmem:[#allocation5 + $0x20] sm:$0xff] %v2103_v56  ;;  %v2159_v54 = vor.u32 %v2158_v26, %v2154_v19  ;;  %v2170_v38 = vrot.slane %v2168_v3, 1  ;;  %v6372_v22 = vld [vmem:[#allocation5 + $0x18] sm:$0xf]  ;;  %v7664_v60 = vld [vmem:[#allocation5 + $0x1c] sm:$0xf]  ;;  %v7005_v33 = vor.u32 %v7823_v16, %v7004_v44 }
 0x2f9   :  { %2116 = vst [vmem:[#allocation5 + $0x28] sm:$0x11] %v2104_v57  ;;  %v2163_v46 = vrot.slane %v2161_v10, 1  ;;  %v2175_v52 = vrot.slane %v2173_v13, 1  ;;  %3379 = vmatpush.bf16.msrb.mxu2 %v6829_v62  ;;  %v6932_v8 = vld [vmem:[#allocation12 + $0x450] sm:$0xf]  ;;  %v6505_v57 = vor.u32 %v7696_v20, %v6502_v29 }
 0x2fa   :  { %v2171_v30 = vor.u32 %v2170_v38, %v2166_v58  ;;  %3359 = vmatpush.bf16.msrb.mxu1 %v6773_v7  ;;  %3410 = vmatpush.bf16.msra.mxu0 %v7013_v34  ;;  %v7805_v5 = vld [vmem:[#allocation12 + $0x454] sm:$0xf0]  ;;  %v6996_v26 = vld [vmem:[#allocation12 + $0x4d0] sm:$0xf]  ;;  %v7680_v28 = vld [vmem:[#allocation12 + $0x74] sm:$0xf] }
 0x2fb   :  { %v9477_v25 = vsel %vm481_vm9, %v2159_v54, %v2163_v46  ;;  %3392 = vmatpush.bf16.msrb.mxu3 %v6941_v2  ;;  %v7821_v11 = vld [vmem:[#allocation12 + $0x4d4] sm:$0xf0]  ;;  %v6933_v23 = vor.u32 %v7805_v5, %v6932_v8  ;;  %v6438_v46 = vld [vmem:[#allocation12 + $0x78] sm:$0xf0]  ;;  %v6494_v37 = vld [vmem:[#allocation12 + $0xe8] sm:$0xf0] }
 0x2fc   :  { %3285 = vmatmul.bf16.vlgmr.msra.gmra.mxu1 %v9477_v25  ;;  %v9481_v24 = vsel %vm481_vm9, %v2171_v30, %v2175_v52  ;;  %v7694_v52 = vld [vmem:[#allocation12 + $0xe4] sm:$0xf]  ;;  %v6997_v42 = vor.u32 %v7821_v11, %v6996_v26  ;;  %v6924_v43 = vld [vmem:[#allocation12 + $0x440] sm:$0xf]  ;;  %v7803_v36 = vld [vmem:[#allocation12 + $0x444] sm:$0xf0]  ;;  %v6441_v34 = vor.u32 %v7680_v28, %v6438_v46 }
 0x2fd   :  { %3304 = vmatmul.bf16.vlgmr.msra.gmra.mxu2 %v9481_v24  ;;  %v6497_v55 = vor.u32 %v7694_v52, %v6494_v37  ;;  %v6988_v40 = vld [vmem:[#allocation12 + $0x4c0] sm:$0xf]  ;;  %v7819_v35 = vld [vmem:[#allocation12 + $0x4c4] sm:$0xf0]  ;;  %v6925_v62 = vor.u32 %v7803_v36, %v6924_v43  ;;  %v7678_v6 = vld [vmem:[#allocation12 + $0x64] sm:$0xf] }
 0x2fe   :  { %3360 = vmatpush.bf16.msrb.mxu1 %v6765_v4  ;;  %3411 = vmatpush.bf16.msra.mxu0 %v7005_v33  ;;  %v6989_v4 = vor.u32 %v7819_v35, %v6988_v40  ;;  %v6430_v15 = vld [vmem:[#allocation12 + $0x68] sm:$0xf0]  ;;  %v7692_v2 = vld [vmem:[#allocation12 + $0xd4] sm:$0xf]  ;;  %v6486_v16 = vld [vmem:[#allocation12 + $0xd8] sm:$0xf0] }
 0x2ff   :  { %v7665_v48 = vld [vmem:[#allocation5 + $0x1c] sm:$0xf0]  ;;  %v6374_v9 = vld [vmem:[#allocation5 + $0x20] sm:$0xf0]  ;;  %3448 = vmatpush.bf16.msra.mxu2 %v6505_v57  ;;  %3393 = vmatpush.bf16.msrb.mxu3 %v6933_v23  ;;  %v7817_v20 = vld [vmem:[#allocation12 + $0x4b4] sm:$0xf0] }
 0x300   :  { %v9484_v39 = vor.u32 %v7665_v48, %v6372_v22  ;;  %v9486_v53 = vor.u32 %v7664_v60, %v6374_v9  ;;  %v2122_v63 = vld [vmem:[#allocation5 + $0x28] sm:$0x33]  ;;  %v6433_v22 = vor.u32 %v7678_v6, %v6430_v15  ;;  %v2224_v60 = vshrl.u32 %v9453_v59, 16  ;;  %v6916_v33 = vld [vmem:[#allocation12 + $0x430] sm:$0xf] }
 0x301   :  { %v2147_v14 = vunpack.c.l.b16 %v2122_v63  ;;  %v2148_v50 = vunpack.c.h.b16 %v2122_v63  ;;  %v6489_v9 = vor.u32 %v7692_v2, %v6486_v16  ;;  %v7801_v63 = vld [vmem:[#allocation12 + $0x434] sm:$0xf0]  ;;  %v7676_v29 = vld [vmem:[#allocation12 + $0x54] sm:$0xf]  ;;  %v6422_v5 = vld [vmem:[#allocation12 + $0x58] sm:$0xf0] }
 0x302   :  { %v2180_v31 = vshll.u32 %v9484_v39, 16  ;;  %v2192_v61 = vshll.u32 %v9486_v53, 16  ;;  %v2178_v27 = vshrl.u32 %v9484_v39, 16  ;;  %v2190_v1 = vshrl.u32 %v9486_v53, 16  ;;  %3412 = vmatpush.bf16.msra.mxu0 %v6997_v42  ;;  %3429 = vmatpush.bf16.msra.mxu1 %v6441_v34  ;;  %v7690_v26 = vld [vmem:[#allocation12 + $0xc4] sm:$0xf] }
 0x303   :  { %v9490_v18 = vpack.c.b16 %v2147_v14, %v2147_v14  ;;  %v9493_v51 = vpack.c.b16 %v2148_v50, %v2148_v50  ;;  %3449 = vmatpush.bf16.msra.mxu2 %v6497_v55  ;;  %3394 = vmatpush.bf16.msrb.mxu3 %v6925_v62  ;;  %v6917_v14 = vor.u32 %v7801_v63, %v6916_v33  ;;  %v6980_v50 = vld [vmem:[#allocation12 + $0x4b0] sm:$0xf]  ;;  %v6478_v11 = vld [vmem:[#allocation12 + $0xc8] sm:$0xf0]  ;;  %v7799_v57 = vld [vmem:[#allocation12 + $0x424] sm:$0xf0] }
 0x304   :  { %3252 = vmatmul.bf16.gmra.mxu3 %v9484_v39  ;;  %v2182_v41 = vrot.slane %v2180_v31, 1  ;;  %v2194_v56 = vrot.slane %v2192_v61, 1  ;;  %v6981_v8 = vor.u32 %v7817_v20, %v6980_v50  ;;  %v6972_v28 = vld [vmem:[#allocation12 + $0x4a0] sm:$0xf]  ;;  %v6481_v23 = vor.u32 %v7690_v26, %v6478_v11  ;;  %v7815_v46 = vld [vmem:[#allocation12 + $0x4a4] sm:$0xf0] }
 0x305   :  { %3271 = vmatmul.bf16.gmra.mxu0 %v9486_v53  ;;  %v2185_v54 = vshll.u32 %v9490_v18, 16  ;;  %v2197_v38 = vshll.u32 %v9493_v51, 16  ;;  %v7674_v52 = vld [vmem:[#allocation12 + $0x44] sm:$0xf]  ;;  %v2233_v42 = vshrl.u32 %v9456_v49, 16  ;;  %v2205_v55 = vrot.slane %v9446_v17, 1 }
 0x306   :  { %v2183_v7 = vor.u32 %v2182_v41, %v2178_v27  ;;  %v2195_v30 = vor.u32 %v2194_v56, %v2190_v1  ;;  %3413 = vmatpush.bf16.msra.mxu0 %v6989_v4  ;;  %3430 = vmatpush.bf16.msra.mxu1 %v6433_v22  ;;  %v6425_v41 = vor.u32 %v7676_v29, %v6422_v5  ;;  %v6908_v56 = vld [vmem:[#allocation12 + $0x420] sm:$0xf]  ;;  %v7688_v43 = vld [vmem:[#allocation12 + $0xb4] sm:$0xf]  ;;  %v6470_v36 = vld [vmem:[#allocation12 + $0xb8] sm:$0xf0] }
 0x307   :  { %v2187_v12 = vrot.slane %v2185_v54, 1  ;;  %v2199_v21 = vrot.slane %v2197_v38, 1  ;;  %3450 = vmatpush.bf16.msra.mxu2 %v6489_v9  ;;  %3395 = vmatpush.bf16.msrb.mxu3 %v6917_v14  ;;  %v6909_v37 = vor.u32 %v7799_v57, %v6908_v56  ;;  %v6900_v34 = vld [vmem:[#allocation12 + $0x410] sm:$0xf]  ;;  %v2208_v40 = vrot.slane %v9448_v47, 1 }
 0x308   :  { %v7797_v62 = vld [vmem:[#allocation12 + $0x414] sm:$0xf0]  ;;  %v6964_v4 = vld [vmem:[#allocation12 + $0x490] sm:$0xf]  ;;  %v2226_v6 = vrot.slane %v2224_v60, 1  ;;  %v2227_v15 = vrot.slane %v2161_v10, 2  ;;  %v6473_v22 = vor.u32 %v7688_v43, %v6470_v36 }
 0x309   :  { %v9513_v44 = vsel %vm481_vm9, %v2183_v7, %v2187_v12  ;;  %v9516_v48 = vsel %vm481_vm9, %v2195_v30, %v2199_v21  ;;  %v6414_v7 = vld [vmem:[#allocation12 + $0x48] sm:$0xf0]  ;;  %v2206_v30 = vrot.slane %v9453_v59, 1  ;;  %v2209_v12 = vrot.slane %v9456_v49, 1  ;;  %v7813_v2 = vld [vmem:[#allocation12 + $0x494] sm:$0xf0] }
 0x30a   :  { %3414 = vmatpush.bf16.msra.mxu0 %v6981_v8  ;;  %v6973_v21 = vor.u32 %v7815_v46, %v6972_v28  ;;  %3431 = vmatpush.bf16.msra.mxu1 %v6425_v41  ;;  %v6417_v35 = vor.u32 %v7674_v52, %v6414_v7  ;;  %v7672_v16 = vld [vmem:[#allocation12 + $0x34] sm:$0xf]  ;;  %v2235_v33 = vrot.slane %v2233_v42, 1  ;;  %v2236_v63 = vrot.slane %v2173_v13, 2  ;;  %v6406_v50 = vld [vmem:[#allocation12 + $0x38] sm:$0xf0] }
 0x30b   :  { %3451 = vmatpush.bf16.msra.mxu2 %v6481_v23  ;;  %v9529_v9 = vsel %vm190_vm2, %v2205_v55, %v2206_v30  ;;  %3396 = vmatpush.bf16.msrb.mxu3 %v6909_v37  ;;  %v6901_v14 = vor.u32 %v7797_v62, %v6900_v34  ;;  %v7686_v20 = vld [vmem:[#allocation12 + $0xa4] sm:$0xf]  ;;  %v9535_v60 = vsel %vm190_vm2, %v2208_v40, %v2209_v12  ;;  %v6462_v29 = vld [vmem:[#allocation12 + $0xa8] sm:$0xf0]  ;;  %v6892_v8 = vld [vmem:[#allocation12 + $0x400] sm:$0xf] }
 0x30c   :  { %3290 = vmatmul.bf16.gmra.mxu1 %v9513_v44  ;;  %v6965_v10 = vor.u32 %v7813_v2, %v6964_v4  ;;  %v7795_v5 = vld [vmem:[#allocation12 + $0x404] sm:$0xf0]  ;;  %v2221_v26 = vrot.slane %v2154_v19, 1  ;;  %v2222_v13 = vrot.slane %v2156_v45, 2  ;;  %v6409_v11 = vor.u32 %v7672_v16, %v6406_v50  ;;  %v6956_v41 = vld [vmem:[#allocation12 + $0x480] sm:$0xf] }
 0x30d   :  { %3309 = vmatmul.bf16.gmra.mxu2 %v9516_v48  ;;  %v7811_v56 = vld [vmem:[#allocation12 + $0x484] sm:$0xf0]  ;;  %v2230_v57 = vrot.slane %v2166_v58, 1  ;;  %v2231_v28 = vrot.slane %v2168_v3, 2  ;;  %v6465_v23 = vor.u32 %v7686_v20, %v6462_v29  ;;  %v7670_v46 = vld [vmem:[#allocation12 + $0x24] sm:$0xf]  ;;  %v2228_v7 = vor.u32 %v2227_v15, %v2226_v6 }
 0x30e   :  { %3415 = vmatpush.bf16.msra.mxu0 %v6973_v21  ;;  %3432 = vmatpush.bf16.msra.mxu1 %v6417_v35  ;;  %v6398_v52 = vld [vmem:[#allocation12 + $0x28] sm:$0xf0]  ;;  %v6893_v19 = vor.u32 %v7795_v5, %v6892_v8  ;;  %v7684_v30 = vld [vmem:[#allocation12 + $0x94] sm:$0xf]  ;;  %v6454_v42 = vld [vmem:[#allocation12 + $0x98] sm:$0xf0]  ;;  %v2237_v45 = vor.u32 %v2236_v63, %v2235_v33  ;;  %v6957_v37 = vor.u32 %v7811_v56, %v6956_v41 }
 0x30f   :  { %3452 = vmatpush.bf16.msra.mxu2 %v6473_v22  ;;  %3397 = vmatpush.bf16.msrb.mxu3 %v6901_v14  ;;  %v7712_v43 = vld [vmem:[#allocation12 + $0x174] sm:$0xf]  ;;  %v6566_v36 = vld [vmem:[#allocation12 + $0x178] sm:$0xf0]  ;;  %v2223_v12 = vor.u32 %v2222_v13, %v2221_v26  ;;  %v2212_v58 = vrot.slane %v9490_v18, 1  ;;  %v2215_v21 = vrot.slane %v9493_v51, 1  ;;  %v6401_v3 = vor.u32 %v7670_v46, %v6398_v52 }
 0x310   :  { %v7728_v34 = vld [vmem:[#allocation12 + $0x1f4] sm:$0xf]  ;;  %v6630_v55 = vld [vmem:[#allocation12 + $0x1f8] sm:$0xf0]  ;;  %v2232_v40 = vor.u32 %v2231_v28, %v2230_v57  ;;  %v6457_v35 = vor.u32 %v7684_v30, %v6454_v42  ;;  %v6569_v6 = vor.u32 %v7712_v43, %v6566_v36  ;;  %v7682_v15 = vld [vmem:[#allocation12 + $0x84] sm:$0xf] }
 0x311   :  { %v7668_v62 = vld [vmem:[#allocation12 + $0x14] sm:$0xf]  ;;  %v6390_v4 = vld [vmem:[#allocation12 + $0x18] sm:$0xf0]  ;;  %v9549_v22 = vsel %vm517_vm10, %v2223_v12, %v2228_v7  ;;  %v6633_v2 = vor.u32 %v7728_v34, %v6630_v55  ;;  %v6446_v16 = vld [vmem:[#allocation12 + $0x88] sm:$0xf0] }
 0x312   :  { %3416 = vmatpush.bf16.msra.mxu0 %v6965_v10  ;;  %3433 = vmatpush.bf16.msra.mxu1 %v6409_v11  ;;  %v7710_v33 = vld [vmem:[#allocation12 + $0x164] sm:$0xf]  ;;  %v6558_v63 = vld [vmem:[#allocation12 + $0x168] sm:$0xf0]  ;;  %v9553_v14 = vsel %vm517_vm10, %v2232_v40, %v2237_v45  ;;  %v2242_v50 = vshrl.u32 %v9490_v18, 16  ;;  %v2251_v20 = vshrl.u32 %v9493_v51, 16  ;;  %v6393_v8 = vor.u32 %v7668_v62, %v6390_v4 }
 0x313   :  { %3453 = vmatpush.bf16.msra.mxu2 %v6465_v23  ;;  %3398 = vmatpush.bf16.msrb.mxu3 %v6893_v19  ;;  %v7726_v10 = vld [vmem:[#allocation12 + $0x1e4] sm:$0xf]  ;;  %v6622_v29 = vld [vmem:[#allocation12 + $0x1e8] sm:$0xf0]  ;;  %v7760_v26 = vld [vmem:[#allocation12 + $0x2f4] sm:$0xf]  ;;  %v6449_v11 = vor.u32 %v7682_v15, %v6446_v16  ;;  %v6561_v56 = vor.u32 %v7710_v33, %v6558_v63 }
 0x314   :  { %3323 = vmatmul.bf16.vlgmr.msra.gmra.mxu3 %v9529_v9  ;;  %v7666_v5 = vld [vmem:[#allocation12 + $0x4] sm:$0xf]  ;;  %v6758_v13 = vld [vmem:[#allocation12 + $0x2f8] sm:$0xf0]  ;;  %v6382_v41 = vld [vmem:[#allocation12 + $0x8] sm:$0xf0]  ;;  %v6625_v23 = vor.u32 %v7726_v10, %v6622_v29 }
 0x315   :  { %3342 = vmatmul.bf16.vlgmr.msrb.gmra.mxu0 %v9535_v60  ;;  %v7708_v57 = vld [vmem:[#allocation12 + $0x154] sm:$0xf]  ;;  %v6550_v28 = vld [vmem:[#allocation12 + $0x158] sm:$0xf0]  ;;  %v6761_v46 = vor.u32 %v7760_v26, %v6758_v13  ;;  %v7758_v42 = vld [vmem:[#allocation12 + $0x2e4] sm:$0xf]  ;;  %v6385_v36 = vor.u32 %v7666_v5, %v6382_v41 }
 0x316   :  { %3417 = vmatpush.bf16.msra.mxu0 %v6957_v37  ;;  %3434 = vmatpush.bf16.msra.mxu1 %v6401_v3  ;;  %v7724_v52 = vld [vmem:[#allocation12 + $0x1d4] sm:$0xf]  ;;  %v6694_v19 = vld [vmem:[#allocation12 + $0x278] sm:$0xf0]  ;;  %v6750_v45 = vld [vmem:[#allocation12 + $0x2e8] sm:$0xf0]  ;;  %v6553_v34 = vor.u32 %v7708_v57, %v6550_v28 }
 0x317   :  { %3454 = vmatpush.bf16.msra.mxu2 %v6457_v35  ;;  %3467 = vmatpush.bf16.msra.mxu3 %v6569_v6  ;;  %v7744_v7 = vld [vmem:[#allocation12 + $0x274] sm:$0xf]  ;;  %v6614_v30 = vld [vmem:[#allocation12 + $0x1d8] sm:$0xf0]  ;;  %v2211_v37 = vrot.slane %v9484_v39, 1  ;;  %v2214_v43 = vrot.slane %v9486_v53, 1  ;;  %v6753_v4 = vor.u32 %v7758_v42, %v6750_v45 }
 0x318   :  { %v2244_v12 = vrot.slane %v2242_v50, 1  ;;  %v2245_v3 = vrot.slane %v2185_v54, 2  ;;  %v6697_v55 = vor.u32 %v7744_v7, %v6694_v19  ;;  %v7706_v40 = vld [vmem:[#allocation12 + $0x144] sm:$0xf]  ;;  %v6617_v62 = vor.u32 %v7724_v52, %v6614_v30  ;;  %v6542_v6 = vld [vmem:[#allocation12 + $0x148] sm:$0xf0] }
 0x319   :  { %v9563_v35 = vsel %vm190_vm2, %v2211_v37, %v2212_v58  ;;  %v7742_v15 = vld [vmem:[#allocation12 + $0x264] sm:$0xf]  ;;  %v9569_v54 = vsel %vm190_vm2, %v2214_v43, %v2215_v21  ;;  %v2253_v16 = vrot.slane %v2251_v20, 1  ;;  %v2254_v33 = vrot.slane %v2197_v38, 2  ;;  %v6606_v63 = vld [vmem:[#allocation12 + $0x1c8] sm:$0xf0] }
 0x31a   :  { %3486 = vmatpush.bf16.msrb.mxu0 %v6633_v2  ;;  %3435 = vmatpush.bf16.msra.mxu1 %v6393_v8  ;;  %v6686_v2 = vld [vmem:[#allocation12 + $0x268] sm:$0xf0]  ;;  %v7722_v58 = vld [vmem:[#allocation12 + $0x1c4] sm:$0xf]  ;;  %v2239_v50 = vrot.slane %v2178_v27, 1  ;;  %v2240_v10 = vrot.slane %v2180_v31, 2  ;;  %v6545_v38 = vor.u32 %v7706_v40, %v6542_v6 }
 0x31b   :  { %3455 = vmatpush.bf16.msra.mxu2 %v6449_v11  ;;  %3468 = vmatpush.bf16.msra.mxu3 %v6561_v56  ;;  %v7756_v29 = vld [vmem:[#allocation12 + $0x2d4] sm:$0xf]  ;;  %v6742_v8 = vld [vmem:[#allocation12 + $0x2d8] sm:$0xf0]  ;;  %v2248_v21 = vrot.slane %v2190_v1, 1  ;;  %v2249_v20 = vrot.slane %v2192_v61, 2  ;;  %v6689_v5 = vor.u32 %v7742_v15, %v6686_v2  ;;  %v2246_v11 = vor.u32 %v2245_v3, %v2244_v12 }
 0x31c   :  { %3361 = vmatmul.bf16.vlgmr.msrb.gmra.mxu1 %v9549_v22  ;;  %v7704_v26 = vld [vmem:[#allocation12 + $0x134] sm:$0xf]  ;;  %v6534_v13 = vld [vmem:[#allocation12 + $0x138] sm:$0xf0]  ;;  %v6609_v27 = vor.u32 %v7722_v58, %v6606_v63  ;;  %v6745_v31 = vor.u32 %v7756_v29, %v6742_v8  ;;  %v2255_v28 = vor.u32 %v2254_v33, %v2253_v16  ;;  %v7754_v1 = vld [vmem:[#allocation12 + $0x2c4] sm:$0xf]  ;;  %v2241_v52 = vor.u32 %v2240_v10, %v2239_v50 }
 0x31d   :  { %3380 = vmatmul.bf16.vlgmr.msrb.gmra.mxu2 %v9553_v14  ;;  %v7720_v41 = vld [vmem:[#allocation12 + $0x1b4] sm:$0xf]  ;;  %v6678_v57 = vld [vmem:[#allocation12 + $0x258] sm:$0xf0]  ;;  %v2250_v61 = vor.u32 %v2249_v20, %v2248_v21  ;;  %v6537_v7 = vor.u32 %v7704_v26, %v6534_v13  ;;  %v7702_v30 = vld [vmem:[#allocation12 + $0x124] sm:$0xf] }
 0x31e   :  { %3487 = vmatpush.bf16.msrb.mxu0 %v6625_v23  ;;  %3436 = vmatpush.bf16.msra.mxu1 %v6385_v36  ;;  %v7740_v56 = vld [vmem:[#allocation12 + $0x254] sm:$0xf]  ;;  %v6598_v23 = vld [vmem:[#allocation12 + $0x1b8] sm:$0xf0]  ;;  %v9583_v42 = vsel %vm517_vm10, %v2241_v52, %v2246_v11  ;;  %v6526_v43 = vld [vmem:[#allocation12 + $0x128] sm:$0xf0] }
 0x31f   :  { %3524 = vmatpush.bf16.msrb.mxu2 %v6761_v46  ;;  %3469 = vmatpush.bf16.msra.mxu3 %v6553_v34  ;;  %v6734_v46 = vld [vmem:[#allocation12 + $0x2c8] sm:$0xf0]  ;;  %v6681_v19 = vor.u32 %v7740_v56, %v6678_v57  ;;  %v6601_v45 = vor.u32 %v7720_v41, %v6598_v23  ;;  %v7738_v36 = vld [vmem:[#allocation12 + $0x244] sm:$0xf]  ;;  %v9587_v3 = vsel %vm517_vm10, %v2250_v61, %v2255_v28  ;;  %v7752_v40 = vld [vmem:[#allocation12 + $0x2b4] sm:$0xf] }
 0x320   :  { %v6737_v37 = vor.u32 %v7754_v1, %v6734_v46  ;;  %v6670_v12 = vld [vmem:[#allocation12 + $0x248] sm:$0xf0]  ;;  %v7718_v34 = vld [vmem:[#allocation12 + $0x1a4] sm:$0xf]  ;;  %v2265_v6 = vrot.slane %v9456_v49, 2  ;;  %v6529_v15 = vor.u32 %v7702_v30, %v6526_v43  ;;  %v2264_v49 = vrot.slane %v9448_v47, 2 }
 0x321   :  { %v6673_v2 = vor.u32 %v7738_v36, %v6670_v12  ;;  %v7700_v16 = vld [vmem:[#allocation12 + $0x114] sm:$0xf]  ;;  %v6518_v33 = vld [vmem:[#allocation12 + $0x118] sm:$0xf0]  ;;  %v7750_v21 = vld [vmem:[#allocation12 + $0x2a4] sm:$0xf] }
 0x322   :  { %3505 = vmatpush.bf16.msrb.mxu1 %v6697_v55  ;;  %3488 = vmatpush.bf16.msrb.mxu0 %v6617_v62  ;;  %v6590_v55 = vld [vmem:[#allocation12 + $0x1a8] sm:$0xf0]  ;;  %v6726_v62 = vld [vmem:[#allocation12 + $0x2b8] sm:$0xf0]  ;;  %v7716_v50 = vld [vmem:[#allocation12 + $0x194] sm:$0xf]  ;;  %v9599_v57 = vsel %vm10575_vm3, %v2264_v49, %v2265_v6 }
 0x323   :  { %3525 = vmatpush.bf16.msrb.mxu2 %v6753_v4  ;;  %3470 = vmatpush.bf16.msra.mxu3 %v6545_v38  ;;  %v2262_v4 = vrot.slane %v9453_v59, 2  ;;  %v6593_v58 = vor.u32 %v7718_v34, %v6590_v55  ;;  %v6729_v63 = vor.u32 %v7752_v40, %v6726_v62  ;;  %v7736_v10 = vld [vmem:[#allocation12 + $0x234] sm:$0xf]  ;;  %v6662_v29 = vld [vmem:[#allocation12 + $0x238] sm:$0xf0]  ;;  %v2261_v59 = vrot.slane %v9446_v17, 2 }
 0x324   :  { %3328 = vmatmul.bf16.gmra.mxu3 %v9563_v35  ;;  %v6582_v8 = vld [vmem:[#allocation12 + $0x198] sm:$0xf0]  ;;  %v6718_v20 = vld [vmem:[#allocation12 + $0x2a8] sm:$0xf0]  ;;  %v6521_v38 = vor.u32 %v7700_v16, %v6518_v33  ;;  %v7698_v26 = vld [vmem:[#allocation12 + $0x104] sm:$0xf] }
 0x325   :  { %3347 = vmatmul.bf16.gmra.mxu0 %v9569_v54  ;;  %v9595_v13 = vsel %vm10575_vm3, %v2261_v59, %v2262_v4  ;;  %v6585_v11 = vor.u32 %v7716_v50, %v6582_v8  ;;  %v7734_v41 = vld [vmem:[#allocation12 + $0x224] sm:$0xf]  ;;  %v6654_v56 = vld [vmem:[#allocation12 + $0x228] sm:$0xf0]  ;;  %v7748_v1 = vld [vmem:[#allocation12 + $0x294] sm:$0xf] }
 0x326   :  { %3506 = vmatpush.bf16.msrb.mxu1 %v6689_v5  ;;  %3489 = vmatpush.bf16.msrb.mxu0 %v6609_v27  ;;  %v6665_v5 = vor.u32 %v7736_v10, %v6662_v29  ;;  %v6721_v27 = vor.u32 %v7750_v21, %v6718_v20  ;;  %v7714_v28 = vld [vmem:[#allocation12 + $0x184] sm:$0xf]  ;;  %v6574_v23 = vld [vmem:[#allocation12 + $0x188] sm:$0xf0]  ;;  %v6710_v46 = vld [vmem:[#allocation12 + $0x298] sm:$0xf0]  ;;  %v6657_v61 = vor.u32 %v7734_v41, %v6654_v56 }
 0x327   :  { %3526 = vmatpush.bf16.msrb.mxu2 %v6745_v31  ;;  %3471 = vmatpush.bf16.msra.mxu3 %v6537_v7  ;;  %v6510_v31 = vld [vmem:[#allocation12 + $0x108] sm:$0xf0]  ;;  %v7732_v7 = vld [vmem:[#allocation12 + $0x214] sm:$0xf]  ;;  %v6822_v30 = vld [vmem:[#allocation12 + $0x378] sm:$0xf0] }
 0x328   :  { %v6513_v52 = vor.u32 %v7698_v26, %v6510_v31  ;;  %v6646_v43 = vld [vmem:[#allocation12 + $0x218] sm:$0xf0]  ;;  %v7792_v36 = vld [vmem:[#allocation12 + $0x3f4] sm:$0xf]  ;;  %v7746_v55 = vld [vmem:[#allocation12 + $0x284] sm:$0xf] }
 0x329   :  { %v6886_v12 = vld [vmem:[#allocation12 + $0x3f8] sm:$0xf0]  ;;  %v6702_v40 = vld [vmem:[#allocation12 + $0x288] sm:$0xf0]  ;;  %v7774_v4 = vld [vmem:[#allocation12 + $0x364] sm:$0xf] }
 0x32a   :  { %3507 = vmatpush.bf16.msrb.mxu1 %v6681_v19  ;;  %3490 = vmatpush.bf16.msrb.mxu0 %v6601_v45  ;;  %v7776_v19 = vld [vmem:[#allocation12 + $0x374] sm:$0xf]  ;;  %v6577_v45 = vor.u32 %v7714_v28, %v6574_v23  ;;  %v6889_v62 = vor.u32 %v7792_v36, %v6886_v12  ;;  %v6814_v6 = vld [vmem:[#allocation12 + $0x368] sm:$0xf0]  ;;  %v6705_v33 = vor.u32 %v7746_v55, %v6702_v40  ;;  %v2268_v50 = vrot.slane %v9490_v18, 2 }
 0x32b   :  { %3527 = vmatpush.bf16.msrb.mxu2 %v6737_v37  ;;  %3472 = vmatpush.bf16.msra.mxu3 %v6529_v15  ;;  %v6713_v37 = vor.u32 %v7748_v1, %v6710_v46  ;;  %v6825_v34 = vor.u32 %v7776_v19, %v6822_v30  ;;  %v6649_v15 = vor.u32 %v7732_v7, %v6646_v43  ;;  %v6878_v16 = vld [vmem:[#allocation12 + $0x3e8] sm:$0xf0]  ;;  %v7824_v8 = vld [vmem:[#allocation12 + $0x4f4] sm:$0xf]  ;;  %v7014_v21 = vld [vmem:[#allocation12 + $0x4f8] sm:$0xf0] }
 0x32c   :  { %3366 = vmatmul.bf16.gmra.mxu1 %v9583_v42  ;;  %v6817_v10 = vor.u32 %v7774_v4, %v6814_v6  ;;  %v7772_v20 = vld [vmem:[#allocation12 + $0x354] sm:$0xf]  ;;  %v7017_v49 = vor.u32 %v7824_v8, %v7014_v21  ;;  %v6870_v26 = vld [vmem:[#allocation12 + $0x3d8] sm:$0xf0]  ;;  %v2271_v18 = vrot.slane %v9493_v51, 2  ;;  %v2267_v41 = vrot.slane %v9484_v39, 2 }
 0x32d   :  { %3385 = vmatmul.bf16.gmra.mxu2 %v9587_v3  ;;  %v7006_v31 = vld [vmem:[#allocation12 + $0x4e8] sm:$0xf0]  ;;  %v2270_v56 = vrot.slane %v9486_v53, 2  ;;  %v7806_v1 = vld [vmem:[#allocation12 + $0x464] sm:$0xf] }
 0x32e   :  { %3508 = vmatpush.bf16.msrb.mxu1 %v6673_v2  ;;  %3491 = vmatpush.bf16.msrb.mxu0 %v6593_v58  ;;  %v7790_v2 = vld [vmem:[#allocation12 + $0x3e4] sm:$0xf]  ;;  %v6942_v7 = vld [vmem:[#allocation12 + $0x468] sm:$0xf0]  ;;  %v9609_v19 = vsel %vm10575_vm3, %v2267_v41, %v2268_v50  ;;  %v7820_v36 = vld [vmem:[#allocation12 + $0x4d4] sm:$0xf] }
 0x32f   :  { %3528 = vmatpush.bf16.msrb.mxu2 %v6729_v63  ;;  %3473 = vmatpush.bf16.msra.mxu3 %v6521_v38  ;;  %v7730_v58 = vld [vmem:[#allocation12 + $0x204] sm:$0xf]  ;;  %v6638_v63 = vld [vmem:[#allocation12 + $0x208] sm:$0xf0]  ;;  %v6881_v29 = vor.u32 %v7790_v2, %v6878_v16  ;;  %v6806_v38 = vld [vmem:[#allocation12 + $0x358] sm:$0xf0] }
 0x330   :  { %v6641_v59 = vor.u32 %v7730_v58, %v6638_v63  ;;  %v6809_v28 = vor.u32 %v7772_v20, %v6806_v38  ;;  %v7786_v51 = vld [vmem:[#allocation12 + $0x3c4] sm:$0xf]  ;;  %v6862_v30 = vld [vmem:[#allocation12 + $0x3c8] sm:$0xf0]  ;;  %v6998_v12 = vld [vmem:[#allocation12 + $0x4d8] sm:$0xf0] }
 0x331   :  { %v6865_v55 = vor.u32 %v7786_v51, %v6862_v30  ;;  %v7001_v40 = vor.u32 %v7820_v36, %v6998_v12  ;;  %v7784_v4 = vld [vmem:[#allocation12 + $0x3b4] sm:$0xf]  ;;  %v6854_v6 = vld [vmem:[#allocation12 + $0x3b8] sm:$0xf0]  ;;  %v7818_v16 = vld [vmem:[#allocation12 + $0x4c4] sm:$0xf] }
 0x332   :  { %3509 = vmatpush.bf16.msrb.mxu1 %v6665_v5  ;;  %3492 = vmatpush.bf16.msrb.mxu0 %v6585_v11  ;;  %v7788_v5 = vld [vmem:[#allocation12 + $0x3d4] sm:$0xf]  ;;  %v6934_v2 = vld [vmem:[#allocation12 + $0x458] sm:$0xf0]  ;;  %v6990_v58 = vld [vmem:[#allocation12 + $0x4c8] sm:$0xf0] }
 0x333   :  { %3529 = vmatpush.bf16.msrb.mxu2 %v6721_v27  ;;  %3474 = vmatpush.bf16.msra.mxu3 %v6513_v52  ;;  %v7808_v11 = vld [vmem:[#allocation12 + $0x474] sm:$0xf]  ;;  %v7822_v27 = vld [vmem:[#allocation12 + $0x4e4] sm:$0xf]  ;;  %v6873_v46 = vor.u32 %v7788_v5, %v6870_v26  ;;  %v6993_v50 = vor.u32 %v7818_v16, %v6990_v58  ;;  %v6782_v21 = vld [vmem:[#allocation12 + $0x328] sm:$0xf0] }
 0x334   :  { %3399 = vmatmul.bf16.vlgmr.msrb.gmra.mxu3 %v9595_v13  ;;  %v7009_v23 = vor.u32 %v7822_v27, %v7006_v31  ;;  %v7770_v52 = vld [vmem:[#allocation12 + $0x344] sm:$0xf]  ;;  %v6926_v20 = vld [vmem:[#allocation12 + $0x448] sm:$0xf0]  ;;  %v7816_v26 = vld [vmem:[#allocation12 + $0x4b4] sm:$0xf] }
 0x335   :  { %3418 = vmatmul.bf16.vlgmr.msra.gmra.mxu0 %v9599_v57  ;;  %v7766_v8 = vld [vmem:[#allocation12 + $0x324] sm:$0xf]  ;;  %v7780_v31 = vld [vmem:[#allocation12 + $0x394] sm:$0xf]  ;;  %v6838_v41 = vld [vmem:[#allocation12 + $0x398] sm:$0xf0] }
 0x336   :  { %3510 = vmatpush.bf16.msrb.mxu1 %v6657_v61  ;;  %3493 = vmatpush.bf16.msrb.mxu0 %v6577_v45  ;;  %v6798_v61 = vld [vmem:[#allocation12 + $0x348] sm:$0xf0]  ;;  %v6945_v45 = vor.u32 %v7806_v1, %v6942_v7  ;;  %v6785_v5 = vor.u32 %v7766_v8, %v6782_v21  ;;  %v7778_v51 = vld [vmem:[#allocation12 + $0x384] sm:$0xf] }
 0x337   :  { %3530 = vmatpush.bf16.msrb.mxu2 %v6713_v37  ;;  %3543 = vmatpush.bf16.msrb.mxu3 %v6825_v34  ;;  %v9613_v37 = vsel %vm10575_vm3, %v2270_v56, %v2271_v18  ;;  %v6801_v43 = vor.u32 %v7770_v52, %v6798_v61  ;;  %v7768_v34 = vld [vmem:[#allocation12 + $0x334] sm:$0xf]  ;;  %v6974_v1 = vld [vmem:[#allocation12 + $0x4a8] sm:$0xf0]  ;;  %v6841_v52 = vor.u32 %v7780_v31, %v6838_v41  ;;  %v7762_v61 = vld [vmem:[#allocation12 + $0x304] sm:$0xf] }
 0x338   :  { %v7800_v56 = vld [vmem:[#allocation12 + $0x434] sm:$0xf]  ;;  %v6766_v7 = vld [vmem:[#allocation12 + $0x308] sm:$0xf0] }
 0x339   :  { %v6830_v30 = vld [vmem:[#allocation12 + $0x388] sm:$0xf0]  ;;  %v6769_v12 = vor.u32 %v7762_v61, %v6766_v7 }
 0x33a   :  { %3562 = vmatpush.bf16.msra.mxu0 %v6889_v62  ;;  %3511 = vmatpush.bf16.msrb.mxu1 %v6649_v15  ;;  %v6790_v62 = vld [vmem:[#allocation12 + $0x338] sm:$0xf0]  ;;  %v7804_v15 = vld [vmem:[#allocation12 + $0x454] sm:$0xf]  ;;  %v6958_v16 = vld [vmem:[#allocation12 + $0x488] sm:$0xf0] }
 0x33b   :  { %3531 = vmatpush.bf16.msrb.mxu2 %v6705_v33  ;;  %3544 = vmatpush.bf16.msrb.mxu3 %v6817_v10  ;;  %v6937_v33 = vor.u32 %v7804_v15, %v6934_v2  ;;  %v6793_v63 = vor.u32 %v7768_v34, %v6790_v62  ;;  %v7802_v10 = vld [vmem:[#allocation12 + $0x444] sm:$0xf]  ;;  %v7812_v34 = vld [vmem:[#allocation12 + $0x494] sm:$0xf]  ;;  %v6833_v62 = vor.u32 %v7778_v51, %v6830_v30 }
 0x33c   :  { %3437 = vmatmul.bf16.vlgmr.msra.gmra.mxu1 %v9446_v17  ;;  %v6950_v17 = vld [vmem:[#allocation12 + $0x478] sm:$0xf0]  ;;  %v6929_v38 = vor.u32 %v7802_v10, %v6926_v20  ;;  %v7810_v2 = vld [vmem:[#allocation12 + $0x484] sm:$0xf] }
 0x33d   :  { %3456 = vmatmul.bf16.vlgmr.msra.gmra.mxu2 %v9448_v47  ;;  %v6953_v47 = vor.u32 %v7808_v11, %v6950_v17  ;;  %v6982_v11 = vld [vmem:[#allocation12 + $0x4b8] sm:$0xf0]  ;;  %v7764_v17 = vld [vmem:[#allocation12 + $0x314] sm:$0xf] }
 0x33e   :  { %3563 = vmatpush.bf16.msra.mxu0 %v6881_v29  ;;  %3512 = vmatpush.bf16.msrb.mxu1 %v6641_v59  ;;  %v6857_v29 = vor.u32 %v7784_v4, %v6854_v6  ;;  %v7782_v59 = vld [vmem:[#allocation12 + $0x3a4] sm:$0xf]  ;;  %v6985_v18 = vor.u32 %v7816_v26, %v6982_v11  ;;  %v6902_v6 = vld [vmem:[#allocation12 + $0x418] sm:$0xf0] }
 0x33f   :  { %3600 = vmatpush.bf16.msra.mxu2 %v7017_v49  ;;  %3545 = vmatpush.bf16.msrb.mxu3 %v6809_v28  ;;  %v6846_v49 = vld [vmem:[#allocation12 + $0x3a8] sm:$0xf0]  ;;  %v6918_v28 = vld [vmem:[#allocation12 + $0x438] sm:$0xf0] }
 0x340   :  { %v6849_v27 = vor.u32 %v7782_v59, %v6846_v49 }
 0x342   :  { %3581 = vmatpush.bf16.msra.mxu1 %v6953_v47  ;;  %3564 = vmatpush.bf16.msra.mxu0 %v6873_v46  ;;  %v6774_v47 = vld [vmem:[#allocation12 + $0x318] sm:$0xf0] }
 0x343   :  { %3601 = vmatpush.bf16.msra.mxu2 %v7009_v23  ;;  %3546 = vmatpush.bf16.msrb.mxu3 %v6801_v43  ;;  %v7814_v23 = vld [vmem:[#allocation12 + $0x4a4] sm:$0xf]  ;;  %v6910_v43 = vld [vmem:[#allocation12 + $0x428] sm:$0xf0] }
 0x344   :  { %3404 = vmatmul.bf16.gmra.mxu3 %v9609_v19  ;;  %v6977_v46 = vor.u32 %v7814_v23, %v6974_v1 }
 0x345   :  { %3423 = vmatmul.bf16.gmra.mxu0 %v9613_v37 }
 0x346   :  { %3582 = vmatpush.bf16.msra.mxu1 %v6945_v45  ;;  %3565 = vmatpush.bf16.msra.mxu0 %v6865_v55  ;;  %v7798_v45 = vld [vmem:[#allocation12 + $0x424] sm:$0xf]  ;;  %v6966_v55 = vld [vmem:[#allocation12 + $0x498] sm:$0xf0] }
 0x347   :  { %3602 = vmatpush.bf16.msra.mxu2 %v7001_v40  ;;  %3547 = vmatpush.bf16.msrb.mxu3 %v6793_v63  ;;  %v6913_v36 = vor.u32 %v7798_v45, %v6910_v43  ;;  %v7796_v40 = vld [vmem:[#allocation12 + $0x414] sm:$0xf]  ;;  %v6969_v4 = vor.u32 %v7812_v34, %v6966_v55 }
 0x348   :  { %v6905_v15 = vor.u32 %v7796_v40, %v6902_v6 }
 0x34a   :  { %3583 = vmatpush.bf16.msra.mxu1 %v6937_v33  ;;  %3566 = vmatpush.bf16.msra.mxu0 %v6857_v29  ;;  %v6894_v33 = vld [vmem:[#allocation12 + $0x408] sm:$0xf0] }
 0x34b   :  { %3603 = vmatpush.bf16.msra.mxu2 %v6993_v50  ;;  %3548 = vmatpush.bf16.msrb.mxu3 %v6785_v5 }
 0x34c   :  { %3442 = vmatmul.bf16.gmra.mxu1 %v9484_v39  ;;  %v6921_v39 = vor.u32 %v7800_v56, %v6918_v28 }
 0x34d   :  { %3461 = vmatmul.bf16.gmra.mxu2 %v9486_v53  ;;  %v6777_v53 = vor.u32 %v7764_v17, %v6774_v47 }
 0x34e   :  { %3584 = vmatpush.bf16.msra.mxu1 %v6929_v38  ;;  %3567 = vmatpush.bf16.msra.mxu0 %v6849_v27 }
 0x34f   :  { %3604 = vmatpush.bf16.msra.mxu2 %v6985_v18  ;;  %3549 = vmatpush.bf16.msrb.mxu3 %v6777_v53 }
 0x352   :  { %3585 = vmatpush.bf16.msra.mxu1 %v6921_v39  ;;  %3568 = vmatpush.bf16.msra.mxu0 %v6841_v52 }
 0x353   :  { %3605 = vmatpush.bf16.msra.mxu2 %v6977_v46  ;;  %3550 = vmatpush.bf16.msrb.mxu3 %v6769_v12 }
 0x354   :  { %3475 = vmatmul.bf16.vlgmr.msra.gmra.mxu3 %v9477_v25  ;;  %v6961_v25 = vor.u32 %v7810_v2, %v6958_v16 }
 0x355   :  { %3494 = vmatmul.bf16.vlgmr.msrb.gmra.mxu0 %v9481_v24  ;;  %v7794_v24 = vld [vmem:[#allocation12 + $0x404] sm:$0xf] }
 0x356   :  { %3586 = vmatpush.bf16.msra.mxu1 %v6913_v36  ;;  %3569 = vmatpush.bf16.msra.mxu0 %v6833_v62  ;;  %v6897_v58 = vor.u32 %v7794_v24, %v6894_v33 }
 0x357   :  { %3606 = vmatpush.bf16.msra.mxu2 %v6969_v4 }
 0x35a   :  { %3587 = vmatpush.bf16.msra.mxu1 %v6905_v15 }
 0x35b   :  { %3607 = vmatpush.bf16.msra.mxu2 %v6961_v25 }
 0x35c   :  { %3513 = vmatmul.bf16.vlgmr.msrb.gmra.mxu1 %v9529_v9  ;;  %v8180_v9 = vld [vmem:[%s10568_s7] sm:$0x7f] }
 0x35d   :  { %3532 = vmatmul.bf16.vlgmr.msrb.gmra.mxu2 %v9535_v60  ;;  %v9630_v50 = vperm.slane %v8180_v9, 3 }
 0x35e   :  { %3588 = vmatpush.bf16.msra.mxu1 %v6897_v58 }
 0x364   :  { %3480 = vmatmul.bf16.gmra.mxu3 %v9513_v44 }
 0x365   :  { %3499 = vmatmul.bf16.gmra.mxu0 %v9516_v48 }
 0x36c   :  { %3518 = vmatmul.bf16.gmra.mxu1 %v9563_v35 }
 0x36d   :  { %3537 = vmatmul.bf16.gmra.mxu2 %v9569_v54 }
 0x372   :  { %v3267_v63 = vpop.f32.mrf.mxu0 }
 0x374   :  { %3551 = vmatmul.bf16.vlgmr.msrb.gmra.mxu3 %v9549_v22 }
 0x375   :  { %3570 = vmatmul.bf16.vlgmr.msra.gmra.mxu0 %v9553_v14 }
 0x377   :  { %v3248_v60 = vpop.f32.mrf.mxu3 }
 0x378   :  { %v3249_v44 = vadd.f32 %v3248_v60, %v9630_v50 }
 0x379   :  { %v3286_v10 = vpop.f32.mrf.mxu1 }
 0x37a   :  { %v9634_v48 = vpop.f32.mrf.mxu0  ;;  %v3268_v35 = vadd.f32 %v3267_v63, %v3249_v44 }
 0x37c   :  { %v3287_v29 = vadd.f32 %v3286_v10, %v3268_v35  ;;  %3589 = vmatmul.bf16.vlgmr.msra.gmra.mxu1 %v9595_v13 }
 0x37d   :  { %3608 = vmatmul.bf16.vlgmr.msra.gmra.mxu2 %v9599_v57 }
 0x37f   :  { %v3250_v22 = vpop.f32.mrf.mxu3 }
 0x380   :  { %v3305_v54 = vpop.f32.mrf.mxu2  ;;  %v3251_v33 = vadd.f32 %v3250_v22, %v9630_v50 }
 0x381   :  { %v3306_v8 = vadd.f32 %v3305_v54, %v3287_v29  ;;  %v3288_v21 = vpop.f32.mrf.mxu1 }
 0x382   :  { %v3272_v20 = vpop.f32.mrf.mxu0  ;;  %v3270_v60 = vadd.f32 %v9634_v48, %v3251_v33 }
 0x384   :  { %3556 = vmatmul.bf16.gmra.mxu3 %v9583_v42  ;;  %v3289_v29 = vadd.f32 %v3288_v21, %v3270_v60 }
 0x385   :  { %3575 = vmatmul.bf16.gmra.mxu0 %v9587_v3 }
 0x387   :  { %v3253_v14 = vpop.f32.mrf.mxu3 }
 0x388   :  { %v3254_v59 = vadd.f32 %v3253_v14, %v9630_v50  ;;  %v3307_v49 = vpop.f32.mrf.mxu2 }
 0x389   :  { %v3291_v38 = vpop.f32.mrf.mxu1  ;;  %v3308_v54 = vadd.f32 %v3307_v49, %v3289_v29 }
 0x38a   :  { %v9641_v5 = vpop.f32.mrf.mxu0  ;;  %v3273_v26 = vadd.f32 %v3272_v20, %v3254_v59 }
 0x38c   :  { %v3292_v13 = vadd.f32 %v3291_v38, %v3273_v26  ;;  %3594 = vmatmul.bf16.gmra.mxu1 %v9609_v19 }
 0x38d   :  { %3613 = vmatmul.bf16.gmra.mxu2 %v9613_v37 }
 0x38f   :  { %v3255_v57 = vpop.f32.mrf.mxu3 }
 0x390   :  { %v3310_v11 = vpop.f32.mrf.mxu2 }
 0x391   :  { %v3311_v17 = vadd.f32 %v3310_v11, %v3292_v13  ;;  %v9645_v27 = vpop.f32.mrf.mxu1 }
 0x392   :  { %v3343_v42 = vpop.f32.mrf.mxu0 }
 0x397   :  { %v3324_v3 = vpop.f32.mrf.mxu3 }
 0x398   :  { %v9647_v18 = vpop.f32.mrf.mxu2  ;;  %v3325_v47 = vadd.f32 %v3324_v3, %v3306_v8 }
 0x399   :  { %v3362_v31 = vpop.f32.mrf.mxu1 }
 0x39a   :  { %v3345_v41 = vpop.f32.mrf.mxu0  ;;  %v3344_v56 = vadd.f32 %v3343_v42, %v3325_v47  ;;  %v3256_v42 = vadd.f32 %v3255_v57, %v9630_v50  ;;  %v8181_v57 = vld [vmem:[%s10568_s7 + $0x8] sm:$0x7f] }
 0x39c   :  { %v3363_v28 = vadd.f32 %v3362_v31, %v3344_v56  ;;  %v3275_v47 = vadd.f32 %v9641_v5, %v3256_v42 }
 0x39f   :  { %v3326_v23 = vpop.f32.mrf.mxu3 }
 0x3a0   :  { %v3381_v39 = vpop.f32.mrf.mxu2  ;;  %v3327_v14 = vadd.f32 %v3326_v23, %v3308_v54 }
 0x3a1   :  { %v3382_v1 = vadd.f32 %v3381_v39, %v3363_v28  ;;  %v3364_v19 = vpop.f32.mrf.mxu1 }
 0x3a2   :  { %v3348_v53 = vpop.f32.mrf.mxu0  ;;  %v3346_v38 = vadd.f32 %v3345_v41, %v3327_v14 }
 0x3a4   :  { %v3365_v48 = vadd.f32 %v3364_v19, %v3346_v38  ;;  %v2438_v19 = vperm.slane %v8181_v57, 3 }
 0x3a7   :  { %v3329_v37 = vpop.f32.mrf.mxu3 }
 0x3a8   :  { %v3330_v46 = vadd.f32 %v3329_v37, %v3311_v17  ;;  %v3383_v52 = vpop.f32.mrf.mxu2 }
 0x3a9   :  { %v3367_v61 = vpop.f32.mrf.mxu1  ;;  %v3384_v3 = vadd.f32 %v3383_v52, %v3365_v48 }
 0x3aa   :  { %v9649_v7 = vpop.f32.mrf.mxu0  ;;  %v3349_v51 = vadd.f32 %v3348_v53, %v3330_v46 }
 0x3ac   :  { %v3368_v30 = vadd.f32 %v3367_v61, %v3349_v51 }
 0x3af   :  { %v3331_v45 = vpop.f32.mrf.mxu3 }
 0x3b0   :  { %v3386_v43 = vpop.f32.mrf.mxu2 }
 0x3b1   :  { %v3387_v36 = vadd.f32 %v3386_v43, %v3368_v30  ;;  %v9651_v12 = vpop.f32.mrf.mxu1 }
 0x3b2   :  { %v3419_v34 = vpop.f32.mrf.mxu0 }
 0x3b7   :  { %v3400_v55 = vpop.f32.mrf.mxu3 }
 0x3b8   :  { %v9653_v40 = vpop.f32.mrf.mxu2  ;;  %v3401_v62 = vadd.f32 %v3400_v55, %v3382_v1  ;;  %v3294_v1 = vadd.f32 %v9645_v27, %v3275_v47 }
 0x3b9   :  { %v3438_v15 = vpop.f32.mrf.mxu1 }
 0x3ba   :  { %v9655_v4 = vadd.f32 %v3419_v34, %v3401_v62  ;;  %v3421_v6 = vpop.f32.mrf.mxu0  ;;  %v3313_v50 = vadd.f32 %v9647_v18, %v3294_v1  ;;  %v3439_v52 = vadd.f32 %v3438_v15, %v2438_v19 }
 0x3bc   :  { %v9673_v21 = vmin.f32 %v9655_v4, 0.0  ;;  %v3332_v53 = vadd.f32 %v3331_v45, %v3313_v50 }
 0x3be   :  { %v3635_v31 = vmul.f32 1.442695, %v9673_v21  ;;  %v3351_v18 = vadd.f32 %v9649_v7, %v3332_v53 }
 0x3bf   :  { %v3402_v2 = vpop.f32.mrf.mxu3 }
 0x3c0   :  { %v3457_v16 = vpop.f32.mrf.mxu2  ;;  %v3403_v49 = vadd.f32 %v3402_v2, %v3384_v3  ;;  %8083 = vpow2.f32 %v3635_v31  ;;  %v3370_v34 = vadd.f32 %v9651_v12, %v3351_v18 }
 0x3c1   :  { %v3440_v24 = vpop.f32.mrf.mxu1  ;;  %v3458_v43 = vadd.f32 %v3457_v16, %v3439_v52 }
 0x3c2   :  { %v3424_v25 = vpop.f32.mrf.mxu0  ;;  %v9677_v41 = vadd.f32 %v3421_v6, %v3403_v49  ;;  %v3389_v62 = vadd.f32 %v9653_v40, %v3370_v34  ;;  %v3441_v6 = vadd.f32 %v3440_v24, %v2438_v19 }
 0x3c4   :  { %v9687_v5 = vmin.f32 %v9677_v41, 0.0  ;;  %vm3621_vm3 = vcmp.gt.f32.partialorder %v9677_v41, 0.0 }
 0x3c6   :  { %v9689_v61 = vpop.eup %8083  ;;  %v3639_v51 = vmul.f32 1.442695, %v9687_v5 }
 0x3c7   :  { %v3405_v58 = vpop.f32.mrf.mxu3  ;;  %8085 = vlog2.f32 %v9689_v61  ;;  %vm3651_vm5 = vcmp.eq.f32.partialorder %v9689_v61, 1.0  ;;  %vm3819_vm6 = vcmp.eq.f32.partialorder %v9689_v61, 0.0 }
 0x3c8   :  { %v3459_v63 = vpop.f32.mrf.mxu2  ;;  %v3406_v9 = vadd.f32 %v3405_v58, %v3387_v36  ;;  %8087 = vpow2.f32 %v3639_v51 }
 0x3c9   :  { %v9661_v10 = vpop.f32.mrf.mxu1  ;;  %v3460_v7 = vadd.f32 %v3459_v63, %v3441_v6 }
 0x3ca   :  { %v9659_v44 = vpop.f32.mrf.mxu0  ;;  %v9663_v35 = vadd.f32 %v3424_v25, %v3406_v9  ;;  %v3444_v63 = vadd.f32 %v9661_v10, %v2438_v19 }
 0x3cc   :  { %v9699_v15 = vmin.f32 %v9663_v35, 0.0 }
 0x3cd   :  { %v8086_v33 = vpop.eup %8085 }
 0x3ce   :  { %v9703_v9 = vpop.eup %8087  ;;  %v3643_v60 = vmul.f32 1.442695, %v9699_v15  ;;  %v9706_v54 = vmul.f32 0.6931472, %v8086_v33 }
 0x3cf   :  { %v3407_v8 = vpop.f32.mrf.mxu3  ;;  %8089 = vlog2.f32 %v9703_v9 }
 0x3d0   :  { %v9665_v20 = vpop.f32.mrf.mxu2  ;;  %v3408_v16 = vadd.f32 %v3407_v8, %v3389_v62  ;;  %8091 = vpow2.f32 %v3643_v60  ;;  %vm3696_vm15 = vweird.f32 %v9706_v54 }
 0x3d1   :  { %v9667_v59 = vpop.f32.mrf.mxu1  ;;  %8093 = vrcp.f32 %v9706_v54 }
 0x3d2   :  { %v3495_v22 = vpop.f32.mrf.mxu0  ;;  %v9709_v40 = vadd.f32 %v9659_v44, %v3408_v16  ;;  %v3446_v53 = vadd.f32 %v9667_v59, %v2438_v19 }
 0x3d4   :  { %v9715_v48 = vmin.f32 %v9709_v40, 0.0 }
 0x3d5   :  { %v8090_v42 = vpop.eup %8089 }
 0x3d6   :  { %v9718_v31 = vpop.eup %8091  ;;  %v9721_v50 = vmul.f32 0.6931472, %v8090_v42 }
 0x3d7   :  { %v3476_v13 = vpop.f32.mrf.mxu3  ;;  %v9723_v57 = vpop.eup %8093  ;;  %8095 = vlog2.f32 %v9718_v31 }
 0x3d8   :  { %v9669_v26 = vpop.f32.mrf.mxu2  ;;  %v3477_v36 = vadd.f32 %v3476_v13, %v3458_v43  ;;  %v3692_v43 = vmul.f32 %v9723_v57, %v9706_v54  ;;  %vm3697_vm4 = vweird.f32 %v9723_v57  ;;  %vm3726_vm1 = vweird.f32 %v9721_v50 }
 0x3d9   :  { %v3514_v17 = vpop.f32.mrf.mxu1  ;;  %vm9772_vm14 = vmor %vm3696_vm15, %vm3697_vm4  ;;  %vm3619_vm4 = vcmp.gt.f32.partialorder %v9655_v4, 0.0 }
 0x3da   :  { %v3497_v11 = vpop.f32.mrf.mxu0  ;;  %v3496_v2 = vadd.f32 %v3495_v22, %v3477_v36 }
 0x3dc   :  { %v3515_v12 = vadd.f32 %v3514_v17, %v3496_v2  ;;  %v3463_v17 = vadd.f32 %v9665_v20, %v3444_v63  ;;  %v3693_v2 = vsub.f32 1.0, %v3692_v43  ;;  %v7018_v43 = vadd.f32 -1.0, %v9689_v61 }
 0x3dd   :  { %v8096_v6 = vpop.eup %8095 }
 0x3df   :  { %v3478_v56 = vpop.f32.mrf.mxu3 }
 0x3e0   :  { %v3533_v28 = vpop.f32.mrf.mxu2  ;;  %v3479_v29 = vadd.f32 %v3478_v56, %v3460_v7  ;;  %v3647_v56 = vmul.f32 1.442695, %v9715_v48 }
 0x3e1   :  { %v3516_v39 = vpop.f32.mrf.mxu1  ;;  %v3534_v24 = vadd.f32 %v3533_v28, %v3515_v12 }
 0x3e2   :  { %v9679_v23 = vpop.f32.mrf.mxu0  ;;  %v3498_v8 = vadd.f32 %v3497_v11, %v3479_v29  ;;  %8097 = vpow2.f32 %v3647_v56  ;;  %v9749_v29 = vmul.f32 0.6931472, %v8096_v6 }
 0x3e3   :  { %8099 = vrcp.f32 %v9721_v50 }
 0x3e4   :  { %v3517_v3 = vadd.f32 %v3516_v39, %v3498_v8 }
 0x3e7   :  { %v3481_v37 = vpop.f32.mrf.mxu3 }
 0x3e8   :  { %v3535_v46 = vpop.f32.mrf.mxu2  ;;  %v3482_v49 = vadd.f32 %v3481_v37, %v3463_v17  ;;  %v9738_v7 = vpop.eup %8097 }
 0x3e9   :  { %v3519_v30 = vpop.f32.mrf.mxu1  ;;  %v3536_v10 = vadd.f32 %v3535_v46, %v3517_v3  ;;  %v3465_v46 = vadd.f32 %v9669_v26, %v3446_v53  ;;  %v9743_v12 = vpop.eup %8099 }
 0x3ea   :  { %v9692_v27 = vpop.f32.mrf.mxu0  ;;  %v3501_v20 = vadd.f32 %v9679_v23, %v3482_v49  ;;  %v3722_v8 = vmul.f32 %v9743_v12, %v9721_v50  ;;  %vm3727_vm11 = vweird.f32 %v9743_v12 }
 0x3eb   :  { %vm9808_vm7 = vmor %vm3726_vm1, %vm3727_vm11  ;;  %vm3821_vm1 = vcmp.eq.f32.partialorder %v9703_v9, 0.0 }
 0x3ec   :  { %v3520_v59 = vadd.f32 %v3519_v30, %v3501_v20  ;;  %v3723_v42 = vsub.f32 1.0, %v3722_v8 }
 0x3ef   :  { %v3483_v45 = vpop.f32.mrf.mxu3 }
 0x3f0   :  { %v3538_v55 = vpop.f32.mrf.mxu2  ;;  %v3484_v23 = vadd.f32 %v3483_v45, %v3465_v46 }
 0x3f1   :  { %v9701_v25 = vpop.f32.mrf.mxu1  ;;  %v3539_v36 = vadd.f32 %v3538_v55, %v3520_v59  ;;  %v3694_v55 = vmul.f32 %v9723_v57, %v3693_v2 }
 0x3f2   :  { %v3571_v58 = vpop.f32.mrf.mxu0  ;;  %v3503_v16 = vadd.f32 %v9692_v27, %v3484_v23 }
 0x3f4   :  { %v3522_v63 = vadd.f32 %v9701_v25, %v3503_v16  ;;  %v3695_v25 = vadd.f32 %v9723_v57, %v3694_v55  ;;  %v3732_v16 = vand.u32 2147483648, %v9721_v50 }
 0x3f7   :  { %v3552_v22 = vpop.f32.mrf.mxu3 }
 0x3f8   :  { %v3540_v14 = vpop.f32.mrf.mxu2  ;;  %v3553_v38 = vadd.f32 %v3552_v22, %v3534_v24 }
 0x3f9   :  { %v3590_v13 = vpop.f32.mrf.mxu1 }
 0x3fa   :  { %v3572_v44 = vadd.f32 %v3571_v58, %v3553_v38  ;;  %v3573_v47 = vpop.f32.mrf.mxu0  ;;  %v3541_v38 = vadd.f32 %v3540_v14, %v3522_v63  ;;  %v3700_v14 = vand.u32 2147483647, %v9706_v54 }
 0x3fc   :  { %v3591_v11 = vadd.f32 %v3590_v13, %v3572_v44  ;;  %vm3701_vm0 = vcmp.eq.f32.partialorder %v3700_v14, 8.507059e+37 }
 0x3ff   :  { %v3554_v28 = vpop.f32.mrf.mxu3 }
 0x400   :  { %v3609_v1 = vpop.f32.mrf.mxu2  ;;  %v3555_v52 = vadd.f32 %v3554_v28, %v3536_v10 }
 0x401   :  { %v9727_v39 = vadd.f32 %v3609_v1, %v3591_v11  ;;  %v3592_v37 = vpop.f32.mrf.mxu1 }
 0x402   :  { %v3574_v18 = vadd.f32 %v3573_v47, %v3555_v52  ;;  %v3576_v34 = vpop.f32.mrf.mxu0  ;;  %v3702_v47 = vand.u32 2147483648, %v9706_v54  ;;  %v3699_v52 = vsel %vm9772_vm14, %v9723_v57, %v3695_v25  ;;  %v3724_v54 = vmul.f32 %v9743_v12, %v3723_v42 }
 0x403   :  { %v9732_v51 = vmin.f32 %v9727_v39, 0.0  ;;  %v3733_v42 = vor.u32 1.1754944e-38, %v3732_v16  ;;  %vm3653_vm14 = vcmp.eq.f32.partialorder %v9703_v9, 1.0 }
 0x404   :  { %v3593_v62 = vadd.f32 %v3592_v37, %v3574_v18  ;;  %v3703_v59 = vor.u32 1.1754944e-38, %v3702_v47  ;;  %v3725_v6 = vadd.f32 %v9743_v12, %v3724_v54  ;;  %v3760_v47 = vand.u32 2147483647, %v9749_v29 }
 0x405   :  { %v3637_v19 = vmul.f32 1.442695, %v9732_v51 }
 0x407   :  { %8101 = vpow2.f32 %v3637_v19  ;;  %v3557_v26 = vpop.f32.mrf.mxu3 }
 0x408   :  { %v3611_v33 = vpop.f32.mrf.mxu2  ;;  %v3558_v58 = vadd.f32 %v3557_v26, %v3539_v36  ;;  %8103 = vlog2.f32 %v9738_v7  ;;  %v3704_v36 = vsel %vm3701_vm0, %v3703_v59, %v3699_v52  ;;  %v3667_v26 = vmul.f32 %v7018_v43, %v9673_v21 }
 0x409   :  { %v9741_v60 = vadd.f32 %v3611_v33, %v3593_v62  ;;  %v3595_v24 = vpop.f32.mrf.mxu1  ;;  %v7020_v33 = vadd.f32 -1.0, %v9703_v9  ;;  %vm3756_vm0 = vweird.f32 %v9749_v29 }
 0x40a   :  { %v3577_v45 = vadd.f32 %v3576_v34, %v3558_v58  ;;  %v3578_v56 = vpop.f32.mrf.mxu0  ;;  %v3730_v58 = vand.u32 2147483647, %v9721_v50 }
 0x40b   :  { %v9746_v30 = vmin.f32 %v9741_v60, 0.0 }
 0x40c   :  { %v3596_v13 = vadd.f32 %v3595_v24, %v3577_v45  ;;  %v3705_v24 = vmul.f32 %v3704_v36, %v3667_v26  ;;  %vm3731_vm8 = vcmp.eq.f32.partialorder %v3730_v58, 8.507059e+37  ;;  %v7852_v26 = vld [vmem:[#allocation14 + $0xb0] sm:$0xff] }
 0x40d   :  { %v9751_v22 = vpop.eup %8101  ;;  %v3641_v27 = vmul.f32 1.442695, %v9746_v30 }
 0x40e   :  { %8105 = vlog2.f32 %v9751_v22  ;;  %v8104_v10 = vpop.eup %8103  ;;  %v3811_v53 = vsel %vm3651_vm5, %v9673_v21, %v3705_v24  ;;  %v7019_v52 = vadd.f32 -1.0, %v9751_v22  ;;  %v7837_v21 = vld [vmem:[#allocation14 + $0x38] sm:$0xff] }
 0x40f   :  { %8107 = vpow2.f32 %v3641_v27  ;;  %v3559_v17 = vpop.f32.mrf.mxu3  ;;  %v9789_v19 = vmul.f32 0.6931472, %v8104_v10  ;;  %v3827_v16 = vsel %vm3819_vm6, -1.0, %v3811_v53  ;;  %4674 = vmatpush.bf16.msra.mxu3 %v7837_v21  ;;  %vm3652_vm6 = vcmp.eq.f32.partialorder %v9751_v22, 1.0  ;;  %v7843_v53 = vld [vmem:[#allocation14 + $0x68] sm:$0xff] }
 0x410   :  { %8109 = vrcp.f32 %v9749_v29  ;;  %v3614_v44 = vpop.f32.mrf.mxu2  ;;  %v3560_v3 = vadd.f32 %v3559_v17, %v3541_v38  ;;  %v3668_v58 = vmul.f32 %v7019_v52, %v9732_v51 }
 0x411   :  { %v9762_v49 = vadd.f32 %v3614_v44, %v3596_v13  ;;  %v3597_v23 = vpop.f32.mrf.mxu1  ;;  %v3729_v13 = vsel %vm9808_vm7, %v9743_v12, %v3725_v6  ;;  %v3669_v44 = vmul.f32 %v7020_v33, %v9687_v5  ;;  %v3762_v12 = vand.u32 2147483648, %v9749_v29 }
 0x412   :  { %v3579_v28 = vadd.f32 %v3578_v56, %v3560_v3  ;;  %v7022_v3 = vadd.f32 -1.0, %v9718_v31  ;;  %v3734_v14 = vsel %vm3731_vm8, %v3733_v42, %v3729_v13  ;;  %vm9853_vm7 = vcmp.eq.f32.partialorder %v3760_v47, 8.507059e+37 }
 0x413   :  { %v9768_v11 = vmin.f32 %v9762_v49, 0.0  ;;  %v3735_v59 = vmul.f32 %v3734_v14, %v3669_v44  ;;  %v3763_v36 = vor.u32 1.1754944e-38, %v3762_v12  ;;  %v7836_v44 = vld [vmem:[#allocation14 + $0x30] sm:$0xff] }
 0x414   :  { %v8106_v1 = vpop.eup %8105  ;;  %v3598_v57 = vadd.f32 %v3597_v23, %v3579_v28  ;;  %v9839_v43 = vmul.f32 %v7022_v3, %v9699_v15  ;;  %4675 = vmatpush.bf16.msra.mxu3 %v7836_v44  ;;  %v7833_v44 = vld [vmem:[#allocation14 + $0x18] sm:$0xff] }
 0x415   :  { %v9776_v20 = vpop.eup %8107  ;;  %v9781_v37 = vmul.f32 0.6931472, %v8106_v1  ;;  %v3645_v46 = vmul.f32 1.442695, %v9768_v11  ;;  %v3813_v61 = vsel %vm3653_vm14, %v9687_v5, %v3735_v59 }
 0x416   :  { %v9785_v18 = vpop.eup %8109  ;;  %8111 = vlog2.f32 %v9776_v20  ;;  %v7021_v3 = vadd.f32 -1.0, %v9776_v20 }
 0x417   :  { %8113 = vrcp.f32 %v9781_v37  ;;  %v3752_v62 = vmul.f32 %v9785_v18, %v9749_v29  ;;  %v3717_v1 = vand.u32 2147483648, %v9781_v37  ;;  %vm3711_vm11 = vweird.f32 %v9781_v37 }
 0x418   :  { %8115 = vpow2.f32 %v3645_v46  ;;  %v3616_v34 = vpop.f32.mrf.mxu2  ;;  %v3715_v46 = vand.u32 2147483647, %v9781_v37  ;;  %vm3757_vm5 = vweird.f32 %v9785_v18  ;;  %v3835_v29 = vsel %vm3619_vm4, %v9655_v4, %v3827_v16  ;;  %v7834_v16 = vld [vmem:[#allocation14 + $0x20] sm:$0xff] }
 0x419   :  { %v9796_v2 = vadd.f32 %v3616_v34, %v3598_v57  ;;  %8117 = vrcp.f32 %v9789_v19  ;;  %v3753_v8 = vsub.f32 1.0, %v3752_v62  ;;  %v7845_v57 = vld [vmem:[#allocation14 + $0x78] sm:$0xff]  ;;  %v3718_v33 = vor.u32 1.1754944e-38, %v3717_v1  ;;  %v7835_v1 = vld [vmem:[#allocation14 + $0x28] sm:$0xff] }
 0x41a   :  { %4693 = vmatpush.bf16.msrb.mxu0 %v7845_v57  ;;  %vm3716_vm13 = vcmp.eq.f32.partialorder %v3715_v46, 8.507059e+37  ;;  %v7861_v46 = vld [vmem:[#allocation14 + $0xf8] sm:$0xff]  ;;  %v3829_v4 = vsel %vm3821_vm1, -1.0, %v3813_v61  ;;  %4676 = vmatpush.bf16.msra.mxu3 %v7835_v1  ;;  %v3670_v21 = vmul.f32 %v7021_v3, %v9746_v30  ;;  %vm3786_vm1 = vweird.f32 %v9789_v19 }
 0x41b   :  { %v9805_v45 = vmin.f32 %v9796_v2, 0.0  ;;  %v3754_v28 = vmul.f32 %v9785_v18, %v3753_v8  ;;  %4731 = vmatpush.bf16.msrb.mxu2 %v7861_v46 }
 0x41c   :  { %v8112_v55 = vpop.eup %8111 }
 0x41d   :  { %v8114_v27 = vpop.eup %8113  ;;  %v9812_v38 = vmul.f32 0.6931472, %v8112_v55  ;;  %v3649_v50 = vmul.f32 1.442695, %v9805_v45  ;;  %v3755_v6 = vadd.f32 %v9785_v18, %v3754_v28 }
 0x41e   :  { %v9818_v17 = vpop.eup %8115  ;;  %v3707_v25 = vmul.f32 %v8114_v27, %v9781_v37  ;;  %vm3712_vm15 = vweird.f32 %v8114_v27  ;;  %4677 = vmatpush.bf16.msra.mxu3 %v7834_v16  ;;  %v7857_v16 = vld [vmem:[#allocation14 + $0xd8] sm:$0xff] }
 0x41f   :  { %8119 = vrcp.f32 %v9812_v38  ;;  %v9826_v56 = vpop.eup %8117  ;;  %vm3713_vm8 = vmor %vm3711_vm11, %vm3712_vm15  ;;  %vm3820_vm15 = vcmp.eq.f32.partialorder %v9751_v22, 0.0  ;;  %v3745_v47 = vand.u32 2147483647, %v9812_v38  ;;  %v3747_v12 = vand.u32 2147483648, %v9812_v38 }
 0x420   :  { %v3708_v10 = vsub.f32 1.0, %v3707_v25  ;;  %8121 = vlog2.f32 %v9818_v17  ;;  %v9844_v23 = vmul.f32 %v9826_v56, %v9789_v19  ;;  %v7844_v25 = vld [vmem:[#allocation14 + $0x70] sm:$0xff]  ;;  %vm3620_vm11 = vcmp.gt.f32.partialorder %v9727_v39, 0.0 }
 0x421   :  { %8123 = vpow2.f32 %v3649_v50  ;;  %4694 = vmatpush.bf16.msrb.mxu0 %v7844_v25  ;;  %vm3746_vm4 = vcmp.eq.f32.partialorder %v3745_v47, 8.507059e+37  ;;  %v7841_v25 = vld [vmem:[#allocation14 + $0x58] sm:$0xff]  ;;  %v7023_v47 = vadd.f32 -1.0, %v9818_v17 }
 0x422   :  { %v3709_v54 = vmul.f32 %v8114_v27, %v3708_v10  ;;  %v3783_v50 = vsub.f32 1.0, %v9844_v23  ;;  %v3748_v23 = vor.u32 1.1754944e-38, %v3747_v12  ;;  %4678 = vmatpush.bf16.msra.mxu3 %v7833_v44 }
 0x424   :  { %v3710_v34 = vadd.f32 %v8114_v27, %v3709_v54  ;;  %v3790_v54 = vand.u32 2147483647, %v9789_v19 }
 0x425   :  { %v9849_v62 = vpop.eup %8119  ;;  %4695 = vmatpush.bf16.msrb.mxu0 %v7843_v53  ;;  %v7868_v53 = vld [vmem:[#allocation14 + $0x130] sm:$0xff] }
 0x426   :  { %v8122_v37 = vpop.eup %8121  ;;  %v3714_v55 = vsel %vm3713_vm8, %v8114_v27, %v3710_v34  ;;  %v3737_v24 = vmul.f32 %v9849_v62, %v9812_v38  ;;  %vm3742_vm14 = vweird.f32 %v9849_v62 }
 0x427   :  { %v9863_v63 = vpop.eup %8123  ;;  %v3719_v8 = vsel %vm3716_vm13, %v3718_v33, %v3714_v55  ;;  %v9869_v13 = vmul.f32 0.6931472, %v8122_v37  ;;  %vm9882_vm13 = vmor %vm3756_vm0, %vm3757_vm5  ;;  %vm3741_vm0 = vweird.f32 %v9812_v38  ;;  %vm3655_vm5 = vcmp.eq.f32.partialorder %v9718_v31, 1.0  ;;  %v7842_v37 = vld [vmem:[#allocation14 + $0x60] sm:$0xff] }
 0x428   :  { %v3720_v27 = vmul.f32 %v3719_v8, %v3668_v58  ;;  %v3738_v42 = vsub.f32 1.0, %v3737_v24  ;;  %v3759_v14 = vsel %vm9882_vm13, %v9785_v18, %v3755_v6  ;;  %v7853_v18 = vld [vmem:[#allocation14 + $0xb8] sm:$0xff]  ;;  %vm3743_vm8 = vmor %vm3741_vm0, %vm3742_vm14  ;;  %v3792_v33 = vand.u32 2147483648, %v9789_v19  ;;  %v7860_v24 = vld [vmem:[#allocation14 + $0xf0] sm:$0xff] }
 0x429   :  { %8125 = vrcp.f32 %v9869_v13  ;;  %v3764_v38 = vsel %vm9853_vm7, %v3763_v36, %v3759_v14  ;;  %4712 = vmatpush.bf16.msrb.mxu1 %v7853_v18  ;;  %vm3654_vm7 = vcmp.eq.f32.partialorder %v9776_v20, 1.0  ;;  %4696 = vmatpush.bf16.msrb.mxu0 %v7842_v37  ;;  %vm3822_vm13 = vcmp.eq.f32.partialorder %v9776_v20, 0.0 }
 0x42a   :  { %v3812_v22 = vsel %vm3652_vm6, %v9732_v51, %v3720_v27  ;;  %v3739_v10 = vmul.f32 %v9849_v62, %v3738_v42  ;;  %8127 = vlog2.f32 %v9863_v63  ;;  %v3765_v8 = vmul.f32 %v3764_v38, %v9839_v43  ;;  %4732 = vmatpush.bf16.msrb.mxu2 %v7860_v24  ;;  %v7851_v27 = vld [vmem:[#allocation14 + $0xa8] sm:$0xff] }
 0x42b   :  { %v3828_v28 = vsel %vm3820_vm15, -1.0, %v3812_v22  ;;  %vm3787_vm6 = vweird.f32 %v9826_v56  ;;  %vm3622_vm15 = vcmp.gt.f32.partialorder %v9741_v60, 0.0  ;;  %v7859_v42 = vld [vmem:[#allocation14 + $0xe8] sm:$0xff]  ;;  %v3777_v12 = vand.u32 2147483648, %v9869_v13 }
 0x42c   :  { %v3836_v51 = vsel %vm3620_vm11, %v9727_v39, %v3828_v28  ;;  %v3740_v52 = vadd.f32 %v9849_v62, %v3739_v10  ;;  %v3784_v39 = vmul.f32 %v9826_v56, %v3783_v50  ;;  %v7024_v20 = vadd.f32 -1.0, %v9738_v7  ;;  %vm9951_vm0 = vmor %vm3786_vm1, %vm3787_vm6  ;;  %v7832_v28 = vld [vmem:[#allocation14 + $0x10] sm:$0xff] }
 0x42d   :  { %v3843_v59 = vpack.c.bf16 %v3836_v51, %v3835_v29  ;;  %4713 = vmatpush.bf16.msrb.mxu1 %v7852_v26  ;;  %v3815_v14 = vsel %vm3655_vm5, %v9699_v15, %v3765_v8  ;;  %vm3823_vm11 = vcmp.eq.f32.partialorder %v9718_v31, 0.0  ;;  %4697 = vmatpush.bf16.msrb.mxu0 %v7841_v25  ;;  %v7840_v29 = vld [vmem:[#allocation14 + $0x50] sm:$0xff]  ;;  %vm9962_vm5 = vcmp.eq.f32.partialorder %v3790_v54, 8.507059e+37  ;;  %v7850_v51 = vld [vmem:[#allocation14 + $0xa0] sm:$0xff] }
 0x42e   :  { %v3744_v57 = vsel %vm3743_vm8, %v9849_v62, %v3740_v52  ;;  %v3837_v62 = vsel %vm3621_vm3, %v9677_v41, %v3829_v4  ;;  %v3785_v50 = vadd.f32 %v9826_v56, %v3784_v39  ;;  %vm3623_vm3 = vcmp.gt.f32.partialorder %v9663_v35, 0.0  ;;  %4733 = vmatpush.bf16.msrb.mxu2 %v7859_v42  ;;  %v7858_v52 = vld [vmem:[#allocation14 + $0xe0] sm:$0xff]  ;;  %4679 = vmatpush.bf16.msra.mxu3 %v7832_v28  ;;  %v7856_v25 = vld [vmem:[#allocation14 + $0xd0] sm:$0xff]  ;;  %v7855_v28 = vld [vmem:[#allocation14 + $0xc8] sm:$0xff] }
 0x42f   :  { %v9911_v34 = vpop.eup %8125  ;;  %v9913_v6 = vrot.slane %v3843_v59, 7  ;;  %v3749_v9 = vsel %vm3746_vm4, %v3748_v23, %v3744_v57  ;;  %vm3771_vm8 = vweird.f32 %v9869_v13  ;;  %v3793_v59 = vor.u32 1.1754944e-38, %v3792_v33  ;;  %v7831_v57 = vld [vmem:[#allocation14 + $0x8] sm:$0xff]  ;;  %v7849_v33 = vld [vmem:[#allocation14 + $0x98] sm:$0xff]  ;;  %v7830_v8 = vld [vmem:[#allocation14] sm:$0xff] }
 0x430   :  { %v8128_v36 = vpop.eup %8127  ;;  %v3750_v58 = vmul.f32 %v3749_v9, %v3670_v21  ;;  %v3767_v55 = vmul.f32 %v9911_v34, %v9869_v13  ;;  %vm3772_vm14 = vweird.f32 %v9911_v34  ;;  %v3789_v15 = vsel %vm9951_vm0, %v9826_v56, %v3785_v50  ;;  %v7838_v50 = vld [vmem:[#allocation14 + $0x40] sm:$0xff] }
 0x431   :  { %3867 = vst [vmem:[#allocation6] sm:$0xee] %v9913_v6  ;;  %v9925_v61 = vmul.f32 0.6931472, %v8128_v36  ;;  %4714 = vmatpush.bf16.msrb.mxu1 %v7851_v27  ;;  %v3852_v18 = vrot.slane %v9913_v6, 4  ;;  %vm3773_vm4 = vmor %vm3771_vm8, %vm3772_vm14  ;;  %v3672_v56 = vmul.f32 %v7023_v47, %v9768_v11  ;;  %v3831_v54 = vsel %vm3823_vm11, -1.0, %v3815_v14  ;;  %4698 = vmatpush.bf16.msrb.mxu0 %v7840_v29 }
 0x432   :  { %v3814_v41 = vsel %vm3654_vm7, %v9746_v30, %v3750_v58  ;;  %v3768_v43 = vsub.f32 1.0, %v3767_v55  ;;  %v3775_v30 = vand.u32 2147483647, %v9869_v13  ;;  %v3778_v13 = vor.u32 1.1754944e-38, %v3777_v12  ;;  %v7839_v6 = vld [vmem:[#allocation14 + $0x48] sm:$0xff]  ;;  %4734 = vmatpush.bf16.msrb.mxu2 %v7858_v52  ;;  %4680 = vmatpush.bf16.msra.mxu3 %v7831_v57  ;;  %v7877_v27 = vld [vmem:[#allocation14 + $0x178] sm:$0xff] }
 0x433   :  { %v3830_v3 = vsel %vm3822_vm13, -1.0, %v3814_v41  ;;  %8129 = vrcp.f32 %v9925_v61  ;;  %v3794_v21 = vsel %vm9962_vm5, %v3793_v59, %v3789_v15  ;;  %vm3656_vm7 = vcmp.eq.f32.partialorder %v9818_v17, 1.0 }
 0x434   :  { %v3838_v5 = vsel %vm3622_vm15, %v9741_v60, %v3830_v3  ;;  %v3769_v22 = vmul.f32 %v9911_v34, %v3768_v43  ;;  %vm3776_vm1 = vcmp.eq.f32.partialorder %v3775_v30, 8.507059e+37  ;;  %v3839_v37 = vsel %vm3623_vm3, %v9663_v35, %v3831_v54  ;;  %v7869_v43 = vld [vmem:[#allocation14 + $0x138] sm:$0xff]  ;;  %v7847_v60 = vld [vmem:[#allocation14 + $0x88] sm:$0xff]  ;;  %v7846_v54 = vld [vmem:[#allocation14 + $0x80] sm:$0xff] }
 0x435   :  { %v3844_v10 = vpack.c.bf16 %v3838_v5, %v3837_v62  ;;  %4715 = vmatpush.bf16.msrb.mxu1 %v7850_v51  ;;  %vm3824_vm6 = vcmp.eq.f32.partialorder %v9818_v17, 0.0  ;;  %vm3624_vm15 = vcmp.gt.f32.partialorder %v9762_v49, 0.0  ;;  %v7025_v55 = vadd.f32 -1.0, %v9863_v63  ;;  %4699 = vmatpush.bf16.msrb.mxu0 %v7839_v6  ;;  %v7848_v17 = vld [vmem:[#allocation14 + $0x90] sm:$0xff]  ;;  %v7867_v6 = vld [vmem:[#allocation14 + $0x128] sm:$0xff] }
 0x436   :  { %v3770_v1 = vadd.f32 %v9911_v34, %v3769_v22  ;;  %v3807_v24 = vand.u32 2147483648, %v9925_v61  ;;  %4735 = vmatpush.bf16.msrb.mxu2 %v7857_v16  ;;  %vm3625_vm13 = vcmp.gt.f32.partialorder %v9709_v40, 0.0  ;;  %vm3657_vm14 = vcmp.eq.f32.partialorder %v9738_v7, 1.0  ;;  %4681 = vmatpush.bf16.msra.mxu3 %v7830_v8  ;;  %v7876_v51 = vld [vmem:[#allocation14 + $0x170] sm:$0xff]  ;;  %v7885_v16 = vld [vmem:[#allocation14 + $0x1b8] sm:$0xff]  ;;  %v7866_v8 = vld [vmem:[#allocation14 + $0x120] sm:$0xff] }
 0x437   :  { %v3853_v46 = vrot.slane %v3844_v10, 7  ;;  %vm3801_vm11 = vweird.f32 %v9925_v61  ;;  %vm3825_vm0 = vcmp.eq.f32.partialorder %v9738_v7, 0.0  ;;  %v3674_v5 = vmul.f32 %v7025_v55, %v9805_v45 }
 0x438   :  { %v3774_v19 = vsel %vm3773_vm4, %v9911_v34, %v3770_v1  ;;  %v3673_v34 = vmul.f32 %v7024_v20, %v9715_v48  ;;  %v7028_v3 = vld [vmem:[#allocation6] sm:$0xf]  ;;  %v7826_v47 = vld [vmem:[#allocation6 + $0x4] sm:$0xf]  ;;  %v3808_v30 = vor.u32 1.1754944e-38, %v3807_v24  ;;  %vm3626_vm4 = vcmp.gt.f32.partialorder %v9796_v2, 0.0 }
 0x439   :  { %v9973_v23 = vpop.eup %8129  ;;  %v3854_v4 = vsel %vm8718_vm12, %v3852_v18, %v3853_v46  ;;  %v3855_v39 = vrot.slane %v3853_v46, 4  ;;  %v3779_v38 = vsel %vm3776_vm1, %v3778_v13, %v3774_v19  ;;  %4716 = vmatpush.bf16.msrb.mxu1 %v7849_v33  ;;  %4700 = vmatpush.bf16.msrb.mxu0 %v7838_v50  ;;  %vm3658_vm1 = vcmp.eq.f32.partialorder %v9863_v63, 1.0  ;;  %v7874_v50 = vld [vmem:[#allocation14 + $0x160] sm:$0xff] }
 0x43a   :  { %3868 = vst [vmem:[#allocation6 + $0x8] sm:$0xff] %v3854_v4  ;;  %v3780_v9 = vmul.f32 %v3779_v38, %v3672_v56  ;;  %v3797_v31 = vmul.f32 %v9973_v23, %v9925_v61  ;;  %v3795_v36 = vmul.f32 %v3794_v21, %v3673_v34  ;;  %vm3802_vm3 = vweird.f32 %v9973_v23  ;;  %4736 = vmatpush.bf16.msrb.mxu2 %v7856_v25  ;;  %v7875_v34 = vld [vmem:[#allocation14 + $0x168] sm:$0xff]  ;;  %v7865_v25 = vld [vmem:[#allocation14 + $0x118] sm:$0xff] }
 0x43b   :  { %3869 = vst [vmem:[#allocation6 + $0x10] sm:$0x11] %v3855_v39  ;;  %vm10006_vm8 = vmor %vm3801_vm11, %vm3802_vm3  ;;  %4750 = vmatpush.bf16.msrb.mxu3 %v7869_v43  ;;  %v7883_v43 = vld [vmem:[#allocation14 + $0x1a8] sm:$0xff] }
 0x43c   :  { %v3816_v26 = vsel %vm3656_vm7, %v9768_v11, %v3780_v9  ;;  %v3798_v58 = vsub.f32 1.0, %v3797_v31  ;;  %v3805_v11 = vand.u32 2147483647, %v9925_v61  ;;  %vm3826_vm7 = vcmp.eq.f32.partialorder %v9863_v63, 0.0 }
 0x43d   :  { %v3832_v62 = vsel %vm3824_vm6, -1.0, %v3816_v26  ;;  %4717 = vmatpush.bf16.msrb.mxu1 %v7848_v17  ;;  %4769 = vmatpush.bf16.msra.mxu0 %v7877_v27  ;;  %v7891_v27 = vld [vmem:[#allocation14 + $0x1e8] sm:$0xff]  ;;  %vm10634_vm6 = vcmask 1045504  }
 0x43e   :  { %v3840_v44 = vsel %vm3624_vm15, %v9762_v49, %v3832_v62  ;;  %v3799_v35 = vmul.f32 %v9973_v23, %v3798_v58  ;;  %v3817_v49 = vsel %vm3657_vm14, %v9715_v48, %v3795_v36  ;;  %vm3806_vm5 = vcmp.eq.f32.partialorder %v3805_v11, 8.507059e+37  ;;  %4737 = vmatpush.bf16.msrb.mxu2 %v7855_v28  ;;  %vm10635_vm15 = vmmov %vm10634_vm6 }
 0x43f   :  { %v3845_v41 = vpack.c.bf16 %v3840_v44, %v3839_v37  ;;  %v3833_v15 = vsel %vm3825_vm0, -1.0, %v3817_v49  ;;  %4751 = vmatpush.bf16.msrb.mxu3 %v7868_v53  ;;  %v7893_v37 = vld [vmem:[#allocation14 + $0x1f8] sm:$0xff]  ;;  %v7884_v44 = vld [vmem:[#allocation14 + $0x1b0] sm:$0xff]  ;;  %vm10636_vm3 = vmmov %vm10634_vm6 }
 0x440   :  { %v3800_v42 = vadd.f32 %v9973_v23, %v3799_v35  ;;  %v3841_v9 = vsel %vm3625_vm13, %v9709_v40, %v3833_v15  ;;  %v7892_v35 = vld [vmem:[#allocation14 + $0x1f0] sm:$0xff]  ;;  %vm10637_vm13 = vmmov %vm10636_vm3 }
 0x441   :  { %v10001_v12 = vrot.slane %v3845_v41, 7  ;;  %v7827_v61 = vld [vmem:[#allocation6 + $0x4] sm:$0xf0]  ;;  %v7030_v20 = vld [vmem:[#allocation6 + $0x8] sm:$0xf0]  ;;  %4718 = vmatpush.bf16.msrb.mxu1 %v7847_v60  ;;  %4770 = vmatpush.bf16.msra.mxu0 %v7876_v51  ;;  %v7873_v41 = vld [vmem:[#allocation14 + $0x158] sm:$0xff] }
 0x442   :  { %v3804_v48 = vsel %vm10006_vm8, %v9973_v23, %v3800_v42  ;;  %v10013_v10 = vor.u32 %v7827_v61, %v7028_v3  ;;  %v10015_v14 = vor.u32 %v7826_v47, %v7030_v20  ;;  %v3875_v29 = vld [vmem:[#allocation6 + $0x10] sm:$0x33]  ;;  %v7854_v23 = vld [vmem:[#allocation14 + $0xc0] sm:$0xff] }
 0x443   :  { %3870 = vst [vmem:[#allocation6 + $0x18] sm:$0xee] %v10001_v12  ;;  %v3809_v1 = vsel %vm3806_vm5, %v3808_v30, %v3804_v48  ;;  %v3901_v52 = vunpack.c.l.b16 %v3875_v29  ;;  %v3902_v18 = vunpack.c.h.b16 %v3875_v29  ;;  %4738 = vmatpush.bf16.msrb.mxu2 %v7854_v23  ;;  %v3857_v40 = vrot.slane %v10001_v12, 4  ;;  %4752 = vmatpush.bf16.msrb.mxu3 %v7867_v6  ;;  %v7864_v42 = vld [vmem:[#allocation14 + $0x110] sm:$0xff]  ;;  %v7882_v47 = vld [vmem:[#allocation14 + $0x1a0] sm:$0xff]  ;;  %v7863_v29 = vld [vmem:[#allocation14 + $0x108] sm:$0xff] }
 0x444   :  { %v3810_v46 = vmul.f32 %v3809_v1, %v3674_v5  ;;  %4682 = vmatmul.bf16.vlgmr.msra.gmra.mxu3 %v10013_v10  ;;  %4701 = vmatmul.bf16.vlgmr.msrb.gmra.mxu0 %v10015_v14  ;;  %v3912_v13 = vshll.u32 %v10013_v10, 16  ;;  %v3924_v56 = vshll.u32 %v10015_v14, 16  ;;  %v3910_v4 = vshrl.u32 %v10013_v10, 16  ;;  %v7872_v49 = vld [vmem:[#allocation14 + $0x150] sm:$0xff]  ;;  %v7890_v12 = vld [vmem:[#allocation14 + $0x1e0] sm:$0xff]  ;;  %v7871_v1 = vld [vmem:[#allocation14 + $0x148] sm:$0xff] }
 0x445   :  { %v10026_v7 = vpack.c.b16 %v3901_v52, %v3901_v52  ;;  %v10028_v59 = vpack.c.b16 %v3902_v18, %v3902_v18  ;;  %v3922_v38 = vshrl.u32 %v10015_v14, 16  ;;  %4719 = vmatpush.bf16.msrb.mxu1 %v7846_v54  ;;  %4771 = vmatpush.bf16.msra.mxu0 %v7875_v34  ;;  %v7881_v18 = vld [vmem:[#allocation14 + $0x198] sm:$0xff]  ;;  %v7862_v6 = vld [vmem:[#allocation14 + $0x100] sm:$0xff] }
 0x446   :  { %v3818_v19 = vsel %vm3658_vm1, %v9805_v45, %v3810_v46  ;;  %v3914_v39 = vrot.slane %v3912_v13, 1  ;;  %v3926_v57 = vrot.slane %v3924_v56, 1  ;;  %v7889_v46 = vld [vmem:[#allocation14 + $0x1d8] sm:$0xff]  ;;  %v7870_v34 = vld [vmem:[#allocation14 + $0x140] sm:$0xff] }
 0x447   :  { %v3834_v63 = vsel %vm3826_vm7, -1.0, %v3818_v19  ;;  %v3917_v21 = vshll.u32 %v10026_v7, 16  ;;  %v3929_v45 = vshll.u32 %v10028_v59, 16  ;;  %4807 = vmatpush.bf16.msra.mxu2 %v7893_v37  ;;  %4753 = vmatpush.bf16.msrb.mxu3 %v7866_v8  ;;  %v7880_v37 = vld [vmem:[#allocation14 + $0x190] sm:$0xff]  ;;  %v3965_v8 = vrot.slane %v10028_v59, 1 }
 0x448   :  { %v3842_v31 = vsel %vm3626_vm4, %v9796_v2, %v3834_v63  ;;  %v3915_v33 = vor.u32 %v3914_v39, %v3910_v4  ;;  %v3927_v58 = vor.u32 %v3926_v57, %v3922_v38 }
 0x449   :  { %v3846_v26 = vpack.c.bf16 %v3842_v31, %v3841_v9  ;;  %v3919_v36 = vrot.slane %v3917_v21, 1  ;;  %v3931_v62 = vrot.slane %v3929_v45, 1  ;;  %4788 = vmatpush.bf16.msra.mxu1 %v7885_v16  ;;  %4772 = vmatpush.bf16.msra.mxu0 %v7874_v50  ;;  %v7900_v50 = vld [vmem:[#allocation14 + $0x230] sm:$0xff] }
 0x44a   :  { %v7036_v3 = vld [vmem:[#allocation6 + $0x18] sm:$0xf]  ;;  %v7828_v22 = vld [vmem:[#allocation6 + $0x1c] sm:$0xf] }
 0x44b   :  { %v3858_v2 = vrot.slane %v3846_v26, 7  ;;  %v3920_v55 = vsel %vm481_vm9, %v3915_v33, %v3919_v36  ;;  %v3932_v24 = vsel %vm481_vm9, %v3927_v58, %v3931_v62  ;;  %4808 = vmatpush.bf16.msra.mxu2 %v7892_v35  ;;  %4754 = vmatpush.bf16.msrb.mxu3 %v7865_v25  ;;  %v7888_v26 = vld [vmem:[#allocation14 + $0x1d0] sm:$0xff]  ;;  %v7901_v36 = vld [vmem:[#allocation14 + $0x238] sm:$0xff]  ;;  %v3980_v35 = vshrl.u32 %v10026_v7, 16 }
 0x44c   :  { %4720 = vmatmul.bf16.vlgmr.msrb.gmra.mxu1 %v3920_v55  ;;  %4739 = vmatmul.bf16.vlgmr.msrb.gmra.mxu2 %v3932_v24  ;;  %v7909_v58 = vld [vmem:[#allocation14 + $0x278] sm:$0xff]  ;;  %v7887_v55 = vld [vmem:[#allocation14 + $0x1c8] sm:$0xff]  ;;  %v3962_v24 = vrot.slane %v10026_v7, 1  ;;  %v3964_v25 = vrot.slane %v10015_v14, 1 }
 0x44d   :  { %v3859_v11 = vsel %vm8718_vm12, %v3857_v40, %v3858_v2  ;;  %v3860_v17 = vrot.slane %v3858_v2, 4  ;;  %4789 = vmatpush.bf16.msra.mxu1 %v7884_v44  ;;  %4773 = vmatpush.bf16.msra.mxu0 %v7873_v41  ;;  %v7879_v2 = vld [vmem:[#allocation14 + $0x188] sm:$0xff]  ;;  %v7908_v44 = vld [vmem:[#allocation14 + $0x270] sm:$0xff]  ;;  %v7878_v41 = vld [vmem:[#allocation14 + $0x180] sm:$0xff] }
 0x44e   :  { %3871 = vst [vmem:[#allocation6 + $0x20] sm:$0xff] %v3859_v11  ;;  %v3989_v11 = vshrl.u32 %v10028_v59, 16 }
 0x44f   :  { %3872 = vst [vmem:[#allocation6 + $0x28] sm:$0x11] %v3860_v17  ;;  %4809 = vmatpush.bf16.msra.mxu2 %v7891_v27  ;;  %4755 = vmatpush.bf16.msrb.mxu3 %v7864_v42  ;;  %v3961_v17 = vrot.slane %v10013_v10, 1  ;;  %v3966_v42 = vsel %vm190_vm2, %v3964_v25, %v3965_v8 }
 0x451   :  { %4790 = vmatpush.bf16.msra.mxu1 %v7883_v43  ;;  %4774 = vmatpush.bf16.msra.mxu0 %v7872_v49  ;;  %v7886_v43 = vld [vmem:[#allocation14 + $0x1c0] sm:$0xff]  ;;  %v3963_v27 = vsel %vm190_vm2, %v3961_v17, %v3962_v24  ;;  %v7899_v49 = vld [vmem:[#allocation14 + $0x228] sm:$0xff] }
 0x453   :  { %4810 = vmatpush.bf16.msra.mxu2 %v7890_v12  ;;  %4756 = vmatpush.bf16.msrb.mxu3 %v7863_v29  ;;  %v3983_v12 = vrot.slane %v3917_v21, 2  ;;  %v3987_v21 = vrot.slane %v3924_v56, 2 }
 0x455   :  { %v7829_v5 = vld [vmem:[#allocation6 + $0x1c] sm:$0xf0]  ;;  %v7038_v30 = vld [vmem:[#allocation6 + $0x20] sm:$0xf0]  ;;  %4791 = vmatpush.bf16.msra.mxu1 %v7882_v47  ;;  %4775 = vmatpush.bf16.msra.mxu0 %v7871_v1  ;;  %v3982_v47 = vrot.slane %v3980_v35, 1 }
 0x456   :  { %v10059_v61 = vor.u32 %v7829_v5, %v7036_v3  ;;  %v10061_v20 = vor.u32 %v7828_v22, %v7038_v30  ;;  %v3878_v48 = vld [vmem:[#allocation6 + $0x28] sm:$0x33]  ;;  %v3991_v5 = vrot.slane %v3989_v11, 1  ;;  %v3992_v22 = vrot.slane %v3929_v45, 2  ;;  %v7906_v45 = vld [vmem:[#allocation14 + $0x260] sm:$0xff] }
 0x457   :  { %v3903_v60 = vunpack.c.l.b16 %v3878_v48  ;;  %v3904_v28 = vunpack.c.h.b16 %v3878_v48  ;;  %4811 = vmatpush.bf16.msra.mxu2 %v7889_v46  ;;  %4757 = vmatpush.bf16.msrb.mxu3 %v7862_v6  ;;  %v7907_v3 = vld [vmem:[#allocation14 + $0x268] sm:$0xff]  ;;  %v3977_v30 = vrot.slane %v3910_v4, 1  ;;  %v3978_v48 = vrot.slane %v3912_v13, 2  ;;  %v7897_v4 = vld [vmem:[#allocation14 + $0x218] sm:$0xff]  ;;  %v7896_v6 = vld [vmem:[#allocation14 + $0x210] sm:$0xff] }
 0x458   :  { %4687 = vmatmul.bf16.gmra.mxu3 %v10059_v61  ;;  %4706 = vmatmul.bf16.gmra.mxu0 %v10061_v20  ;;  %v3936_v15 = vshll.u32 %v10059_v61, 16  ;;  %v3948_v53 = vshll.u32 %v10061_v20, 16  ;;  %v3934_v19 = vshrl.u32 %v10059_v61, 16  ;;  %v3946_v23 = vshrl.u32 %v10061_v20, 16  ;;  %v7902_v35 = vld [vmem:[#allocation14 + $0x240] sm:$0xff] }
 0x459   :  { %v10067_v51 = vpack.c.b16 %v3903_v60, %v3903_v60  ;;  %v10069_v52 = vpack.c.b16 %v3904_v28, %v3904_v28  ;;  %4792 = vmatpush.bf16.msra.mxu1 %v7881_v18  ;;  %4776 = vmatpush.bf16.msra.mxu0 %v7870_v34  ;;  %v3986_v60 = vrot.slane %v3922_v38, 1  ;;  %v7898_v28 = vld [vmem:[#allocation14 + $0x220] sm:$0xff]  ;;  %v3984_v29 = vor.u32 %v3983_v12, %v3982_v47  ;;  %v7904_v34 = vld [vmem:[#allocation14 + $0x250] sm:$0xff] }
 0x45a   :  { %v3938_v54 = vrot.slane %v3936_v15, 1  ;;  %v3950_v39 = vrot.slane %v3948_v53, 1  ;;  %v3993_v1 = vor.u32 %v3992_v22, %v3991_v5  ;;  %v3979_v18 = vor.u32 %v3978_v48, %v3977_v30 }
 0x45b   :  { %v3941_v63 = vshll.u32 %v10067_v51, 16  ;;  %v3953_v57 = vshll.u32 %v10069_v52, 16  ;;  %4812 = vmatpush.bf16.msra.mxu2 %v7888_v26  ;;  %4826 = vmatpush.bf16.msra.mxu3 %v7901_v36  ;;  %v3988_v46 = vor.u32 %v3987_v21, %v3986_v60  ;;  %v3968_v56 = vrot.slane %v10067_v51, 1  ;;  %v7895_v36 = vld [vmem:[#allocation14 + $0x208] sm:$0xff] }
 0x45c   :  { %v3939_v9 = vor.u32 %v3938_v54, %v3934_v19  ;;  %v3951_v31 = vor.u32 %v3950_v39, %v3946_v23  ;;  %v7905_v54 = vld [vmem:[#allocation14 + $0x258] sm:$0xff]  ;;  %v3985_v13 = vsel %vm517_vm10, %v3979_v18, %v3984_v29  ;;  %v3971_v38 = vrot.slane %v10069_v52, 1 }
 0x45d   :  { %v3943_v33 = vrot.slane %v3941_v63, 1  ;;  %v3955_v16 = vrot.slane %v3953_v57, 1  ;;  %4793 = vmatpush.bf16.msra.mxu1 %v7880_v37  ;;  %4845 = vmatpush.bf16.msrb.mxu0 %v7909_v58  ;;  %v3994_v39 = vsel %vm517_vm10, %v3988_v46, %v3993_v1  ;;  %v7903_v58 = vld [vmem:[#allocation14 + $0x248] sm:$0xff]  ;;  %v3995_v24 = vrot.slane %v3934_v19, 1  ;;  %v10148_v46 = vld [vmem:[%s10568_s7] sm:$0x7f] }
 0x45e   :  { %v3996_v8 = vrot.slane %v3936_v15, 2  ;;  %v4023_v47 = vrot.slane %v10059_v61, 2 }
 0x45f   :  { %v3944_v62 = vsel %vm481_vm9, %v3939_v9, %v3943_v33  ;;  %v3956_v40 = vsel %vm481_vm9, %v3951_v31, %v3955_v16  ;;  %4813 = vmatpush.bf16.msra.mxu2 %v7887_v55  ;;  %4827 = vmatpush.bf16.msra.mxu3 %v7900_v50  ;;  %v3998_v9 = vshrl.u32 %v10067_v51, 16  ;;  %v4007_v31 = vshrl.u32 %v10069_v52, 16 }
 0x460   :  { %4725 = vmatmul.bf16.gmra.mxu1 %v3944_v62  ;;  %4744 = vmatmul.bf16.gmra.mxu2 %v3956_v40  ;;  %v3967_v33 = vrot.slane %v10059_v61, 1  ;;  %v3970_v16 = vrot.slane %v10061_v20, 1  ;;  %v4001_v40 = vrot.slane %v3941_v63, 2  ;;  %v4010_v55 = vrot.slane %v3953_v57, 2  ;;  %v7894_v63 = vld [vmem:[#allocation14 + $0x200] sm:$0xff] }
 0x461   :  { %4794 = vmatpush.bf16.msra.mxu1 %v7879_v2  ;;  %4846 = vmatpush.bf16.msrb.mxu0 %v7908_v44  ;;  %v4000_v62 = vrot.slane %v3998_v9, 1  ;;  %v4009_v2 = vrot.slane %v4007_v31, 1  ;;  %v4004_v50 = vrot.slane %v3946_v23, 1  ;;  %v4005_v44 = vrot.slane %v3948_v53, 2 }
 0x462   :  { %v3969_v37 = vsel %vm190_vm2, %v3967_v33, %v3968_v56  ;;  %v3972_v26 = vsel %vm190_vm2, %v3970_v16, %v3971_v38  ;;  %v3997_v17 = vor.u32 %v3996_v8, %v3995_v24  ;;  %v4018_v23 = vrot.slane %v10026_v7, 2 }
 0x463   :  { %4814 = vmatpush.bf16.msra.mxu2 %v7886_v43  ;;  %4828 = vmatpush.bf16.msra.mxu3 %v7899_v49  ;;  %v4002_v11 = vor.u32 %v4001_v40, %v4000_v62  ;;  %v4011_v57 = vor.u32 %v4010_v55, %v4009_v2  ;;  %v4006_v25 = vor.u32 %v4005_v44, %v4004_v50  ;;  %v4021_v53 = vrot.slane %v10028_v59, 2 }
 0x464   :  { %v4020_v43 = vrot.slane %v10015_v14, 2  ;;  %v4024_v49 = vrot.slane %v10067_v51, 2  ;;  %v4026_v7 = vrot.slane %v10061_v20, 2 }
 0x465   :  { %4795 = vmatpush.bf16.msra.mxu1 %v7878_v41  ;;  %4847 = vmatpush.bf16.msrb.mxu0 %v7907_v3  ;;  %v4003_v19 = vsel %vm517_vm10, %v3997_v17, %v4002_v11  ;;  %v4012_v15 = vsel %vm517_vm10, %v4006_v25, %v4011_v57  ;;  %v4017_v41 = vrot.slane %v10013_v10, 2  ;;  %v4027_v3 = vrot.slane %v10069_v52, 2 }
 0x466   :  { %v4025_v59 = vsel %vm10636_vm3, %v4023_v47, %v4024_v49 }
 0x467   :  { %4829 = vmatpush.bf16.msra.mxu3 %v7898_v28  ;;  %v4028_v10 = vsel %vm10637_vm13, %v4026_v7, %v4027_v3 }
 0x468   :  { %4758 = vmatmul.bf16.vlgmr.msrb.gmra.mxu3 %v3963_v27  ;;  %4777 = vmatmul.bf16.vlgmr.msra.gmra.mxu0 %v3966_v42  ;;  %v4019_v27 = vsel %vm10634_vm6, %v4017_v41, %v4018_v23  ;;  %v4022_v42 = vsel %vm10635_vm15, %v4020_v43, %v4021_v53 }
 0x469   :  { %4848 = vmatpush.bf16.msrb.mxu0 %v7906_v45 }
 0x46b   :  { %4830 = vmatpush.bf16.msra.mxu3 %v7897_v4  ;;  %v4193_v4 = vperm.slane %v10148_v46, 4 }
 0x46d   :  { %4849 = vmatpush.bf16.msrb.mxu0 %v7905_v54 }
 0x46f   :  { %4831 = vmatpush.bf16.msra.mxu3 %v7896_v6 }
 0x470   :  { %4796 = vmatmul.bf16.vlgmr.msra.gmra.mxu1 %v3985_v13  ;;  %4815 = vmatmul.bf16.vlgmr.msra.gmra.mxu2 %v3994_v39 }
 0x471   :  { %4850 = vmatpush.bf16.msrb.mxu0 %v7904_v34 }
 0x473   :  { %4832 = vmatpush.bf16.msra.mxu3 %v7895_v36 }
 0x475   :  { %4851 = vmatpush.bf16.msrb.mxu0 %v7903_v58 }
 0x477   :  { %4833 = vmatpush.bf16.msra.mxu3 %v7894_v63 }
 0x478   :  { %4763 = vmatmul.bf16.gmra.mxu3 %v3969_v37  ;;  %4782 = vmatmul.bf16.gmra.mxu0 %v3972_v26 }
 0x479   :  { %4852 = vmatpush.bf16.msrb.mxu0 %v7902_v35 }
 0x480   :  { %4801 = vmatmul.bf16.gmra.mxu1 %v4003_v19  ;;  %4820 = vmatmul.bf16.gmra.mxu2 %v4012_v15 }
 0x488   :  { %4834 = vmatmul.bf16.vlgmr.msra.gmra.mxu3 %v4019_v27  ;;  %4853 = vmatmul.bf16.vlgmr.msrb.gmra.mxu0 %v4022_v42 }
 0x498   :  { %4839 = vmatmul.bf16.gmra.mxu3 %v4025_v59  ;;  %4858 = vmatmul.bf16.gmra.mxu0 %v4028_v10 }
 0x4c1   :  { %v4702_v14 = vpop.f32.mrf.mxu0 }
 0x4c7   :  { %v4683_v12 = vpop.f32.mrf.mxu3 }
 0x4c8   :  { %v4684_v13 = vadd.f32 %v4683_v12, %v4193_v4 }
 0x4c9   :  { %v4704_v5 = vpop.f32.mrf.mxu0  ;;  %v4721_v48 = vpop.f32.mrf.mxu1 }
 0x4ca   :  { %v4703_v56 = vadd.f32 %v4702_v14, %v4684_v13 }
 0x4cc   :  { %v4722_v9 = vadd.f32 %v4721_v48, %v4703_v56 }
 0x4cf   :  { %v4685_v22 = vpop.f32.mrf.mxu3  ;;  %v4740_v60 = vpop.f32.mrf.mxu2 }
 0x4d0   :  { %v4686_v31 = vadd.f32 %v4685_v22, %v4193_v4  ;;  %v4741_v33 = vadd.f32 %v4740_v60, %v4722_v9 }
 0x4d1   :  { %v4723_v28 = vpop.f32.mrf.mxu1 }
 0x4d2   :  { %v4705_v37 = vadd.f32 %v4704_v5, %v4686_v31 }
 0x4d4   :  { %v4724_v40 = vadd.f32 %v4723_v28, %v4705_v37 }
 0x4d5   :  { %v4707_v30 = vpop.f32.mrf.mxu0 }
 0x4d7   :  { %v4742_v61 = vpop.f32.mrf.mxu2 }
 0x4d8   :  { %v4743_v24 = vadd.f32 %v4742_v61, %v4724_v40 }
 0x4db   :  { %v4688_v51 = vpop.f32.mrf.mxu3 }
 0x4dc   :  { %v4689_v2 = vadd.f32 %v4688_v51, %v4193_v4 }
 0x4dd   :  { %v4709_v21 = vpop.f32.mrf.mxu0  ;;  %v4726_v1 = vpop.f32.mrf.mxu1 }
 0x4de   :  { %v4708_v8 = vadd.f32 %v4707_v30, %v4689_v2 }
 0x4e0   :  { %v4727_v57 = vadd.f32 %v4726_v1, %v4708_v8 }
 0x4e3   :  { %v4690_v52 = vpop.f32.mrf.mxu3  ;;  %v4745_v18 = vpop.f32.mrf.mxu2 }
 0x4e4   :  { %v4691_v23 = vadd.f32 %v4690_v52, %v4193_v4  ;;  %v4746_v53 = vadd.f32 %v4745_v18, %v4727_v57 }
 0x4e5   :  { %v4778_v45 = vpop.f32.mrf.mxu0  ;;  %v4728_v38 = vpop.f32.mrf.mxu1 }
 0x4e6   :  { %v4710_v49 = vadd.f32 %v4709_v21, %v4691_v23 }
 0x4e8   :  { %v4729_v12 = vadd.f32 %v4728_v38, %v4710_v49 }
 0x4eb   :  { %v4759_v20 = vpop.f32.mrf.mxu3  ;;  %v4747_v6 = vpop.f32.mrf.mxu2 }
 0x4ec   :  { %v4760_v26 = vadd.f32 %v4759_v20, %v4741_v33  ;;  %v4748_v48 = vadd.f32 %v4747_v6, %v4729_v12 }
 0x4ed   :  { %v4780_v29 = vpop.f32.mrf.mxu0  ;;  %v4797_v36 = vpop.f32.mrf.mxu1 }
 0x4ee   :  { %v4779_v55 = vadd.f32 %v4778_v45, %v4760_v26 }
 0x4f0   :  { %v4798_v50 = vadd.f32 %v4797_v36, %v4779_v55 }
 0x4f3   :  { %v4761_v54 = vpop.f32.mrf.mxu3  ;;  %v4816_v58 = vpop.f32.mrf.mxu2 }
 0x4f4   :  { %v4762_v44 = vadd.f32 %v4761_v54, %v4743_v24  ;;  %v4817_v35 = vadd.f32 %v4816_v58, %v4798_v50  ;;  %v7919_v24 = vld [vmem:[%s10566_s5 + $0x38] sm:$0xff] }
 0x4f5   :  { %v4783_v39 = vpop.f32.mrf.mxu0  ;;  %v4799_v25 = vpop.f32.mrf.mxu1  ;;  %5413 = vmatpush.bf16.msrb.mxu1 %v7919_v24 }
 0x4f6   :  { %v4781_v17 = vadd.f32 %v4780_v29, %v4762_v44 }
 0x4f8   :  { %v4800_v43 = vadd.f32 %v4799_v25, %v4781_v17 }
 0x4fb   :  { %v4764_v34 = vpop.f32.mrf.mxu3  ;;  %v4818_v19 = vpop.f32.mrf.mxu2 }
 0x4fc   :  { %v4765_v27 = vadd.f32 %v4764_v34, %v4746_v53  ;;  %v4819_v3 = vadd.f32 %v4818_v19, %v4800_v43  ;;  %v7935_v19 = vld [vmem:[%s10566_s5 + $0xb8] sm:$0xff] }
 0x4fd   :  { %v4785_v16 = vpop.f32.mrf.mxu0  ;;  %v4802_v5 = vpop.f32.mrf.mxu1  ;;  %5451 = vmatpush.bf16.msrb.mxu3 %v7935_v19  ;;  %v7923_v19 = vld [vmem:[%s10566_s5 + $0x58] sm:$0xff] }
 0x4fe   :  { %v4784_v10 = vadd.f32 %v4783_v39, %v4765_v27  ;;  %v7917_v27 = vld [vmem:[%s10566_s5 + $0x28] sm:$0xff] }
 0x500   :  { %v4803_v60 = vadd.f32 %v4802_v5, %v4784_v10 }
 0x503   :  { %v4766_v62 = vpop.f32.mrf.mxu3  ;;  %v4821_v22 = vpop.f32.mrf.mxu2 }
 0x504   :  { %v4767_v52 = vadd.f32 %v4766_v62, %v4748_v48  ;;  %v4822_v28 = vadd.f32 %v4821_v22, %v4803_v60  ;;  %v7934_v22 = vld [vmem:[%s10566_s5 + $0xb0] sm:$0xff]  ;;  %v10221_v48 = vld [vmem:[%s10566_s5 + $0xf8] sm:$0xff] }
 0x505   :  { %v4854_v63 = vpop.f32.mrf.mxu0  ;;  %v4804_v4 = vpop.f32.mrf.mxu1  ;;  %5452 = vmatpush.bf16.msrb.mxu3 %v7934_v22  ;;  %5470 = vmatpush.bf16.msra.mxu0 %v10221_v48  ;;  %v7951_v22 = vld [vmem:[%s10566_s5 + $0x138] sm:$0xff] }
 0x506   :  { %v4786_v1 = vadd.f32 %v4785_v16, %v4767_v52 }
 0x508   :  { %v4805_v56 = vadd.f32 %v4804_v4, %v4786_v1  ;;  %v10243_v4 = vld [vmem:[%s10566_s5 + $0xf0] sm:$0xff] }
 0x509   :  { %5471 = vmatpush.bf16.msra.mxu0 %v10243_v4 }
 0x50b   :  { %v4835_v11 = vpop.f32.mrf.mxu3  ;;  %v4823_v54 = vpop.f32.mrf.mxu2 }
 0x50c   :  { %v4836_v15 = vadd.f32 %v4835_v11, %v4817_v35  ;;  %v4824_v9 = vadd.f32 %v4823_v54, %v4805_v56  ;;  %v7918_v11 = vld [vmem:[%s10566_s5 + $0x30] sm:$0xff] }
 0x50d   :  { %v4856_v7 = vpop.f32.mrf.mxu0  ;;  %5414 = vmatpush.bf16.msrb.mxu1 %v7918_v11 }
 0x50e   :  { %v10151_v41 = vadd.f32 %v4854_v63, %v4836_v15 }
 0x510   :  { %v10154_v42 = vmin.f32 %v10151_v41, 0.0  ;;  %vm4864_vm7 = vcmp.gt.f32.partialorder %v10151_v41, 0.0 }
 0x511   :  { %5415 = vmatpush.bf16.msrb.mxu1 %v7917_v27  ;;  %v10302_v27 = vld [vmem:[%s10566_s5 + $0xd8] sm:$0xff] }
 0x512   :  { %v4872_v47 = vmul.f32 1.442695, %v10154_v42 }
 0x513   :  { %v4837_v59 = vpop.f32.mrf.mxu3 }
 0x514   :  { %8131 = vpow2.f32 %v4872_v47  ;;  %v4838_v14 = vadd.f32 %v4837_v59, %v4819_v3 }
 0x515   :  { %v4859_v20 = vpop.f32.mrf.mxu0 }
 0x516   :  { %v10157_v30 = vadd.f32 %v4856_v7, %v4838_v14  ;;  %v7927_v7 = vld [vmem:[%s10566_s5 + $0x78] sm:$0xff] }
 0x517   :  { %5432 = vmatpush.bf16.msrb.mxu2 %v7927_v7 }
 0x518   :  { %v10160_v51 = vmin.f32 %v10157_v30, 0.0 }
 0x51a   :  { %v10162_v21 = vpop.eup %8131  ;;  %v4874_v61 = vmul.f32 1.442695, %v10160_v51 }
 0x51b   :  { %8133 = vlog2.f32 %v10162_v21  ;;  %v4840_v45 = vpop.f32.mrf.mxu3  ;;  %v7362_v44 = vadd.f32 -1.0, %v10162_v21  ;;  %vm4880_vm5 = vcmp.eq.f32.partialorder %v10162_v21, 1.0  ;;  %vm4964_vm4 = vcmp.eq.f32.partialorder %v10162_v21, 0.0  ;;  %v7933_v21 = vld [vmem:[%s10566_s5 + $0xa8] sm:$0xff] }
 0x51c   :  { %8135 = vpow2.f32 %v4874_v61  ;;  %v4841_v29 = vadd.f32 %v4840_v45, %v4822_v28  ;;  %v7916_v28 = vld [vmem:[%s10566_s5 + $0x20] sm:$0xff]  ;;  %5453 = vmatpush.bf16.msrb.mxu3 %v7933_v21  ;;  %v7921_v21 = vld [vmem:[%s10566_s5 + $0x48] sm:$0xff] }
 0x51d   :  { %v4861_v16 = vpop.f32.mrf.mxu0  ;;  %v4888_v23 = vmul.f32 %v7362_v44, %v10154_v42  ;;  %5416 = vmatpush.bf16.msrb.mxu1 %v7916_v28  ;;  %v7929_v28 = vld [vmem:[%s10566_s5 + $0x88] sm:$0xff] }
 0x51e   :  { %v10166_v18 = vadd.f32 %v4859_v20, %v4841_v29 }
 0x520   :  { %v10169_v13 = vmin.f32 %v10166_v18, 0.0 }
 0x521   :  { %v8134_v39 = vpop.eup %8133 }
 0x522   :  { %v10171_v38 = vpop.eup %8135  ;;  %v4893_v6 = vmul.f32 0.6931472, %v8134_v39  ;;  %v4876_v34 = vmul.f32 1.442695, %v10169_v13  ;;  %v7915_v39 = vld [vmem:[%s10566_s5 + $0x18] sm:$0xff] }
 0x523   :  { %8137 = vlog2.f32 %v10171_v38  ;;  %v4842_v31 = vpop.f32.mrf.mxu3  ;;  %v7363_v14 = vadd.f32 -1.0, %v10171_v38  ;;  %5417 = vmatpush.bf16.msrb.mxu1 %v7915_v39  ;;  %vm4881_vm13 = vcmp.eq.f32.partialorder %v10171_v38, 1.0 }
 0x524   :  { %8139 = vrcp.f32 %v4893_v6  ;;  %v4843_v33 = vadd.f32 %v4842_v31, %v4824_v9  ;;  %v4911_v50 = vand.u32 2147483648, %v4893_v6  ;;  %v4909_v35 = vand.u32 2147483647, %v4893_v6  ;;  %v7925_v9 = vld [vmem:[%s10566_s5 + $0x68] sm:$0xff]  ;;  %v7932_v31 = vld [vmem:[%s10566_s5 + $0xa0] sm:$0xff] }
 0x525   :  { %8141 = vpow2.f32 %v4876_v34  ;;  %vm4905_vm11 = vweird.f32 %v4893_v6  ;;  %v4889_v54 = vmul.f32 %v7363_v14, %v10160_v51  ;;  %5454 = vmatpush.bf16.msrb.mxu3 %v7932_v31 }
 0x526   :  { %v10175_v37 = vadd.f32 %v4861_v16, %v4843_v33  ;;  %v4912_v25 = vor.u32 1.1754944e-38, %v4911_v50  ;;  %vm4910_vm8 = vcmp.eq.f32.partialorder %v4909_v35, 8.507059e+37  ;;  %v10259_v33 = vld [vmem:[%s10566_s5 + $0xe8] sm:$0xff]  ;;  %v7931_v35 = vld [vmem:[%s10566_s5 + $0x98] sm:$0xff] }
 0x527   :  { %5472 = vmatpush.bf16.msra.mxu0 %v10259_v33 }
 0x528   :  { %v10178_v36 = vmin.f32 %v10175_v37, 0.0 }
 0x529   :  { %v8138_v26 = vpop.eup %8137  ;;  %5455 = vmatpush.bf16.msrb.mxu3 %v7931_v35 }
 0x52a   :  { %v8140_v58 = vpop.eup %8139  ;;  %v10180_v62 = vmul.f32 0.6931472, %v8138_v26  ;;  %v4878_v55 = vmul.f32 1.442695, %v10178_v36 }
 0x52b   :  { %v10182_v40 = vpop.eup %8141  ;;  %v4901_v2 = vmul.f32 %v8140_v58, %v4893_v6  ;;  %vm4906_vm14 = vweird.f32 %v8140_v58 }
 0x52c   :  { %8143 = vrcp.f32 %v10180_v62  ;;  %vm4907_vm0 = vmor %vm4905_vm11, %vm4906_vm14  ;;  %v4924_v12 = vand.u32 2147483647, %v10180_v62  ;;  %v4926_v5 = vand.u32 2147483648, %v10180_v62  ;;  %vm4920_vm6 = vweird.f32 %v10180_v62 }
 0x52d   :  { %v4902_v8 = vsub.f32 1.0, %v4901_v2  ;;  %8145 = vlog2.f32 %v10182_v40  ;;  %vm4865_vm14 = vcmp.gt.f32.partialorder %v10157_v30, 0.0  ;;  %vm4965_vm11 = vcmp.eq.f32.partialorder %v10171_v38, 0.0 }
 0x52e   :  { %8147 = vpow2.f32 %v4878_v55  ;;  %v4927_v1 = vor.u32 1.1754944e-38, %v4926_v5  ;;  %vm4925_vm3 = vcmp.eq.f32.partialorder %v4924_v12, 8.507059e+37  ;;  %v7924_v55 = vld [vmem:[%s10566_s5 + $0x60] sm:$0xff]  ;;  %v7364_v44 = vadd.f32 -1.0, %v10182_v40  ;;  %v7922_v5 = vld [vmem:[%s10566_s5 + $0x50] sm:$0xff] }
 0x52f   :  { %v4903_v63 = vmul.f32 %v8140_v58, %v4902_v8 }
 0x531   :  { %v4904_v57 = vadd.f32 %v8140_v58, %v4903_v63 }
 0x532   :  { %v8144_v17 = vpop.eup %8143 }
 0x533   :  { %v8146_v15 = vpop.eup %8145  ;;  %v4908_v53 = vsel %vm4907_vm0, %v8140_v58, %v4904_v57  ;;  %v4916_v43 = vmul.f32 %v8144_v17, %v10180_v62  ;;  %vm4921_vm1 = vweird.f32 %v8144_v17  ;;  %v7914_v62 = vld [vmem:[%s10566_s5 + $0x10] sm:$0xff] }
 0x534   :  { %v10202_v49 = vpop.eup %8147  ;;  %v4913_v3 = vsel %vm4910_vm8, %v4912_v25, %v4908_v53  ;;  %v10204_v47 = vmul.f32 0.6931472, %v8146_v15  ;;  %vm4922_vm15 = vmor %vm4920_vm6, %vm4921_vm1  ;;  %5418 = vmatpush.bf16.msrb.mxu1 %v7914_v62  ;;  %vm4882_vm1 = vcmp.eq.f32.partialorder %v10182_v40, 1.0  ;;  %vm4866_vm6 = vcmp.gt.f32.partialorder %v10166_v18, 0.0 }
 0x535   :  { %v4914_v59 = vmul.f32 %v4913_v3, %v4888_v23  ;;  %v4917_v10 = vsub.f32 1.0, %v4916_v43  ;;  %v7930_v43 = vld [vmem:[%s10566_s5 + $0x90] sm:$0xff]  ;;  %v4890_v3 = vmul.f32 %v7364_v44, %v10169_v13 }
 0x536   :  { %8149 = vrcp.f32 %v10204_v47  ;;  %v4941_v63 = vand.u32 2147483648, %v10204_v47  ;;  %v4939_v57 = vand.u32 2147483647, %v10204_v47  ;;  %vm4935_vm8 = vweird.f32 %v10204_v47  ;;  %5456 = vmatpush.bf16.msrb.mxu3 %v7930_v43 }
 0x537   :  { %v4960_v60 = vsel %vm4880_vm5, %v10154_v42, %v4914_v59  ;;  %v4918_v52 = vmul.f32 %v8144_v17, %v4917_v10  ;;  %8151 = vlog2.f32 %v10202_v49  ;;  %v7926_v42 = vld [vmem:[%s10566_s5 + $0x70] sm:$0xff] }
 0x538   :  { %v4968_v61 = vsel %vm4964_vm4, -1.0, %v4960_v60  ;;  %5433 = vmatpush.bf16.msrb.mxu2 %v7926_v42  ;;  %v4942_v53 = vor.u32 1.1754944e-38, %v4941_v63  ;;  %vm4940_vm4 = vcmp.eq.f32.partialorder %v4939_v57, 8.507059e+37 }
 0x539   :  { %v4972_v45 = vsel %vm4864_vm7, %v10151_v41, %v4968_v61  ;;  %v4919_v20 = vadd.f32 %v8144_v17, %v4918_v52  ;;  %v10325_v61 = vld [vmem:[%s10566_s5 + $0xd0] sm:$0xff]  ;;  %vm4966_vm7 = vcmp.eq.f32.partialorder %v10182_v40, 0.0 }
 0x53a   :  { %v4976_v29 = vpack.c.bf16 %v4972_v45, %v4972_v45  ;;  %5457 = vmatpush.bf16.msrb.mxu3 %v7929_v28  ;;  %v7945_v28 = vld [vmem:[%s10566_s5 + $0x108] sm:$0xff] }
 0x53b   :  { %v4923_v41 = vsel %vm4922_vm15, %v8144_v17, %v4919_v20  ;;  %v7913_v17 = vld [vmem:[%s10566_s5 + $0x8] sm:$0xff] }
 0x53c   :  { %v8150_v56 = vpop.eup %8149  ;;  %v4984_v6 = vrot.slane %v4976_v29, 7  ;;  %v4928_v34 = vsel %vm4925_vm3, %v4927_v1, %v4923_v41  ;;  %5434 = vmatpush.bf16.msrb.mxu2 %v7925_v9  ;;  %5419 = vmatpush.bf16.msrb.mxu1 %v7913_v17  ;;  %v7365_v29 = vadd.f32 -1.0, %v10202_v49 }
 0x53d   :  { %v8152_v16 = vpop.eup %8151  ;;  %v4929_v26 = vmul.f32 %v4928_v34, %v4889_v54  ;;  %v4931_v58 = vmul.f32 %v8150_v56, %v10204_v47  ;;  %vm4936_vm0 = vweird.f32 %v8150_v56  ;;  %v7912_v47 = vld [vmem:[%s10566_s5] sm:$0xff]  ;;  %v10348_v34 = vld [vmem:[%s10566_s5 + $0xc8] sm:$0xff] }
 0x53e   :  { %5000 = vst [vmem:[#allocation7] sm:$0xe] %v4984_v6  ;;  %v10266_v2 = vmul.f32 0.6931472, %v8152_v16  ;;  %v4985_v23 = vrot.slane %v4984_v6, 4  ;;  %vm4937_vm5 = vmor %vm4935_vm8, %vm4936_vm0  ;;  %vm4883_vm0 = vcmp.eq.f32.partialorder %v10202_v49, 1.0 }
 0x53f   :  { %v4961_v24 = vsel %vm4881_vm13, %v10160_v51, %v4929_v26  ;;  %v4932_v8 = vsub.f32 1.0, %v4931_v58  ;;  %v10284_v51 = vld [vmem:[%s10566_s5 + $0xe0] sm:$0xff]  ;;  %v7949_v26 = vld [vmem:[%s10566_s5 + $0x128] sm:$0xff]  ;;  %v4891_v58 = vmul.f32 %v7365_v29, %v10178_v36  ;;  %vm4967_vm8 = vcmp.eq.f32.partialorder %v10202_v49, 0.0 }
 0x540   :  { %v4969_v50 = vsel %vm4965_vm11, -1.0, %v4961_v24  ;;  %8153 = vrcp.f32 %v10266_v2  ;;  %5435 = vmatpush.bf16.msrb.mxu2 %v7924_v55  ;;  %5473 = vmatpush.bf16.msra.mxu0 %v10284_v51  ;;  %v4956_v1 = vand.u32 2147483648, %v10266_v2  ;;  %v4954_v41 = vand.u32 2147483647, %v10266_v2 }
 0x541   :  { %v4973_v38 = vsel %vm4865_vm14, %v10157_v30, %v4969_v50  ;;  %v4933_v11 = vmul.f32 %v8150_v56, %v4932_v8  ;;  %5420 = vmatpush.bf16.msrb.mxu1 %v7912_v47  ;;  %vm4950_vm3 = vweird.f32 %v10266_v2  ;;  %v10364_v50 = vld [vmem:[%s10566_s5 + $0xc0] sm:$0xff]  ;;  %vm4867_vm11 = vcmp.gt.f32.partialorder %v10175_v37, 0.0  ;;  %v7947_v47 = vld [vmem:[%s10566_s5 + $0x118] sm:$0xff] }
 0x542   :  { %v4977_v25 = vpack.c.bf16 %v4973_v38, %v4973_v38  ;;  %v4957_v31 = vor.u32 1.1754944e-38, %v4956_v1  ;;  %vm4955_vm14 = vcmp.eq.f32.partialorder %v4954_v41, 8.507059e+37  ;;  %v7948_v38 = vld [vmem:[%s10566_s5 + $0x120] sm:$0xff] }
 0x543   :  { %v4934_v15 = vadd.f32 %v8150_v56, %v4933_v11 }
 0x544   :  { %v4986_v30 = vrot.slane %v4977_v25, 7  ;;  %5436 = vmatpush.bf16.msrb.mxu2 %v7923_v19  ;;  %5474 = vmatpush.bf16.msra.mxu0 %v10302_v27 }
 0x545   :  { %v4938_v7 = vsel %vm4937_vm5, %v8150_v56, %v4934_v15  ;;  %5489 = vmatpush.bf16.msra.mxu1 %v7951_v22  ;;  %v7928_v56 = vld [vmem:[%s10566_s5 + $0x80] sm:$0xff]  ;;  %vm10638_vm5 = vcmask 1045504  }
 0x546   :  { %v8154_v59 = vpop.eup %8153  ;;  %v4987_v10 = vsel %vm8718_vm12, %v4985_v23, %v4986_v30  ;;  %v4988_v14 = vrot.slane %v4986_v30, 4  ;;  %v4943_v12 = vsel %vm4940_vm4, %v4942_v53, %v4938_v7  ;;  %5458 = vmatpush.bf16.msrb.mxu3 %v7928_v56 }
 0x547   :  { %5001 = vst [vmem:[#allocation7 + $0x4] sm:$0xf] %v4987_v10  ;;  %v4944_v60 = vmul.f32 %v4943_v12, %v4890_v3  ;;  %v4946_v52 = vmul.f32 %v8154_v59, %v10266_v2  ;;  %vm4951_vm15 = vweird.f32 %v8154_v59 }
 0x548   :  { %5002 = vst [vmem:[#allocation7 + $0x8] sm:$0x1] %v4988_v14  ;;  %5437 = vmatpush.bf16.msrb.mxu2 %v7922_v5  ;;  %5475 = vmatpush.bf16.msra.mxu0 %v10325_v61  ;;  %vm4952_vm13 = vmor %vm4950_vm3, %vm4951_vm15 }
 0x549   :  { %v4962_v42 = vsel %vm4882_vm1, %v10169_v13, %v4944_v60  ;;  %v4947_v45 = vsub.f32 1.0, %v4946_v52  ;;  %v7950_v13 = vld [vmem:[%s10566_s5 + $0x130] sm:$0xff] }
 0x54a   :  { %v4970_v20 = vsel %vm4966_vm7, -1.0, %v4962_v42  ;;  %5490 = vmatpush.bf16.msra.mxu1 %v7950_v13  ;;  %7964 = vmatpush.bf16.msra.mxu3 %v7951_v22  ;;  %v7946_v52 = vld [vmem:[%s10566_s5 + $0x110] sm:$0xff] }
 0x54b   :  { %v4974_v40 = vsel %vm4866_vm6, %v10166_v18, %v4970_v20  ;;  %v4948_v54 = vmul.f32 %v8154_v59, %v4947_v45  ;;  %v7920_v18 = vld [vmem:[%s10566_s5 + $0x40] sm:$0xff] }
 0x54c   :  { %v4978_v39 = vpack.c.bf16 %v4974_v40, %v4974_v40  ;;  %5438 = vmatpush.bf16.msrb.mxu2 %v7921_v21  ;;  %5476 = vmatpush.bf16.msra.mxu0 %v10348_v34  ;;  %v7944_v45 = vld [vmem:[%s10566_s5 + $0x100] sm:$0xff] }
 0x54d   :  { %v4949_v6 = vadd.f32 %v8154_v59, %v4948_v54 }
 0x54e   :  { %v4989_v9 = vrot.slane %v4978_v39, 7  ;;  %v10353_v16 = vld [vmem:[#allocation7] sm:$0xff]  ;;  %5491 = vmatpush.bf16.msra.mxu1 %v7949_v26  ;;  %7965 = vmatpush.bf16.msra.mxu3 %v7950_v13 }
 0x54f   :  { %v4953_v62 = vsel %vm4952_vm13, %v8154_v59, %v4949_v6  ;;  %v5008_v2 = vld [vmem:[#allocation7 + $0x8] sm:$0x3]  ;;  %5421 = vmatmul.bf16.vlgmr.msrb.gmra.mxu1 %v10353_v16  ;;  %v5031_v44 = vshrl.u32 %v10353_v16, 16  ;;  %v5033_v63 = vshll.u32 %v10353_v16, 16  ;;  %v5056_v57 = vrot.slane %v10353_v16, 1 }
 0x550   :  { %5003 = vst [vmem:[#allocation7 + $0xc] sm:$0xe] %v4989_v9  ;;  %v4958_v55 = vsel %vm4955_vm14, %v4957_v31, %v4953_v62  ;;  %v5026_v24 = vunpack.c.l.b16 %v5008_v2  ;;  %5439 = vmatpush.bf16.msrb.mxu2 %v7920_v18  ;;  %5477 = vmatpush.bf16.msra.mxu0 %v10364_v50  ;;  %v5084_v18 = vrot.slane %v10353_v16, 2 }
 0x551   :  { %v4959_v8 = vmul.f32 %v4958_v55, %v4891_v58  ;;  %v5035_v17 = vrot.slane %v5033_v63, 1  ;;  %v5065_v43 = vrot.slane %v5033_v63, 2 }
 0x552   :  { %v10370_v35 = vpack.c.b16 %v5026_v24, %v5026_v24  ;;  %5492 = vmatpush.bf16.msra.mxu1 %v7948_v38  ;;  %7966 = vmatpush.bf16.msra.mxu3 %v7949_v26 }
 0x553   :  { %v4963_v11 = vsel %vm4883_vm0, %v10178_v36, %v4959_v8  ;;  %v5036_v53 = vor.u32 %v5035_v17, %v5031_v44  ;;  %v5064_v36 = vrot.slane %v5031_v44, 1 }
 0x554   :  { %7956 = vmatpush.bf16.msra.mxu2 %v10221_v48  ;;  %v4971_v25 = vsel %vm4967_vm8, -1.0, %v4963_v11  ;;  %v5057_v19 = vrot.slane %v10370_v35, 1  ;;  %v5038_v15 = vshll.u32 %v10370_v35, 16  ;;  %v5067_v23 = vshrl.u32 %v10370_v35, 16 }
 0x555   :  { %v4975_v30 = vsel %vm4867_vm11, %v10175_v37, %v4971_v25  ;;  %v4990_v37 = vrot.slane %v4989_v9, 4  ;;  %v5066_v12 = vor.u32 %v5065_v43, %v5064_v36  ;;  %v5085_v6 = vrot.slane %v10370_v35, 2 }
 0x556   :  { %v4979_v49 = vpack.c.bf16 %v4975_v30, %v4975_v30  ;;  %v5058_v3 = vsel %vm190_vm2, %v5056_v57, %v5057_v19  ;;  %v5040_v7 = vrot.slane %v5038_v15, 1  ;;  %v5069_v48 = vrot.slane %v5067_v23, 1  ;;  %5493 = vmatpush.bf16.msra.mxu1 %v7947_v47  ;;  %7967 = vmatpush.bf16.msra.mxu3 %v7948_v38 }
 0x557   :  { %5459 = vmatmul.bf16.vlgmr.msrb.gmra.mxu3 %v5058_v3  ;;  %v5070_v59 = vrot.slane %v5038_v15, 2  ;;  %v5086_v9 = vsel %vm10638_vm5, %v5084_v18, %v5085_v6  ;;  %v5172_v11 = vperm.slane %v10148_v46, 5 }
 0x558   :  { %7957 = vmatpush.bf16.msra.mxu2 %v10243_v4  ;;  %v4991_v10 = vrot.slane %v4979_v49, 7  ;;  %v5041_v14 = vsel %vm481_vm9, %v5036_v53, %v5040_v7 }
 0x559   :  { %5440 = vmatmul.bf16.vlgmr.msrb.gmra.mxu2 %v5041_v14  ;;  %v5071_v5 = vor.u32 %v5070_v59, %v5069_v48 }
 0x55a   :  { %v4992_v22 = vsel %vm8718_vm12, %v4990_v37, %v4991_v10  ;;  %v4993_v60 = vrot.slane %v4991_v10, 4  ;;  %5494 = vmatpush.bf16.msra.mxu1 %v7946_v52  ;;  %7968 = vmatpush.bf16.msra.mxu3 %v7947_v47 }
 0x55b   :  { %5004 = vst [vmem:[#allocation7 + $0x10] sm:$0xf] %v4992_v22  ;;  %v5072_v4 = vsel %vm517_vm10, %v5066_v12, %v5071_v5 }
 0x55c   :  { %7958 = vmatpush.bf16.msra.mxu2 %v10259_v33  ;;  %5005 = vst [vmem:[#allocation7 + $0x14] sm:$0x1] %v4993_v60  ;;  %5478 = vmatmul.bf16.vlgmr.msra.gmra.mxu0 %v5072_v4 }
 0x55e   :  { %5495 = vmatpush.bf16.msra.mxu1 %v7945_v28  ;;  %7969 = vmatpush.bf16.msra.mxu3 %v7946_v52 }
 0x560   :  { %7959 = vmatpush.bf16.msra.mxu2 %v10284_v51 }
 0x562   :  { %v7911_v42 = vld [vmem:[#allocation7 + $0xc] sm:$0xff]  ;;  %5496 = vmatpush.bf16.msra.mxu1 %v7944_v45  ;;  %7970 = vmatpush.bf16.msra.mxu3 %v7945_v28 }
 0x563   :  { %v5011_v20 = vld [vmem:[#allocation7 + $0x14] sm:$0x3]  ;;  %5426 = vmatmul.bf16.gmra.mxu1 %v7911_v42  ;;  %v5045_v29 = vshll.u32 %v7911_v42, 16  ;;  %v5059_v51 = vrot.slane %v7911_v42, 1  ;;  %v5043_v40 = vshrl.u32 %v7911_v42, 16 }
 0x564   :  { %7960 = vmatpush.bf16.msra.mxu2 %v10302_v27  ;;  %v5027_v33 = vunpack.c.l.b16 %v5011_v20 }
 0x565   :  { %v5047_v21 = vrot.slane %v5045_v29, 1  ;;  %v5073_v58 = vrot.slane %v5043_v40, 1  ;;  %v5074_v2 = vrot.slane %v5045_v29, 2 }
 0x566   :  { %v5029_v1 = vpack.c.b16 %v5027_v33, %v5027_v33  ;;  %7971 = vmatpush.bf16.msra.mxu3 %v7944_v45 }
 0x567   :  { %v5048_v39 = vor.u32 %v5047_v21, %v5043_v40  ;;  %v5075_v8 = vor.u32 %v5074_v2, %v5073_v58 }
 0x568   :  { %7961 = vmatpush.bf16.msra.mxu2 %v10325_v61  ;;  %v5060_v13 = vrot.slane %v5029_v1, 1  ;;  %v5050_v54 = vshll.u32 %v5029_v1, 16  ;;  %v5076_v61 = vshrl.u32 %v5029_v1, 16  ;;  %v5088_v62 = vrot.slane %v5029_v1, 2 }
 0x56a   :  { %v5061_v41 = vsel %vm190_vm2, %v5059_v51, %v5060_v13  ;;  %v5052_v56 = vrot.slane %v5050_v54, 1  ;;  %v5079_v31 = vrot.slane %v5050_v54, 2  ;;  %v5078_v26 = vrot.slane %v5076_v61, 1 }
 0x56b   :  { %5464 = vmatmul.bf16.gmra.mxu3 %v5061_v41 }
 0x56c   :  { %7962 = vmatpush.bf16.msra.mxu2 %v10348_v34  ;;  %v5053_v27 = vsel %vm481_vm9, %v5048_v39, %v5052_v56  ;;  %v5087_v34 = vrot.slane %v7911_v42, 2  ;;  %v5080_v55 = vor.u32 %v5079_v31, %v5078_v26  ;;  %vm10639_vm9 = vmmov %vm10638_vm5  ;;  %vm10640_vm5 = vcmask 519169  }
 0x56d   :  { %5445 = vmatmul.bf16.gmra.mxu2 %v5053_v27 }
 0x56e   :  { %v5089_v24 = vsel %vm10639_vm9, %v5087_v34, %v5088_v62  ;;  %v5081_v44 = vsel %vm517_vm10, %v5075_v8, %v5080_v55  ;;  %vm119_vm10 = vcmask 517120  }
 0x56f   :  { %120 = vst.msk [vmem:[#allocation8 + $0x8] sm:$0x3] %vm119_vm10, %v8293_v0 }
 0x570   :  { %7963 = vmatpush.bf16.msra.mxu2 %v10364_v50  ;;  %123 = vst.msk [vmem:[#allocation8 + $0x14] sm:$0x3] %vm119_vm10, %v8293_v0 }
 0x573   :  { %5497 = vmatmul.bf16.vlgmr.msra.gmra.mxu1 %v5086_v9 }
 0x57b   :  { %5502 = vmatmul.bf16.vlgmr.msra.gmra.mxu3 %v5089_v24 }
 0x57d   :  { %5483 = vmatmul.bf16.vlgmr.msra.gmra.mxu2 %v5081_v44 }
 0x5cc   :  { %v5422_v50 = vpop.f32.mrf.mxu1 }
 0x5cd   :  { %v5423_v17 = vadd.f32 %v5422_v50, %v5172_v11 }
 0x5d4   :  { %v5424_v63 = vpop.f32.mrf.mxu1 }
 0x5d5   :  { %v5425_v53 = vadd.f32 %v5424_v63, %v5172_v11 }
 0x5d9   :  { %v5479_v30 = vpop.f32.mrf.mxu0 }
 0x5da   :  { %v5460_v16 = vpop.f32.mrf.mxu3 }
 0x5dc   :  { %v5441_v35 = vpop.f32.mrf.mxu2 }
 0x5dd   :  { %v5442_v19 = vadd.f32 %v5441_v35, %v5423_v17 }
 0x5df   :  { %v5461_v23 = vadd.f32 %v5460_v16, %v5442_v19 }
 0x5e0   :  { %v5427_v38 = vpop.f32.mrf.mxu1 }
 0x5e1   :  { %v5480_v3 = vadd.f32 %v5479_v30, %v5461_v23  ;;  %v5481_v10 = vpop.f32.mrf.mxu0  ;;  %v5428_v5 = vadd.f32 %v5427_v38, %v5172_v11 }
 0x5e2   :  { %v5462_v57 = vpop.f32.mrf.mxu3 }
 0x5e4   :  { %v5443_v25 = vpop.f32.mrf.mxu2 }
 0x5e5   :  { %v5444_v43 = vadd.f32 %v5443_v25, %v5425_v53 }
 0x5e7   :  { %v5463_v47 = vadd.f32 %v5462_v57, %v5444_v43 }
 0x5e8   :  { %v5429_v15 = vpop.f32.mrf.mxu1 }
 0x5e9   :  { %v5482_v12 = vadd.f32 %v5481_v10, %v5463_v47  ;;  %v5430_v29 = vadd.f32 %v5429_v15, %v5172_v11 }
 0x5ee   :  { %v5465_v36 = vpop.f32.mrf.mxu3 }
 0x5f0   :  { %v5446_v49 = vpop.f32.mrf.mxu2  ;;  %v5498_v7 = vpop.f32.mrf.mxu1 }
 0x5f1   :  { %v10416_v48 = vadd.f32 %v5498_v7, %v5480_v3  ;;  %v5447_v52 = vadd.f32 %v5446_v49, %v5428_v5 }
 0x5f3   :  { %v10419_v59 = vmin.f32 %v10416_v48, 0.0  ;;  %v5466_v45 = vadd.f32 %v5465_v36, %v5447_v52  ;;  %vm5508_vm14 = vcmp.gt.f32.partialorder %v10416_v48, 0.0 }
 0x5f5   :  { %v5516_v46 = vmul.f32 1.442695, %v10419_v59 }
 0x5f6   :  { %v5467_v37 = vpop.f32.mrf.mxu3 }
 0x5f7   :  { %8155 = vpow2.f32 %v5516_v46 }
 0x5f8   :  { %v5448_v14 = vpop.f32.mrf.mxu2  ;;  %v5500_v22 = vpop.f32.mrf.mxu1 }
 0x5f9   :  { %v10422_v60 = vadd.f32 %v5500_v22, %v5482_v12  ;;  %v5449_v21 = vadd.f32 %v5448_v14, %v5430_v29 }
 0x5fb   :  { %v10425_v4 = vmin.f32 %v10422_v60, 0.0  ;;  %v5468_v39 = vadd.f32 %v5467_v37, %v5449_v21 }
 0x5fd   :  { %v10427_v28 = vpop.eup %8155  ;;  %v5518_v42 = vmul.f32 1.442695, %v10425_v4 }
 0x5fe   :  { %8157 = vlog2.f32 %v10427_v28  ;;  %v5503_v20 = vpop.f32.mrf.mxu3  ;;  %v7534_v55 = vadd.f32 -1.0, %v10427_v28  ;;  %vm5524_vm15 = vcmp.eq.f32.partialorder %v10427_v28, 1.0  ;;  %vm5608_vm3 = vcmp.eq.f32.partialorder %v10427_v28, 0.0 }
 0x5ff   :  { %8159 = vpow2.f32 %v5518_v42 }
 0x600   :  { %v5484_v33 = vpop.f32.mrf.mxu2  ;;  %v5532_v38 = vmul.f32 %v7534_v55, %v10419_v59 }
 0x601   :  { %v5485_v1 = vadd.f32 %v5484_v33, %v5466_v45 }
 0x603   :  { %v10432_v51 = vadd.f32 %v5503_v20, %v5485_v1 }
 0x604   :  { %v8158_v13 = vpop.eup %8157 }
 0x605   :  { %v10436_v40 = vmin.f32 %v10432_v51, 0.0  ;;  %v10438_v54 = vpop.eup %8159  ;;  %v5537_v41 = vmul.f32 0.6931472, %v8158_v13 }
 0x606   :  { %8161 = vlog2.f32 %v10438_v54  ;;  %v5505_v61 = vpop.f32.mrf.mxu3  ;;  %v7535_v23 = vadd.f32 -1.0, %v10438_v54  ;;  %vm5525_vm9 = vcmp.eq.f32.partialorder %v10438_v54, 1.0  ;;  %vm5609_vm10 = vcmp.eq.f32.partialorder %v10438_v54, 0.0 }
 0x607   :  { %8163 = vrcp.f32 %v5537_v41  ;;  %v5520_v27 = vmul.f32 1.442695, %v10436_v40  ;;  %v5555_v24 = vand.u32 2147483648, %v5537_v41  ;;  %v5553_v44 = vand.u32 2147483647, %v5537_v41 }
 0x608   :  { %v5486_v56 = vpop.f32.mrf.mxu2  ;;  %vm5549_vm1 = vweird.f32 %v5537_v41  ;;  %v5533_v14 = vmul.f32 %v7535_v23, %v10425_v4 }
 0x609   :  { %v5487_v6 = vadd.f32 %v5486_v56, %v5468_v39  ;;  %8165 = vpow2.f32 %v5520_v27  ;;  %v5556_v16 = vor.u32 1.1754944e-38, %v5555_v24  ;;  %vm5554_vm6 = vcmp.eq.f32.partialorder %v5553_v44, 8.507059e+37 }
 0x60b   :  { %v10442_v18 = vadd.f32 %v5505_v61, %v5487_v6 }
 0x60c   :  { %v8162_v0 = vpop.eup %8161 }
 0x60d   :  { %v10445_v9 = vmin.f32 %v10442_v18, 0.0  ;;  %v8164_v31 = vpop.eup %8163  ;;  %v5539_v26 = vmul.f32 0.6931472, %v8162_v0 }
 0x60e   :  { %v5545_v58 = vmul.f32 %v8164_v31, %v5537_v41  ;;  %vm5550_vm4 = vweird.f32 %v8164_v31 }
 0x60f   :  { %v5522_v62 = vmul.f32 1.442695, %v10445_v9  ;;  %8167 = vrcp.f32 %v5539_v26  ;;  %v10448_v2 = vpop.eup %8165  ;;  %vm5551_vm7 = vmor %vm5549_vm1, %vm5550_vm4  ;;  %v5570_v30 = vand.u32 2147483648, %v5539_v26  ;;  %v5568_v49 = vand.u32 2147483647, %v5539_v26 }
 0x610   :  { %v5546_v34 = vsub.f32 1.0, %v5545_v58  ;;  %vm5564_vm11 = vweird.f32 %v5539_v26  ;;  %vm5509_vm4 = vcmp.gt.f32.partialorder %v10422_v60, 0.0  ;;  %v7536_v33 = vadd.f32 -1.0, %v10448_v2 }
 0x611   :  { %8169 = vpow2.f32 %v5522_v62  ;;  %v5571_v10 = vor.u32 1.1754944e-38, %v5570_v30  ;;  %vm5569_vm8 = vcmp.eq.f32.partialorder %v5568_v49, 8.507059e+37 }
 0x612   :  { %v5547_v8 = vmul.f32 %v8164_v31, %v5546_v34  ;;  %8171 = vlog2.f32 %v10448_v2  ;;  %v5534_v54 = vmul.f32 %v7536_v33, %v10436_v40 }
 0x614   :  { %v5548_v50 = vadd.f32 %v8164_v31, %v5547_v8 }
 0x615   :  { %v8168_v63 = vpop.eup %8167 }
 0x616   :  { %v5552_v11 = vsel %vm5551_vm7, %v8164_v31, %v5548_v50  ;;  %v5560_v57 = vmul.f32 %v8168_v63, %v5539_v26  ;;  %vm5565_vm13 = vweird.f32 %v8168_v63  ;;  %v133_v50 = vld [vmem:[%s10567_s6 + $0x8] sm:$0x1f] }
 0x617   :  { %v10452_v35 = vpop.eup %8169  ;;  %v5557_v17 = vsel %vm5554_vm6, %v5556_v16, %v5552_v11  ;;  %vm5566_vm0 = vmor %vm5564_vm11, %vm5565_vm13  ;;  %vm10642_vm13 = vcmask 516096   ;;  %vm5510_vm11 = vcmp.gt.f32.partialorder %v10432_v51, 0.0  ;;  %v10491_v30 = vperm.slane %v133_v50, 2 }
 0x618   :  { %8173 = vlog2.f32 %v10452_v35  ;;  %v8172_v25 = vpop.eup %8171  ;;  %v5558_v19 = vmul.f32 %v5557_v17, %v5532_v38  ;;  %v5561_v15 = vsub.f32 1.0, %v5560_v57  ;;  %v7537_v58 = vadd.f32 -1.0, %v10452_v35 }
 0x619   :  { %v5541_v53 = vmul.f32 0.6931472, %v8172_v25 }
 0x61a   :  { %v5604_v36 = vsel %vm5524_vm15, %v10419_v59, %v5558_v19  ;;  %v5562_v43 = vmul.f32 %v8168_v63, %v5561_v15  ;;  %vm10641_vm15 = vcmask 519168   ;;  %v5535_v11 = vmul.f32 %v7537_v58, %v10445_v9 }
 0x61b   :  { %v5612_v3 = vsel %vm5608_vm3, -1.0, %v5604_v36  ;;  %8175 = vrcp.f32 %v5541_v53  ;;  %v5585_v21 = vand.u32 2147483648, %v5541_v53  ;;  %v5583_v39 = vand.u32 2147483647, %v5541_v53 }
 0x61c   :  { %v5616_v7 = vsel %vm5508_vm14, %v10416_v48, %v5612_v3  ;;  %v5563_v47 = vadd.f32 %v8168_v63, %v5562_v43  ;;  %vm5579_vm7 = vweird.f32 %v5541_v53  ;;  %v10486_v19 = vperm.slane %v133_v50, 0 }
 0x61d   :  { %v5620_v37 = vpack.c.bf16 %v5616_v7, %v5616_v7  ;;  %v5586_v0 = vor.u32 1.1754944e-38, %v5585_v21  ;;  %vm5584_vm3 = vcmp.eq.f32.partialorder %v5583_v39, 8.507059e+37  ;;  %v10488_v15 = vperm.slane %v133_v50, 1 }
 0x61e   :  { %v8174_v46 = vpop.eup %8173  ;;  %v5567_v12 = vsel %vm5566_vm0, %v8168_v63, %v5563_v47  ;;  %vm5526_vm0 = vcmp.eq.f32.partialorder %v10448_v2, 1.0  ;;  %v10494_v43 = vperm.slane %v133_v50, 3  ;;  %v10497_v7 = vperm.slane %v133_v50, 4 }
 0x61f   :  { %v5543_v59 = vmul.f32 0.6931472, %v8174_v46  ;;  %v5628_v5 = vrot.slane %v5620_v37, 7  ;;  %v5572_v22 = vsel %vm5569_vm8, %v5571_v10, %v5567_v12 }
 0x620   :  { %v5573_v52 = vmul.f32 %v5572_v22, %v5533_v14 }
 0x621   :  { %8177 = vrcp.f32 %v5543_v59  ;;  %v8176_v28 = vpop.eup %8175  ;;  %5644 = vst.msk [vmem:[#allocation8] sm:$0xe] %vm10640_vm5, %v5628_v5  ;;  %v5629_v56 = vrot.slane %v5628_v5, 4  ;;  %v5600_v62 = vand.u32 2147483648, %v5543_v59  ;;  %v5598_v24 = vand.u32 2147483647, %v5543_v59 }
 0x622   :  { %v5605_v48 = vsel %vm5525_vm9, %v10425_v4, %v5573_v52  ;;  %v5575_v42 = vmul.f32 %v8176_v28, %v5541_v53  ;;  %vm5580_vm1 = vweird.f32 %v8176_v28  ;;  %vm5594_vm8 = vweird.f32 %v5543_v59 }
 0x623   :  { %v5613_v45 = vsel %vm5609_vm10, -1.0, %v5605_v48  ;;  %vm5581_vm6 = vmor %vm5579_vm7, %vm5580_vm1  ;;  %vm5610_vm5 = vcmp.eq.f32.partialorder %v10448_v2, 0.0  ;;  %vm5511_vm9 = vcmp.gt.f32.partialorder %v10442_v18, 0.0  ;;  %v5601_v16 = vor.u32 1.1754944e-38, %v5600_v62 }
 0x624   :  { %v5617_v20 = vsel %vm5509_vm4, %v10422_v60, %v5613_v45  ;;  %v5576_v29 = vsub.f32 1.0, %v5575_v42  ;;  %vm5599_vm4 = vcmp.eq.f32.partialorder %v5598_v24, 8.507059e+37  ;;  %vm5527_vm1 = vcmp.eq.f32.partialorder %v10452_v35, 1.0 }
 0x625   :  { %v5621_v1 = vpack.c.bf16 %v5617_v20, %v5617_v20  ;;  %vm5611_vm7 = vcmp.eq.f32.partialorder %v10452_v35, 0.0 }
 0x626   :  { %v5577_v41 = vmul.f32 %v8176_v28, %v5576_v29 }
 0x627   :  { %v8178_v13 = vpop.eup %8177  ;;  %v5630_v27 = vrot.slane %v5621_v1, 7 }
 0x628   :  { %v5590_v4 = vmul.f32 %v8178_v13, %v5543_v59  ;;  %v5578_v6 = vadd.f32 %v8176_v28, %v5577_v41  ;;  %vm5595_vm14 = vweird.f32 %v8178_v13 }
 0x629   :  { %v5631_v61 = vsel %vm8718_vm12, %v5629_v56, %v5630_v27  ;;  %v5632_v60 = vrot.slane %v5630_v27, 4  ;;  %vm5596_vm10 = vmor %vm5594_vm8, %vm5595_vm14  ;;  %vm10646_vm14 = vcmask 1044480  }
 0x62a   :  { %v5591_v31 = vsub.f32 1.0, %v5590_v4  ;;  %5645 = vst.msk [vmem:[#allocation8 + $0x4] sm:$0xf] %vm10641_vm15, %v5631_v61  ;;  %v5582_v26 = vsel %vm5581_vm6, %v8176_v28, %v5578_v6  ;;  %vm10643_vm6 = vcmask 519169   ;;  %vm10644_vm15 = vcmask 1045504   ;;  %vm10649_vm8 = vmmov %vm10646_vm14 }
 0x62b   :  { %5646 = vst.msk [vmem:[#allocation8 + $0x8] sm:$0x1] %vm10642_vm13, %v5632_v60  ;;  %v5587_v34 = vsel %vm5584_vm3, %v5586_v0, %v5582_v26  ;;  %vm10645_vm3 = vcmask 519168   ;;  %v5805_v26 = vrot.slane %v8183_v32, 6 }
 0x62c   :  { %v5592_v55 = vmul.f32 %v8178_v13, %v5591_v31  ;;  %v5588_v8 = vmul.f32 %v5587_v34, %v5534_v54 }
 0x62d   :  { %7972 = vpush %v5805_v26 }
 0x62e   :  { %v5593_v44 = vadd.f32 %v8178_v13, %v5592_v55  ;;  %v5606_v63 = vsel %vm5526_vm0, %v10436_v40, %v5588_v8  ;;  %vm10648_vm0 = vmmov %vm10644_vm15 }
 0x62f   :  { %v5614_v38 = vsel %vm5610_vm5, -1.0, %v5606_v63 }
 0x630   :  { %v5597_v57 = vsel %vm5596_vm10, %v8178_v13, %v5593_v44  ;;  %v5618_v17 = vsel %vm5510_vm11, %v10432_v51, %v5614_v38  ;;  %vm5791_vm11 = vcmask 523264   ;;  %vm10652_vm10 = vmmov %vm10649_vm8 }
 0x631   :  { %v5602_v25 = vsel %vm5599_vm4, %v5601_v16, %v5597_v57  ;;  %v5622_v23 = vpack.c.bf16 %v5618_v17, %v5618_v17  ;;  %v7953_v2 = vld [vmem:[#allocation8] sm:$0xff]  }
 0x632   :  { %v5603_v40 = vmul.f32 %v5602_v25, %v5535_v11  ;;  %v7954_v53 = vunpack.c.l.bf16 %v7953_v2  ;;  %v7955_v36 = vunpack.c.h.bf16 %v7953_v2  ;;  %v5652_v49 = vld [vmem:[#allocation8 + $0x8] sm:$0x3] }
 0x633   :  { %v5633_v51 = vrot.slane %v5622_v23, 7  ;;  %v5658_v47 = vunpack.c.l.bf16 %v5652_v49 }
 0x634   :  { %v5607_v3 = vsel %vm5527_vm1, %v10445_v9, %v5603_v40  ;;  %v5663_v37 = vmul.f32 %v7954_v53, %v10486_v19  ;;  %v5668_v10 = vmul.f32 %v7954_v53, %v10488_v15  ;;  %v5669_v14 = vmul.f32 %v7955_v36, %v10488_v15  ;;  %vm10654_vm1 = vmmov %vm10648_vm0 }
 0x635   :  { %v5615_v46 = vsel %vm5611_vm7, -1.0, %v5607_v3  ;;  %v5634_v12 = vrot.slane %v5633_v51, 4  ;;  %5647 = vst.msk [vmem:[#allocation8 + $0xc] sm:$0xe] %vm10643_vm6, %v5633_v51  ;;  %v5699_v59 = vmul.f32 %v7954_v53, %v10491_v30  ;;  %v5700_v9 = vmul.f32 %v7955_v36, %v10491_v30  ;;  %vm10655_vm7 = vmmov %vm10649_vm8 }
 0x636   :  { %v5619_v35 = vsel %vm5511_vm9, %v10442_v18, %v5615_v46  ;;  %v5680_v22 = vrot.slane %v5668_v10, 1  ;;  %v5681_v52 = vrot.slane %v5669_v14, 1  ;;  %v5730_v28 = vmul.f32 %v7954_v53, %v10494_v43  ;;  %vm10651_vm9 = vmmov %vm10648_vm0 }
 0x637   :  { %v5623_v5 = vpack.c.bf16 %v5619_v35, %v5619_v35  ;;  %v5711_v48 = vrot.slane %v5699_v59, 2  ;;  %v5712_v42 = vrot.slane %v5700_v9, 2  ;;  %v5731_v45 = vmul.f32 %v7955_v36, %v10494_v43 }
 0x638   :  { %v5761_v20 = vmul.f32 %v7954_v53, %v10497_v7  ;;  %v5682_v29 = vsel %vm190_vm2, %v5680_v22, %v5681_v52  ;;  %v5742_v1 = vrot.slane %v5730_v28, 3  ;;  %v5762_v18 = vmul.f32 %v7955_v36, %v10497_v7 }
 0x639   :  { %v5635_v33 = vrot.slane %v5623_v5, 7  ;;  %v5694_v21 = vadd.f32 %v5682_v29, %v5663_v37  ;;  %v5713_v13 = vsel %vm10644_vm15, %v5711_v48, %v5712_v42  ;;  %v5743_v41 = vrot.slane %v5731_v45, 3 }
 0x63a   :  { %v5773_v27 = vrot.slane %v5761_v20, 4  ;;  %v5774_v4 = vrot.slane %v5762_v18, 4  ;;  %v5670_v6 = vmul.f32 %v10488_v15, %v5658_v47  ;;  %v5701_v61 = vmul.f32 %v10491_v30, %v5658_v47 }
 0x63b   :  { %v5636_v39 = vsel %vm8718_vm12, %v5634_v12, %v5635_v33  ;;  %v5637_v56 = vrot.slane %v5635_v33, 4  ;;  %v5725_v54 = vadd.f32 %v5713_v13, %v5694_v21  ;;  %v5744_v60 = vsel %vm10646_vm14, %v5742_v1, %v5743_v41 }
 0x63c   :  { %5648 = vst.msk [vmem:[#allocation8 + $0x10] sm:$0xf] %vm10645_vm3, %v5636_v39  ;;  %v5732_v0 = vmul.f32 %v10494_v43, %v5658_v47  ;;  %v5763_v31 = vmul.f32 %v10497_v7, %v5658_v47  ;;  %v5683_v62 = vrot.slane %v5670_v6, 1  ;;  %v5714_v34 = vrot.slane %v5701_v61, 2 }
 0x63d   :  { %5649 = vst.msk [vmem:[#allocation8 + $0x14] sm:$0x1] %vm10642_vm13, %v5637_v56  ;;  %v5756_v58 = vadd.f32 %v5744_v60, %v5725_v54  ;;  %vm10647_vm12 = vcmask 1043456   ;;  %v5664_v24 = vmul.f32 %v7955_v36, %v10486_v19  ;;  %vm5827_vm15 = vcmask 1041409  }
 0x63e   :  { %v5775_v55 = vsel %vm10647_vm12, %v5773_v27, %v5774_v4  ;;  %v5684_v44 = vsel %vm190_vm2, %v5681_v52, %v5683_v62  ;;  %v5745_v50 = vrot.slane %v5732_v0, 3  ;;  %v5776_v16 = vrot.slane %v5763_v31, 4  ;;  %vm10650_vm5 = vmmov %vm10647_vm12 }
 0x63f   :  { %v5787_v8 = vadd.f32 %v5775_v55, %v5756_v58  ;;  %v5695_v63 = vadd.f32 %v5684_v44, %v5664_v24  ;;  %v5715_v11 = vsel %vm10648_vm0, %v5712_v42, %v5714_v34  ;;  %vm10653_vm4 = vmmov %vm10650_vm5  ;;  %v5817_v55 = vlaneseq }
 0x640   :  { %v5746_v25 = vsel %vm10649_vm8, %v5743_v41, %v5745_v50  ;;  %v5777_v36 = vsel %vm10650_vm5, %v5774_v4, %v5776_v16  ;;  %vm10656_vm6 = vmmov %vm10653_vm4  ;;  %vm5830_vm3 = vcmask 123904  }
 0x641   :  { %v5792_v38 = vsel %vm5791_vm11, %v5787_v8, 0.0  ;;  %v5726_v57 = vadd.f32 %v5715_v11, %v5695_v63  ;;  %v5818_v8 = vand.u32 127, %v5817_v55 }
 0x642   :  { %5793 = vadd.xlane.f32.xlu0 %v5792_v38 }
 0x643   :  { %v5653_v17 = vld [vmem:[#allocation8 + $0xc] sm:$0xff]   ;;  %v5757_v53 = vadd.f32 %v5746_v25, %v5726_v57  ;;  %v5820_v38 = vadd.s32 4294967288, %v5818_v8 }
 0x644   :  { %v5659_v23 = vunpack.c.l.bf16 %v5653_v17  ;;  %v5660_v40 = vunpack.c.h.bf16 %v5653_v17  ;;  %v5655_v2 = vld [vmem:[#allocation8 + $0x14] sm:$0x3] }
 0x645   :  { %v5661_v47 = vunpack.c.l.bf16 %v5655_v2  ;;  %v5788_v46 = vadd.f32 %v5777_v36, %v5757_v53 }
 0x646   :  { %v5671_v49 = vmul.f32 %v10488_v15, %v5659_v23  ;;  %v5672_v51 = vmul.f32 %v10488_v15, %v5660_v40  ;;  %v5702_v3 = vmul.f32 %v10491_v30, %v5659_v23  ;;  %v5703_v37 = vmul.f32 %v10491_v30, %v5660_v40 }
 0x647   :  { %v5733_v10 = vmul.f32 %v10494_v43, %v5659_v23  ;;  %v5734_v14 = vmul.f32 %v10494_v43, %v5660_v40  ;;  %v5764_v9 = vmul.f32 %v10497_v7, %v5659_v23  ;;  %v5795_v5 = vsel %vm5791_vm11, %v5788_v46, 0.0 }
 0x648   :  { %v5685_v12 = vrot.slane %v5671_v49, 1  ;;  %v5686_v35 = vrot.slane %v5672_v51, 1  ;;  %v5716_v59 = vrot.slane %v5702_v3, 2  ;;  %v5665_v22 = vmul.f32 %v10486_v19, %v5659_v23  ;;  %5796 = vadd.xlane.f32.xlu1 %v5795_v5 }
 0x649   :  { %v5717_v52 = vrot.slane %v5703_v37, 2  ;;  %v5747_v48 = vrot.slane %v5733_v10, 3  ;;  %v5748_v42 = vrot.slane %v5734_v14, 3  ;;  %v5765_v45 = vmul.f32 %v10497_v7, %v5660_v40 }
 0x64a   :  { %v5687_v28 = vsel %vm190_vm2, %v5685_v12, %v5686_v35  ;;  %v5778_v33 = vrot.slane %v5764_v9, 4  ;;  %v5673_v29 = vmul.f32 %v10488_v15, %v5661_v47  ;;  %v5704_v21 = vmul.f32 %v10491_v30, %v5661_v47 }
 0x64b   :  { %v5696_v20 = vadd.f32 %v5687_v28, %v5665_v22  ;;  %v5718_v1 = vsel %vm10651_vm9, %v5716_v59, %v5717_v52  ;;  %v5779_v18 = vrot.slane %v5765_v45, 4  ;;  %v5735_v13 = vmul.f32 %v10494_v43, %v5661_v47 }
 0x64c   :  { %v5688_v39 = vrot.slane %v5673_v29, 1  ;;  %v5749_v56 = vsel %vm10652_vm10, %v5747_v48, %v5748_v42  ;;  %v5666_v27 = vmul.f32 %v10486_v19, %v5660_v40  ;;  %v5719_v4 = vrot.slane %v5704_v21, 2 }
 0x64d   :  { %v5727_v41 = vadd.f32 %v5718_v1, %v5696_v20  ;;  %v5766_v54 = vmul.f32 %v10497_v7, %v5661_v47  ;;  %v5750_v15 = vrot.slane %v5735_v13, 3  ;;  %v5780_v60 = vsel %vm10653_vm4, %v5778_v33, %v5779_v18 }
 0x64e   :  { %v5689_v61 = vsel %vm190_vm2, %v5686_v35, %v5688_v39  ;;  %v5720_v30 = vsel %vm10654_vm1, %v5717_v52, %v5719_v4  ;;  %vm5822_vm2 = vcmask 130112  }
 0x64f   :  { %v5758_v6 = vadd.f32 %v5749_v56, %v5727_v41  ;;  %v5697_v0 = vadd.f32 %v5689_v61, %v5666_v27  ;;  %v5781_v32 = vrot.slane %v5766_v54, 4  ;;  %v5751_v58 = vsel %vm10655_vm7, %v5748_v42, %v5750_v15 }
 0x651   :  { %v5789_v31 = vadd.f32 %v5780_v60, %v5758_v6  ;;  %v5728_v43 = vadd.f32 %v5720_v30, %v5697_v0  ;;  %v5782_v7 = vsel %vm10656_vm6, %v5779_v18, %v5781_v32 }
 0x653   :  { %v5798_v26 = vsel %vm5791_vm11, %v5789_v31, 0.0  ;;  %v5759_v19 = vadd.f32 %v5751_v58, %v5728_v43 }
 0x654   :  { %5799 = vadd.xlane.f32.xlu2 %v5798_v26 }
 0x655   :  { %v5790_v62 = vadd.f32 %v5782_v7, %v5759_v19 }
 0x657   :  { %v5801_v34 = vsel %vm5791_vm11, %v5790_v62, 0.0 }
 0x65c   :  { %5802 = vadd.xlane.f32.xlu2 %v5801_v34 }
 0x65e   :  { %s7973_s7 = spop %7972 }
 0x65f   :  { %v5807_v44 = vstv %s7973_s7 }
 0x6b5   :  { %v5794_v50 = vpop.xlane.xlu0 %5793 }
 0x6b6   :  { %v5809_v16 = vadd.f32 %v5807_v44, %v5794_v50 }
 0x6b8   :  { %v5819_v25 = vperm.slane %v5809_v16, %v5818_v8 }
 0x6bb   :  { %v5797_v63 = vpop.xlane.xlu1 %5796 }
 0x6bc   :  { %v5810_v11 = vadd.f32 %v5807_v44, %v5797_v63 }
 0x6be   :  { %v5821_v23 = vperm.slane %v5810_v11, %v5820_v38 }
 0x6c0   :  { %v5823_v36 = vsel %vm5822_vm2, %v5821_v23, %v5819_v25 }
 0x6c7   :  { %v5800_v24 = vpop.xlane.xlu2 %5799 }
 0x6c8   :  { %v5811_v57 = vadd.f32 %v5807_v44, %v5800_v24 }
 0x6ca   :  { %v5824_v2 = vperm.slane %v5811_v57, %v5818_v8 }
 0x6cf   :  { %v5803_v17 = vpop.xlane.xlu2 %5802 }
 0x6d0   :  { %v5812_v40 = vadd.f32 %v5807_v44, %v5803_v17 }
 0x6d2   :  { %v5825_v53 = vperm.slane %v5812_v40, %v5820_v38 }
 0x6d4   :  { %v5826_v49 = vsel %vm5822_vm2, %v5825_v53, %v5824_v2 }
 0x6d5   :  { %v5828_v51 = vsel %vm5827_vm15, %v5826_v49, %v5823_v36 }
 0x6d6   :  { %5831 = vst.msk [vmem:[#allocation15] sm:$0x3] %vm5830_vm3, %v5828_v51 }
 0x6d7   :  { %5842 = dma.vmem_to_hbm [thread:$0]  %s5838_s22, 32, %s5840_s23, [#allocation11]  }
 0x6d8   :  { %8284 = dma.done.wait [#allocation11], 32  }
 0x6d9   :  { %8285 = vsyncadd [#allocation11], 4294967264 }
 0x6da   :  { %5847 = vsyncpa [#allocation10], 1 }
 0x6db   :  { %5848 = vsyncpa [#allocation13], 1 }
 0x6dc   :  { %5849 = vsyncpa [#allocation11], 1 }

</bundles_post_ra>
